<compile_context>
chip_gen: v6e
topology: v6e:2x2x1
jax: 0.10.0
libtpu: 0.0.40
codegen_flags: <defaults>
</compile_context>

<pallas_src>
import functools

import jax
import jax.numpy as jnp
from jax.experimental import pallas as pl
from jax.experimental.pallas import tpu as pltpu


# ----------------------------------------------------------------------------
# small helpers
# ----------------------------------------------------------------------------
def _round_up(v, m):
    return (v + m - 1) // m * m


def _pack_conv_weight(w, cp_in, cp_out):
    """(KH,KW,Cin,Cout) -> zero-padded (KH*KW*cp_in, cp_out) bf16 for one matmul."""
    kh, kw, ci, co = w.shape
    w = jnp.pad(w, ((0, 0), (0, 0), (0, cp_in - ci), (0, cp_out - co)))
    return w.reshape(kh * kw * cp_in, cp_out).astype(jnp.bfloat16)


def _pad_vec(v, cp):
    return jnp.pad(v, (0, cp - v.shape[0])).astype(jnp.float32)


def _finalize_bn(stats, gamma_p, beta_p, count, eps):
    """Per-channel scale/shift from per-image (sum, sumsq). Tiny O(C) JAX math."""
    s = jnp.sum(stats.astype(jnp.float32), axis=0)            # (2, cp)
    mean = s[0] / count
    var = jnp.maximum(s[1] / count - mean * mean, 0.0)         # biased var (train fwd)
    scale = gamma_p * jax.lax.rsqrt(var + eps)
    shift = beta_p - mean * scale
    cp = scale.shape[0]
    return scale.reshape(1, cp), shift.reshape(1, cp)


# ----------------------------------------------------------------------------
# in-kernel im2col (single MXU contraction per conv)
# ----------------------------------------------------------------------------
def _im2col_3x3(xpad_ref, ho, wo, stride):
    """Build (ho*wo, 9*C) bf16 im2col matrix from a zero-padded f32 VMEM scratch."""
    taps = []
    for dy in range(3):
        for dx in range(3):
            if stride == 1:
                t = xpad_ref[dy:dy + ho, dx:dx + wo, :]
            else:
                # TODO(synk): for stride>1 a DMA-side strided gather would avoid
                # in-kernel relayout; acceptable here (cold path).
                t = xpad_ref[pl.ds(dy, ho, stride), pl.ds(dx, wo, stride), :]
            taps.append(t.astype(jnp.bfloat16).reshape(ho * wo, t.shape[-1]))
    if len(taps) == 1:
        return taps[0]
    return jnp.concatenate(taps, axis=-1)


# ----------------------------------------------------------------------------
# pass A: conv0 (3x3, stride) + optional 1x1 transform conv + BN statistics
# ----------------------------------------------------------------------------
def _pass_a_kernel(*refs, h, w, ho, wo, stride, cin, has_transform):
    if has_transform:
        (x_ref, w0_ref, wt_ref,
         raw0_ref, stats0_ref, rawt_ref, statst_ref, xpad_ref) = refs
    else:
        x_ref, w0_ref, raw0_ref, stats0_ref, xpad_ref = refs

    cp_out = raw0_ref.shape[-1]

    # Zero-padded copy of this image in VMEM (spatial halo + channel pad to 128).
    xpad_ref[...] = jnp.zeros(xpad_ref.shape, xpad_ref.dtype)
    xpad_ref[1:h + 1, 1:w + 1, 0:cin] = x_ref[0]

    # conv3x3(stride): one im2col matmul, bf16 in / f32 accumulate on the MXU.
    patches = _im2col_3x3(xpad_ref, ho, wo, stride)            # (ho*wo, 9*cp_in)
    acc0 = jnp.dot(patches, w0_ref[...], preferred_element_type=jnp.float32)
    raw0_ref[0] = acc0.reshape(ho, wo, cp_out).astype(raw0_ref.dtype)
    stats0_ref[0, 0:1, :] = jnp.sum(acc0, axis=0, keepdims=True)
    stats0_ref[0, 1:2, :] = jnp.sum(acc0 * acc0, axis=0, keepdims=True)

    if has_transform:
        # 1x1 conv, stride s: the "center" taps of the padded image.
        if stride == 1:
            ctr = xpad_ref[1:h + 1, 1:w + 1, :]
        else:
            ctr = xpad_ref[pl.ds(1, ho, stride), pl.ds(1, wo, stride), :]
        ctr = ctr.astype(jnp.bfloat16).reshape(ho * wo, ctr.shape[-1])
        acct = jnp.dot(ctr, wt_ref[...], preferred_element_type=jnp.float32)
        rawt_ref[0] = acct.reshape(ho, wo, cp_out).astype(rawt_ref.dtype)
        statst_ref[0, 0:1, :] = jnp.sum(acct, axis=0, keepdims=True)
        statst_ref[0, 1:2, :] = jnp.sum(acct * acct, axis=0, keepdims=True)


# ----------------------------------------------------------------------------
# pass B: BN0 (FMA) + ReLU + conv1 (3x3, stride 1) + BN1 statistics
# ----------------------------------------------------------------------------
def _pass_b_kernel(raw0_ref, scale0_ref, shift0_ref, w1_ref,
                   raw1_ref, stats1_ref, opad_ref, *, ho, wo):
    cp = raw1_ref.shape[-1]

    # BN0 folded into a single multiply-add, then ReLU; staged (zero halo) in VMEM.
    y0 = raw0_ref[0].astype(jnp.float32) * scale0_ref[...] + shift0_ref[...]
    y0 = jnp.maximum(y0, 0.0)
    opad_ref[...] = jnp.zeros(opad_ref.shape, opad_ref.dtype)
    opad_ref[1:ho + 1, 1:wo + 1, :] = y0

    patches = _im2col_3x3(opad_ref, ho, wo, 1)
    acc1 = jnp.dot(patches, w1_ref[...], preferred_element_type=jnp.float32)
    raw1_ref[0] = acc1.reshape(ho, wo, cp).astype(raw1_ref.dtype)
    stats1_ref[0, 0:1, :] = jnp.sum(acc1, axis=0, keepdims=True)
    stats1_ref[0, 1:2, :] = jnp.sum(acc1 * acc1, axis=0, keepdims=True)


# ----------------------------------------------------------------------------
# pass C: BN1 (FMA) + residual (BN_t FMA or identity) + add + ReLU
# ----------------------------------------------------------------------------
def _pass_c_kernel(*refs, cout, has_transform):
    if has_transform:
        (raw1_ref, rawt_ref, scale1_ref, shift1_ref,
         scalet_ref, shiftt_ref, out_ref) = refs
    else:
        raw1_ref, x_ref, scale1_ref, shift1_ref, out_ref = refs

    cp = raw1_ref.shape[-1]
    y1 = raw1_ref[0].astype(jnp.float32) * scale1_ref[...] + shift1_ref[...]
    if has_transform:
        res = rawt_ref[0].astype(jnp.float32) * scalet_ref[...] + shiftt_ref[...]
        y = y1 + res
        if cout < cp:
            y = y[..., :cout]
    else:
        y = y1[..., :cout] if cout < cp else y1
        y = y + x_ref[0].astype(jnp.float32)                  # identity residual
    out_ref[0] = jnp.maximum(y, 0.0).astype(out_ref.dtype)


# ----------------------------------------------------------------------------
# BasicBlock parameters + forward
# ----------------------------------------------------------------------------
def basic_block_init(key, in_channels, out_channels):
    k0, k1, k2, k3, k4, k5 = jax.random.split(key, 6)
    p = {
        "w0": 0.1 * jax.random.normal(k0, (3, 3, in_channels, out_channels), jnp.float32),
        "g0": 1.0 + 0.1 * jax.random.normal(k3, (out_channels,), jnp.float32),
        "b0": 0.1 * jax.random.normal(k4, (out_channels,), jnp.float32),
        "w1": 0.1 * jax.random.normal(k1, (3, 3, out_channels, out_channels), jnp.float32),
        "g1": jnp.ones((out_channels,), jnp.float32),
        "b1": jnp.zeros((out_channels,), jnp.float32),
    }
    if in_channels != out_channels:
        p["wt"] = 0.1 * jax.random.normal(k2, (1, 1, in_channels, out_channels), jnp.float32)
        p["gt"] = 1.0 + 0.1 * jax.random.normal(k5, (out_channels,), jnp.float32)
        p["bt"] = jnp.zeros((out_channels,), jnp.float32)
    return p


def basic_block_forward(params, x_nchw, *, stride=1, eps=1e-5):
    """x_nchw: (N, Cin, H, W) like the PyTorch module; returns (N, Cout, Ho, Wo)."""
    x = jnp.transpose(x_nchw, (0, 2, 3, 1)).astype(jnp.float32)   # NCHW -> NHWC
    n, h, w_sz, cin = x.shape
    cout = params["w0"].shape[-1]
    has_transform = "wt" in params
    if not has_transform and stride != 1:
        # mirrors the PyTorch module: identity residual cannot change resolution
        raise ValueError("stride != 1 requires in_channels != out_channels")

    ho = (h + 2 - 3) // stride + 1
    wo = (w_sz + 2 - 3) // stride + 1
    cp_in = _round_up(cin, 128)            # lane-dense internal channel dims
    cp = _round_up(cout, 128)
    raw_dt = jnp.bfloat16                  # HBM dtype of pre-BN intermediates
    count = float(n * ho * wo)

    w0p = _pack_conv_weight(params["w0"], cp_in, cp)
    w1p = _pack_conv_weight(params["w1"], cp, cp)
    g0, b0 = _pad_vec(params["g0"], cp), _pad_vec(params["b0"], cp)
    g1, b1 = _pad_vec(params["g1"], cp), _pad_vec(params["b1"], cp)

    cparams = pltpu.CompilerParams(
        dimension_semantics=("parallel",),            # v7x: shard batch over 2 TCs
        vmem_limit_bytes=40 * 1024 * 1024)            # v5e default is only 16 MiB

    img_spec_in = pl.BlockSpec((1, h, w_sz, cin), lambda i: (i, 0, 0, 0))
    img_spec_cp = pl.BlockSpec((1, ho, wo, cp), lambda i: (i, 0, 0, 0))
    stats_spec = pl.BlockSpec((1, 2, cp), lambda i: (i, 0, 0))
    vec_spec = pl.BlockSpec((1, cp), lambda i: (0, 0))

    # ---------------- pass A: conv0 (+ 1x1 transform) + BN statistics ----------
    in_specs = [img_spec_in, pl.BlockSpec((9 * cp_in, cp), lambda i: (0, 0))]
    args = [x, w0p]
    out_shape = [jax.ShapeDtypeStruct((n, ho, wo, cp), raw_dt),
                 jax.ShapeDtypeStruct((n, 2, cp), jnp.float32)]
    out_specs = [img_spec_cp, stats_spec]
    if has_transform:
        in_specs.append(pl.BlockSpec((cp_in, cp), lambda i: (0, 0)))
        args.append(_pack_conv_weight(params["wt"], cp_in, cp))
        out_shape += [jax.ShapeDtypeStruct((n, ho, wo, cp), raw_dt),
                      jax.ShapeDtypeStruct((n, 2, cp), jnp.float32)]
        out_specs += [img_spec_cp, stats_spec]

    res_a = pl.pallas_call(
        functools.partial(_pass_a_kernel, h=h, w=w_sz, ho=ho, wo=wo,
                          stride=stride, cin=cin, has_transform=has_transform),
        grid=(n,),
        in_specs=in_specs,
        out_specs=tuple(out_specs),
        out_shape=tuple(out_shape),
        scratch_shapes=[pltpu.VMEM((h + 2, w_sz + 2, cp_in), jnp.float32)],
        compiler_params=cparams,
    )(*args)
    if has_transform:
        raw0, stats0, rawt, statst = res_a
    else:
        raw0, stats0 = res_a

    scale0, shift0 = _finalize_bn(stats0, g0, b0, count, eps)

    # ---------------- pass B: BN0 + ReLU + conv1 + BN1 statistics ---------------
    raw1, stats1 = pl.pallas_call(
        functools.partial(_pass_b_kernel, ho=ho, wo=wo),
        grid=(n,),
        in_specs=[img_spec_cp, vec_spec, vec_spec,
                  pl.BlockSpec((9 * cp, cp), lambda i: (0, 0))],
        out_specs=(img_spec_cp, stats_spec),
        out_shape=(jax.ShapeDtypeStruct((n, ho, wo, cp), raw_dt),
                   jax.ShapeDtypeStruct((n, 2, cp), jnp.float32)),
        scratch_shapes=[pltpu.VMEM((ho + 2, wo + 2, cp), jnp.float32)],
        compiler_params=cparams,
    )(raw0, scale0, shift0, w1p)

    scale1, shift1 = _finalize_bn(stats1, g1, b1, count, eps)

    # ---------------- pass C: BN1 + residual (+ BN_t) + add + ReLU --------------
    if has_transform:
        gt, bt = _pad_vec(params["gt"], cp), _pad_vec(params["bt"], cp)
        scalet, shiftt = _finalize_bn(statst, gt, bt, count, eps)
        args_c = [raw1, rawt, scale1, shift1, scalet, shiftt]
        in_specs_c = [img_spec_cp, img_spec_cp,
                      vec_spec, vec_spec, vec_spec, vec_spec]
    else:
        args_c = [raw1, x, scale1, shift1]
        in_specs_c = [img_spec_cp, img_spec_in, vec_spec, vec_spec]

    out = pl.pallas_call(
        functools.partial(_pass_c_kernel, cout=cout, has_transform=has_transform),
        grid=(n,),
        in_specs=in_specs_c,
        out_specs=pl.BlockSpec((1, ho, wo, cout), lambda i: (i, 0, 0, 0)),
        out_shape=jax.ShapeDtypeStruct((n, ho, wo, cout), x.dtype),
        compiler_params=cparams,
    )(*args_c)

    return jnp.transpose(out, (0, 3, 1, 2))            # NHWC -> NCHW


# ----------------------------------------------------------------------------
# Pure-JAX f32 reference (correctness sanity check)
# ----------------------------------------------------------------------------
def _ref_conv_bn(x, w, gamma, beta, *, stride, padding, relu, residual=None, eps=1e-5):
    out = jax.lax.conv_general_dilated(
        x, w, window_strides=(stride, stride),
        padding=[(padding, padding), (padding, padding)],
        dimension_numbers=("NHWC", "HWIO", "NHWC"))
    mean = out.mean(axis=(0, 1, 2), keepdims=True)
    var = ((out - mean) ** 2).mean(axis=(0, 1, 2), keepdims=True)
    y = gamma * (out - mean) * jax.lax.rsqrt(var + eps) + beta
    if residual is not None:
        y = y + residual
    if relu:
        y = jnp.maximum(y, 0.0)
    return y


def _ref_forward(params, x_nchw, *, stride=1):
    x = jnp.transpose(x_nchw, (0, 2, 3, 1))
    out0 = _ref_conv_bn(x, params["w0"], params["g0"], params["b0"],
                        stride=stride, padding=1, relu=True)
    if "wt" in params:
        residual = _ref_conv_bn(x, params["wt"], params["gt"], params["bt"],
                                stride=stride, padding=0, relu=False)
    else:
        residual = x
    out = _ref_conv_bn(out0, params["w1"], params["g1"], params["b1"],
                       stride=1, padding=1, relu=True, residual=residual)
    return jnp.transpose(out, (0, 3, 1, 2))


if __name__ == "__main__":
    key = jax.random.PRNGKey(0)
    k_x, k_p, k_x2, k_p2 = jax.random.split(key, 4)

    fwd = jax.jit(lambda p, xx: basic_block_forward(p, xx, stride=1))

    # Case 1: in_channels != out_channels -> 1x1 transform residual path.
    n, cin, cout, h, w = 2, 4, 8, 16, 16
    x = jax.random.normal(k_x, (n, cin, h, w), jnp.float32)          # NCHW
    params = basic_block_init(k_p, cin, cout)
    out = jax.block_until_ready(fwd(params, x))
    assert out.shape == (n, cout, h, w), out.shape
    ref = jax.block_until_ready(_ref_forward(params, x, stride=1))
    # bf16 MXU inputs + bf16 HBM intermediates -> loose tolerance vs f32 reference.
    assert jnp.allclose(out, ref, rtol=1e-1, atol=1e-1), \
        float(jnp.max(jnp.abs(out - ref)))

    # Case 2: in_channels == out_channels -> identity residual path.
    x2 = jax.random.normal(k_x2, (n, cout, h, w), jnp.float32)
    params2 = basic_block_init(k_p2, cout, cout)
    out2 = jax.block_until_ready(fwd(params2, x2))
    assert out2.shape == (n, cout, h, w), out2.shape
    ref2 = jax.block_until_ready(_ref_forward(params2, x2, stride=1))
    assert jnp.allclose(out2, ref2, rtol=1e-1, atol=1e-1), \
        float(jnp.max(jnp.abs(out2 - ref2)))

    print("KERNEL_OK")
</pallas_src>

<mosaic_0001>
module attributes {stable_mosaic.version = 11 : i64} {
  func.func @_pass_a_kernel(%arg0: i32, %arg1: memref<1x16x16x4xf32, #tpu.memory_space<vmem>>, %arg2: memref<1152x128xbf16, #tpu.memory_space<vmem>>, %arg3: memref<128x128xbf16, #tpu.memory_space<vmem>>, %arg4: memref<1x16x16x128xbf16, #tpu.memory_space<vmem>>, %arg5: memref<1x2x128xf32, #tpu.memory_space<vmem>>, %arg6: memref<1x16x16x128xbf16, #tpu.memory_space<vmem>>, %arg7: memref<1x2x128xf32, #tpu.memory_space<vmem>>, %arg8: memref<18x18x128xf32, #tpu.memory_space<vmem>>) attributes {dimension_semantics = [#tpu.dimension_semantics<parallel>], iteration_bounds = array<i64: 2>, scalar_prefetch = 0 : i64, scratch_operands = 1 : i64, tpu.core_type = #tpu.core_type<tc>, window_params = [{transform_indices = @transform_0, window_bounds = array<i64: 1, 16, 16, 4>}, {pipeline_mode = #tpu.pipeline_mode<synchronous>, transform_indices = @transform_1, window_bounds = array<i64: 1152, 128>}, {pipeline_mode = #tpu.pipeline_mode<synchronous>, transform_indices = @transform_2, window_bounds = array<i64: 128, 128>}, {transform_indices = @transform_3, window_bounds = array<i64: 1, 16, 16, 128>}, {transform_indices = @transform_4, window_bounds = array<i64: 1, 2, 128>}, {transform_indices = @transform_5, window_bounds = array<i64: 1, 16, 16, 128>}, {transform_indices = @transform_6, window_bounds = array<i64: 1, 2, 128>}]} {
    %cst = arith.constant 0.000000e+00 : f32
    %0 = vector.broadcast %cst : f32 to vector<18x18x128xf32>
    %c0 = arith.constant 0 : index
    %c0_0 = arith.constant 0 : index
    %c0_1 = arith.constant 0 : index
    %1 = vector.load %arg8[%c0, %c0_0, %c0_1] : memref<18x18x128xf32, #tpu.memory_space<vmem>>, vector<18x18x128xf32>
    tpu.vector_store %arg8[%c0, %c0_0, %c0_1], %0 {strides = array<i32>} : memref<18x18x128xf32, #tpu.memory_space<vmem>>, vector<18x18x128xf32>,
    %c0_2 = arith.constant 0 : index
    %c0_3 = arith.constant 0 : index
    %c0_4 = arith.constant 0 : index
    %c0_5 = arith.constant 0 : index
    %2 = vector.load %arg1[%c0_2, %c0_3, %c0_4, %c0_5] : memref<1x16x16x4xf32, #tpu.memory_space<vmem>>, vector<1x16x16x4xf32>
    %3 = vector.shape_cast %2 : vector<1x16x16x4xf32> to vector<16x16x4xf32>
    %c1 = arith.constant 1 : index
    %c1_6 = arith.constant 1 : index
    %c0_7 = arith.constant 0 : index
    %4 = vector.load %arg8[%c1, %c1_6, %c0_7] : memref<18x18x128xf32, #tpu.memory_space<vmem>>, vector<16x16x4xf32>
    tpu.vector_store %arg8[%c1, %c1_6, %c0_7], %3 {strides = array<i32>} : memref<18x18x128xf32, #tpu.memory_space<vmem>>, vector<16x16x4xf32>,
    %c0_8 = arith.constant 0 : index
    %c0_9 = arith.constant 0 : index
    %c0_10 = arith.constant 0 : index
    %5 = vector.load %arg8[%c0_8, %c0_9, %c0_10] : memref<18x18x128xf32, #tpu.memory_space<vmem>>, vector<16x16x128xf32>
    %6 = arith.truncf %5 : vector<16x16x128xf32> to vector<16x16x128xbf16>
    %7 = vector.shape_cast %6 : vector<16x16x128xbf16> to vector<256x128xbf16>
    %c0_11 = arith.constant 0 : index
    %c1_12 = arith.constant 1 : index
    %c0_13 = arith.constant 0 : index
    %8 = vector.load %arg8[%c0_11, %c1_12, %c0_13] : memref<18x18x128xf32, #tpu.memory_space<vmem>>, vector<16x16x128xf32>
    %9 = arith.truncf %8 : vector<16x16x128xf32> to vector<16x16x128xbf16>
    %10 = vector.shape_cast %9 : vector<16x16x128xbf16> to vector<256x128xbf16>
    %c0_14 = arith.constant 0 : index
    %c2 = arith.constant 2 : index
    %c0_15 = arith.constant 0 : index
    %11 = vector.load %arg8[%c0_14, %c2, %c0_15] : memref<18x18x128xf32, #tpu.memory_space<vmem>>, vector<16x16x128xf32>
    %12 = arith.truncf %11 : vector<16x16x128xf32> to vector<16x16x128xbf16>
    %13 = vector.shape_cast %12 : vector<16x16x128xbf16> to vector<256x128xbf16>
    %c1_16 = arith.constant 1 : index
    %c0_17 = arith.constant 0 : index
    %c0_18 = arith.constant 0 : index
    %14 = vector.load %arg8[%c1_16, %c0_17, %c0_18] : memref<18x18x128xf32, #tpu.memory_space<vmem>>, vector<16x16x128xf32>
    %15 = arith.truncf %14 : vector<16x16x128xf32> to vector<16x16x128xbf16>
    %16 = vector.shape_cast %15 : vector<16x16x128xbf16> to vector<256x128xbf16>
    %c1_19 = arith.constant 1 : index
    %c1_20 = arith.constant 1 : index
    %c0_21 = arith.constant 0 : index
    %17 = vector.load %arg8[%c1_19, %c1_20, %c0_21] : memref<18x18x128xf32, #tpu.memory_space<vmem>>, vector<16x16x128xf32>
    %18 = arith.truncf %17 : vector<16x16x128xf32> to vector<16x16x128xbf16>
    %19 = vector.shape_cast %18 : vector<16x16x128xbf16> to vector<256x128xbf16>
    %c1_22 = arith.constant 1 : index
    %c2_23 = arith.constant 2 : index
    %c0_24 = arith.constant 0 : index
    %20 = vector.load %arg8[%c1_22, %c2_23, %c0_24] : memref<18x18x128xf32, #tpu.memory_space<vmem>>, vector<16x16x128xf32>
    %21 = arith.truncf %20 : vector<16x16x128xf32> to vector<16x16x128xbf16>
    %22 = vector.shape_cast %21 : vector<16x16x128xbf16> to vector<256x128xbf16>
    %c2_25 = arith.constant 2 : index
    %c0_26 = arith.constant 0 : index
    %c0_27 = arith.constant 0 : index
    %23 = vector.load %arg8[%c2_25, %c0_26, %c0_27] : memref<18x18x128xf32, #tpu.memory_space<vmem>>, vector<16x16x128xf32>
    %24 = arith.truncf %23 : vector<16x16x128xf32> to vector<16x16x128xbf16>
    %25 = vector.shape_cast %24 : vector<16x16x128xbf16> to vector<256x128xbf16>
    %c2_28 = arith.constant 2 : index
    %c1_29 = arith.constant 1 : index
    %c0_30 = arith.constant 0 : index
    %26 = vector.load %arg8[%c2_28, %c1_29, %c0_30] : memref<18x18x128xf32, #tpu.memory_space<vmem>>, vector<16x16x128xf32>
    %27 = arith.truncf %26 : vector<16x16x128xf32> to vector<16x16x128xbf16>
    %28 = vector.shape_cast %27 : vector<16x16x128xbf16> to vector<256x128xbf16>
    %c2_31 = arith.constant 2 : index
    %c2_32 = arith.constant 2 : index
    %c0_33 = arith.constant 0 : index
    %29 = vector.load %arg8[%c2_31, %c2_32, %c0_33] : memref<18x18x128xf32, #tpu.memory_space<vmem>>, vector<16x16x128xf32>
    %30 = arith.truncf %29 : vector<16x16x128xf32> to vector<16x16x128xbf16>
    %31 = vector.shape_cast %30 : vector<16x16x128xbf16> to vector<256x128xbf16>
    %32 = tpu.concatenate %7, %10, %13, %16, %19, %22, %25, %28, %31 in 1 : vector<256x128xbf16>, vector<256x128xbf16>, vector<256x128xbf16>, vector<256x128xbf16>, vector<256x128xbf16>, vector<256x128xbf16>, vector<256x128xbf16>, vector<256x128xbf16>, vector<256x128xbf16> -> vector<256x1152xbf16>
    %c0_34 = arith.constant 0 : index
    %c0_35 = arith.constant 0 : index
    %33 = vector.load %arg2[%c0_34, %c0_35] : memref<1152x128xbf16, #tpu.memory_space<vmem>>, vector<1152x128xbf16>
    %cst_36 = arith.constant dense<0.000000e+00> : vector<256x128xf32>
    %34 = tpu.matmul %32, %33, %cst_36 {dimension_numbers = #tpu.dot_dimension_numbers<[1], [0], [0], [1], [0, 0, 1, 1], [], []>} : vector<256x1152xbf16>, vector<1152x128xbf16>, vector<256x128xf32> -> vector<256x128xf32>
    %35 = vector.shape_cast %34 : vector<256x128xf32> to vector<16x16x128xf32>
    %36 = arith.truncf %35 : vector<16x16x128xf32> to vector<16x16x128xbf16>
    %c0_37 = arith.constant 0 : index
    %c0_38 = arith.constant 0 : index
    %c0_39 = arith.constant 0 : index
    %c0_40 = arith.constant 0 : index
    %37 = vector.load %arg4[%c0_37, %c0_38, %c0_39, %c0_40] : memref<1x16x16x128xbf16, #tpu.memory_space<vmem>>, vector<1x16x16x128xbf16>
    %38 = vector.shape_cast %37 : vector<1x16x16x128xbf16> to vector<16x16x128xbf16>
    %39 = vector.shape_cast %36 : vector<16x16x128xbf16> to vector<1x16x16x128xbf16>
    tpu.vector_store %arg4[%c0_37, %c0_38, %c0_39, %c0_40], %39 {strides = array<i32>} : memref<1x16x16x128xbf16, #tpu.memory_space<vmem>>, vector<1x16x16x128xbf16>,
    %cst_41 = arith.constant dense<0.000000e+00> : vector<128xf32>
    %40 = vector.multi_reduction <add>, %34, %cst_41 [0] : vector<256x128xf32> to vector<128xf32>
    %41 = vector.shape_cast %40 : vector<128xf32> to vector<1x128xf32>
    %c0_42 = arith.constant 0 : index
    %c0_43 = arith.constant 0 : index
    %c0_44 = arith.constant 0 : index
    %42 = vector.load %arg5[%c0_42, %c0_43, %c0_44] : memref<1x2x128xf32, #tpu.memory_space<vmem>>, vector<1x1x128xf32>
    %43 = vector.shape_cast %42 : vector<1x1x128xf32> to vector<1x128xf32>
    %44 = vector.shape_cast %41 : vector<1x128xf32> to vector<1x1x128xf32>
    tpu.vector_store %arg5[%c0_42, %c0_43, %c0_44], %44 {strides = array<i32>} : memref<1x2x128xf32, #tpu.memory_space<vmem>>, vector<1x1x128xf32>,
    %45 = arith.mulf %34, %34 : vector<256x128xf32>
    %cst_45 = arith.constant dense<0.000000e+00> : vector<128xf32>
    %46 = vector.multi_reduction <add>, %45, %cst_45 [0] : vector<256x128xf32> to vector<128xf32>
    %47 = vector.shape_cast %46 : vector<128xf32> to vector<1x128xf32>
    %c0_46 = arith.constant 0 : index
    %c1_47 = arith.constant 1 : index
    %c0_48 = arith.constant 0 : index
    %48 = vector.load %arg5[%c0_46, %c1_47, %c0_48] : memref<1x2x128xf32, #tpu.memory_space<vmem>>, vector<1x1x128xf32>
    %49 = vector.shape_cast %48 : vector<1x1x128xf32> to vector<1x128xf32>
    %50 = vector.shape_cast %47 : vector<1x128xf32> to vector<1x1x128xf32>
    tpu.vector_store %arg5[%c0_46, %c1_47, %c0_48], %50 {strides = array<i32>} : memref<1x2x128xf32, #tpu.memory_space<vmem>>, vector<1x1x128xf32>,
    %c1_49 = arith.constant 1 : index
    %c1_50 = arith.constant 1 : index
    %c0_51 = arith.constant 0 : index
    %51 = vector.load %arg8[%c1_49, %c1_50, %c0_51] : memref<18x18x128xf32, #tpu.memory_space<vmem>>, vector<16x16x128xf32>
    %52 = arith.truncf %51 : vector<16x16x128xf32> to vector<16x16x128xbf16>
    %53 = vector.shape_cast %52 : vector<16x16x128xbf16> to vector<256x128xbf16>
    %c0_52 = arith.constant 0 : index
    %c0_53 = arith.constant 0 : index
    %54 = vector.load %arg3[%c0_52, %c0_53] : memref<128x128xbf16, #tpu.memory_space<vmem>>, vector<128x128xbf16>
    %cst_54 = arith.constant dense<0.000000e+00> : vector<256x128xf32>
    %55 = tpu.matmul %53, %54, %cst_54 {dimension_numbers = #tpu.dot_dimension_numbers<[1], [0], [0], [1], [0, 0, 1, 1], [], []>} : vector<256x128xbf16>, vector<128x128xbf16>, vector<256x128xf32> -> vector<256x128xf32>
    %56 = vector.shape_cast %55 : vector<256x128xf32> to vector<16x16x128xf32>
    %57 = arith.truncf %56 : vector<16x16x128xf32> to vector<16x16x128xbf16>
    %c0_55 = arith.constant 0 : index
    %c0_56 = arith.constant 0 : index
    %c0_57 = arith.constant 0 : index
    %c0_58 = arith.constant 0 : index
    %58 = vector.load %arg6[%c0_55, %c0_56, %c0_57, %c0_58] : memref<1x16x16x128xbf16, #tpu.memory_space<vmem>>, vector<1x16x16x128xbf16>
    %59 = vector.shape_cast %58 : vector<1x16x16x128xbf16> to vector<16x16x128xbf16>
    %60 = vector.shape_cast %57 : vector<16x16x128xbf16> to vector<1x16x16x128xbf16>
    tpu.vector_store %arg6[%c0_55, %c0_56, %c0_57, %c0_58], %60 {strides = array<i32>} : memref<1x16x16x128xbf16, #tpu.memory_space<vmem>>, vector<1x16x16x128xbf16>,
    %cst_59 = arith.constant dense<0.000000e+00> : vector<128xf32>
    %61 = vector.multi_reduction <add>, %55, %cst_59 [0] : vector<256x128xf32> to vector<128xf32>
    %62 = vector.shape_cast %61 : vector<128xf32> to vector<1x128xf32>
    %c0_60 = arith.constant 0 : index
    %c0_61 = arith.constant 0 : index
    %c0_62 = arith.constant 0 : index
    %63 = vector.load %arg7[%c0_60, %c0_61, %c0_62] : memref<1x2x128xf32, #tpu.memory_space<vmem>>, vector<1x1x128xf32>
    %64 = vector.shape_cast %63 : vector<1x1x128xf32> to vector<1x128xf32>
    %65 = vector.shape_cast %62 : vector<1x128xf32> to vector<1x1x128xf32>
    tpu.vector_store %arg7[%c0_60, %c0_61, %c0_62], %65 {strides = array<i32>} : memref<1x2x128xf32, #tpu.memory_space<vmem>>, vector<1x1x128xf32>,
    %66 = arith.mulf %55, %55 : vector<256x128xf32>
    %cst_63 = arith.constant dense<0.000000e+00> : vector<128xf32>
    %67 = vector.multi_reduction <add>, %66, %cst_63 [0] : vector<256x128xf32> to vector<128xf32>
    %68 = vector.shape_cast %67 : vector<128xf32> to vector<1x128xf32>
    %c0_64 = arith.constant 0 : index
    %c1_65 = arith.constant 1 : index
    %c0_66 = arith.constant 0 : index
    %69 = vector.load %arg7[%c0_64, %c1_65, %c0_66] : memref<1x2x128xf32, #tpu.memory_space<vmem>>, vector<1x1x128xf32>
    %70 = vector.shape_cast %69 : vector<1x1x128xf32> to vector<1x128xf32>
    %71 = vector.shape_cast %68 : vector<1x128xf32> to vector<1x1x128xf32>
    tpu.vector_store %arg7[%c0_64, %c1_65, %c0_66], %71 {strides = array<i32>} : memref<1x2x128xf32, #tpu.memory_space<vmem>>, vector<1x1x128xf32>,
    return
  }
  func.func @transform_0(%arg0: i32) -> (i32, i32, i32, i32) {
    %c0_i32 = arith.constant 0 : i32
    %c0_i32_0 = arith.constant 0 : i32
    %c0_i32_1 = arith.constant 0 : i32
    %c0_i32_2 = arith.constant 0 : i32
    return %arg0, %c0_i32, %c0_i32_0, %c0_i32_1 : i32, i32, i32, i32
  }
  func.func @transform_1(%arg0: i32) -> (i32, i32) {
    %c0_i32 = arith.constant 0 : i32
    %c0_i32_0 = arith.constant 0 : i32
    %c0_i32_1 = arith.constant 0 : i32
    return %c0_i32, %c0_i32_0 : i32, i32
  }
  func.func @transform_2(%arg0: i32) -> (i32, i32) {
    %c0_i32 = arith.constant 0 : i32
    %c0_i32_0 = arith.constant 0 : i32
    %c0_i32_1 = arith.constant 0 : i32
    return %c0_i32, %c0_i32_0 : i32, i32
  }
  func.func @transform_3(%arg0: i32) -> (i32, i32, i32, i32) {
    %c0_i32 = arith.constant 0 : i32
    %c0_i32_0 = arith.constant 0 : i32
    %c0_i32_1 = arith.constant 0 : i32
    %c0_i32_2 = arith.constant 0 : i32
    return %arg0, %c0_i32, %c0_i32_0, %c0_i32_1 : i32, i32, i32, i32
  }
  func.func @transform_4(%arg0: i32) -> (i32, i32, i32) {
    %c0_i32 = arith.constant 0 : i32
    %c0_i32_0 = arith.constant 0 : i32
    %c0_i32_1 = arith.constant 0 : i32
    return %arg0, %c0_i32, %c0_i32_0 : i32, i32, i32
  }
  func.func @transform_5(%arg0: i32) -> (i32, i32, i32, i32) {
    %c0_i32 = arith.constant 0 : i32
    %c0_i32_0 = arith.constant 0 : i32
    %c0_i32_1 = arith.constant 0 : i32
    %c0_i32_2 = arith.constant 0 : i32
    return %arg0, %c0_i32, %c0_i32_0, %c0_i32_1 : i32, i32, i32, i32
  }
  func.func @transform_6(%arg0: i32) -> (i32, i32, i32) {
    %c0_i32 = arith.constant 0 : i32
    %c0_i32_0 = arith.constant 0 : i32
    %c0_i32_1 = arith.constant 0 : i32
    return %arg0, %c0_i32, %c0_i32_0 : i32, i32, i32
  }
}

module attributes {stable_mosaic.version = 11 : i64} {
  func.func @_pass_b_kernel(%arg0: i32, %arg1: memref<1x16x16x128xbf16, #tpu.memory_space<vmem>>, %arg2: memref<1x128xf32, #tpu.memory_space<vmem>>, %arg3: memref<1x128xf32, #tpu.memory_space<vmem>>, %arg4: memref<1152x128xbf16, #tpu.memory_space<vmem>>, %arg5: memref<1x16x16x128xbf16, #tpu.memory_space<vmem>>, %arg6: memref<1x2x128xf32, #tpu.memory_space<vmem>>, %arg7: memref<18x18x128xf32, #tpu.memory_space<vmem>>) attributes {dimension_semantics = [#tpu.dimension_semantics<parallel>], iteration_bounds = array<i64: 2>, scalar_prefetch = 0 : i64, scratch_operands = 1 : i64, tpu.core_type = #tpu.core_type<tc>, window_params = [{transform_indices = @transform_0, window_bounds = array<i64: 1, 16, 16, 128>}, {pipeline_mode = #tpu.pipeline_mode<synchronous>, transform_indices = @transform_1, window_bounds = array<i64: 1, 128>}, {pipeline_mode = #tpu.pipeline_mode<synchronous>, transform_indices = @transform_2, window_bounds = array<i64: 1, 128>}, {pipeline_mode = #tpu.pipeline_mode<synchronous>, transform_indices = @transform_3, window_bounds = array<i64: 1152, 128>}, {transform_indices = @transform_4, window_bounds = array<i64: 1, 16, 16, 128>}, {transform_indices = @transform_5, window_bounds = array<i64: 1, 2, 128>}]} {
    %c0 = arith.constant 0 : index
    %c0_0 = arith.constant 0 : index
    %c0_1 = arith.constant 0 : index
    %c0_2 = arith.constant 0 : index
    %0 = vector.load %arg1[%c0, %c0_0, %c0_1, %c0_2] : memref<1x16x16x128xbf16, #tpu.memory_space<vmem>>, vector<1x16x16x128xbf16>
    %1 = vector.shape_cast %0 : vector<1x16x16x128xbf16> to vector<16x16x128xbf16>
    %2 = arith.extf %1 : vector<16x16x128xbf16> to vector<16x16x128xf32>
    %c0_3 = arith.constant 0 : index
    %c0_4 = arith.constant 0 : index
    %3 = vector.load %arg2[%c0_3, %c0_4] : memref<1x128xf32, #tpu.memory_space<vmem>>, vector<1x128xf32>
    %4 = vector.shape_cast %3 : vector<1x128xf32> to vector<1x1x128xf32>
    %5 = vector.broadcast %4 : vector<1x1x128xf32> to vector<16x16x128xf32>
    %6 = arith.mulf %2, %5 : vector<16x16x128xf32>
    %c0_5 = arith.constant 0 : index
    %c0_6 = arith.constant 0 : index
    %7 = vector.load %arg3[%c0_5, %c0_6] : memref<1x128xf32, #tpu.memory_space<vmem>>, vector<1x128xf32>
    %8 = vector.shape_cast %7 : vector<1x128xf32> to vector<1x1x128xf32>
    %9 = vector.broadcast %8 : vector<1x1x128xf32> to vector<16x16x128xf32>
    %10 = arith.addf %6, %9 : vector<16x16x128xf32>
    %cst = arith.constant 0.000000e+00 : f32
    %11 = vector.broadcast %cst : f32 to vector<16x16x128xf32>
    %12 = arith.maximumf %10, %11 : vector<16x16x128xf32>
    %cst_7 = arith.constant 0.000000e+00 : f32
    %13 = vector.broadcast %cst_7 : f32 to vector<18x18x128xf32>
    %c0_8 = arith.constant 0 : index
    %c0_9 = arith.constant 0 : index
    %c0_10 = arith.constant 0 : index
    %14 = vector.load %arg7[%c0_8, %c0_9, %c0_10] : memref<18x18x128xf32, #tpu.memory_space<vmem>>, vector<18x18x128xf32>
    tpu.vector_store %arg7[%c0_8, %c0_9, %c0_10], %13 {strides = array<i32>} : memref<18x18x128xf32, #tpu.memory_space<vmem>>, vector<18x18x128xf32>,
    %c1 = arith.constant 1 : index
    %c1_11 = arith.constant 1 : index
    %c0_12 = arith.constant 0 : index
    %15 = vector.load %arg7[%c1, %c1_11, %c0_12] : memref<18x18x128xf32, #tpu.memory_space<vmem>>, vector<16x16x128xf32>
    tpu.vector_store %arg7[%c1, %c1_11, %c0_12], %12 {strides = array<i32>} : memref<18x18x128xf32, #tpu.memory_space<vmem>>, vector<16x16x128xf32>,
    %c0_13 = arith.constant 0 : index
    %c0_14 = arith.constant 0 : index
    %c0_15 = arith.constant 0 : index
    %16 = vector.load %arg7[%c0_13, %c0_14, %c0_15] : memref<18x18x128xf32, #tpu.memory_space<vmem>>, vector<16x16x128xf32>
    %17 = arith.truncf %16 : vector<16x16x128xf32> to vector<16x16x128xbf16>
    %18 = vector.shape_cast %17 : vector<16x16x128xbf16> to vector<256x128xbf16>
    %c0_16 = arith.constant 0 : index
    %c1_17 = arith.constant 1 : index
    %c0_18 = arith.constant 0 : index
    %19 = vector.load %arg7[%c0_16, %c1_17, %c0_18] : memref<18x18x128xf32, #tpu.memory_space<vmem>>, vector<16x16x128xf32>
    %20 = arith.truncf %19 : vector<16x16x128xf32> to vector<16x16x128xbf16>
    %21 = vector.shape_cast %20 : vector<16x16x128xbf16> to vector<256x128xbf16>
    %c0_19 = arith.constant 0 : index
    %c2 = arith.constant 2 : index
    %c0_20 = arith.constant 0 : index
    %22 = vector.load %arg7[%c0_19, %c2, %c0_20] : memref<18x18x128xf32, #tpu.memory_space<vmem>>, vector<16x16x128xf32>
    %23 = arith.truncf %22 : vector<16x16x128xf32> to vector<16x16x128xbf16>
    %24 = vector.shape_cast %23 : vector<16x16x128xbf16> to vector<256x128xbf16>
    %c1_21 = arith.constant 1 : index
    %c0_22 = arith.constant 0 : index
    %c0_23 = arith.constant 0 : index
    %25 = vector.load %arg7[%c1_21, %c0_22, %c0_23] : memref<18x18x128xf32, #tpu.memory_space<vmem>>, vector<16x16x128xf32>
    %26 = arith.truncf %25 : vector<16x16x128xf32> to vector<16x16x128xbf16>
    %27 = vector.shape_cast %26 : vector<16x16x128xbf16> to vector<256x128xbf16>
    %c1_24 = arith.constant 1 : index
    %c1_25 = arith.constant 1 : index
    %c0_26 = arith.constant 0 : index
    %28 = vector.load %arg7[%c1_24, %c1_25, %c0_26] : memref<18x18x128xf32, #tpu.memory_space<vmem>>, vector<16x16x128xf32>
    %29 = arith.truncf %28 : vector<16x16x128xf32> to vector<16x16x128xbf16>
    %30 = vector.shape_cast %29 : vector<16x16x128xbf16> to vector<256x128xbf16>
    %c1_27 = arith.constant 1 : index
    %c2_28 = arith.constant 2 : index
    %c0_29 = arith.constant 0 : index
    %31 = vector.load %arg7[%c1_27, %c2_28, %c0_29] : memref<18x18x128xf32, #tpu.memory_space<vmem>>, vector<16x16x128xf32>
    %32 = arith.truncf %31 : vector<16x16x128xf32> to vector<16x16x128xbf16>
    %33 = vector.shape_cast %32 : vector<16x16x128xbf16> to vector<256x128xbf16>
    %c2_30 = arith.constant 2 : index
    %c0_31 = arith.constant 0 : index
    %c0_32 = arith.constant 0 : index
    %34 = vector.load %arg7[%c2_30, %c0_31, %c0_32] : memref<18x18x128xf32, #tpu.memory_space<vmem>>, vector<16x16x128xf32>
    %35 = arith.truncf %34 : vector<16x16x128xf32> to vector<16x16x128xbf16>
    %36 = vector.shape_cast %35 : vector<16x16x128xbf16> to vector<256x128xbf16>
    %c2_33 = arith.constant 2 : index
    %c1_34 = arith.constant 1 : index
    %c0_35 = arith.constant 0 : index
    %37 = vector.load %arg7[%c2_33, %c1_34, %c0_35] : memref<18x18x128xf32, #tpu.memory_space<vmem>>, vector<16x16x128xf32>
    %38 = arith.truncf %37 : vector<16x16x128xf32> to vector<16x16x128xbf16>
    %39 = vector.shape_cast %38 : vector<16x16x128xbf16> to vector<256x128xbf16>
    %c2_36 = arith.constant 2 : index
    %c2_37 = arith.constant 2 : index
    %c0_38 = arith.constant 0 : index
    %40 = vector.load %arg7[%c2_36, %c2_37, %c0_38] : memref<18x18x128xf32, #tpu.memory_space<vmem>>, vector<16x16x128xf32>
    %41 = arith.truncf %40 : vector<16x16x128xf32> to vector<16x16x128xbf16>
    %42 = vector.shape_cast %41 : vector<16x16x128xbf16> to vector<256x128xbf16>
    %43 = tpu.concatenate %18, %21, %24, %27, %30, %33, %36, %39, %42 in 1 : vector<256x128xbf16>, vector<256x128xbf16>, vector<256x128xbf16>, vector<256x128xbf16>, vector<256x128xbf16>, vector<256x128xbf16>, vector<256x128xbf16>, vector<256x128xbf16>, vector<256x128xbf16> -> vector<256x1152xbf16>
    %c0_39 = arith.constant 0 : index
    %c0_40 = arith.constant 0 : index
    %44 = vector.load %arg4[%c0_39, %c0_40] : memref<1152x128xbf16, #tpu.memory_space<vmem>>, vector<1152x128xbf16>
    %cst_41 = arith.constant dense<0.000000e+00> : vector<256x128xf32>
    %45 = tpu.matmul %43, %44, %cst_41 {dimension_numbers = #tpu.dot_dimension_numbers<[1], [0], [0], [1], [0, 0, 1, 1], [], []>} : vector<256x1152xbf16>, vector<1152x128xbf16>, vector<256x128xf32> -> vector<256x128xf32>
    %46 = vector.shape_cast %45 : vector<256x128xf32> to vector<16x16x128xf32>
    %47 = arith.truncf %46 : vector<16x16x128xf32> to vector<16x16x128xbf16>
    %c0_42 = arith.constant 0 : index
    %c0_43 = arith.constant 0 : index
    %c0_44 = arith.constant 0 : index
    %c0_45 = arith.constant 0 : index
    %48 = vector.load %arg5[%c0_42, %c0_43, %c0_44, %c0_45] : memref<1x16x16x128xbf16, #tpu.memory_space<vmem>>, vector<1x16x16x128xbf16>
    %49 = vector.shape_cast %48 : vector<1x16x16x128xbf16> to vector<16x16x128xbf16>
    %50 = vector.shape_cast %47 : vector<16x16x128xbf16> to vector<1x16x16x128xbf16>
    tpu.vector_store %arg5[%c0_42, %c0_43, %c0_44, %c0_45], %50 {strides = array<i32>} : memref<1x16x16x128xbf16, #tpu.memory_space<vmem>>, vector<1x16x16x128xbf16>,
    %cst_46 = arith.constant dense<0.000000e+00> : vector<128xf32>
    %51 = vector.multi_reduction <add>, %45, %cst_46 [0] : vector<256x128xf32> to vector<128xf32>
    %52 = vector.shape_cast %51 : vector<128xf32> to vector<1x128xf32>
    %c0_47 = arith.constant 0 : index
    %c0_48 = arith.constant 0 : index
    %c0_49 = arith.constant 0 : index
    %53 = vector.load %arg6[%c0_47, %c0_48, %c0_49] : memref<1x2x128xf32, #tpu.memory_space<vmem>>, vector<1x1x128xf32>
    %54 = vector.shape_cast %53 : vector<1x1x128xf32> to vector<1x128xf32>
    %55 = vector.shape_cast %52 : vector<1x128xf32> to vector<1x1x128xf32>
    tpu.vector_store %arg6[%c0_47, %c0_48, %c0_49], %55 {strides = array<i32>} : memref<1x2x128xf32, #tpu.memory_space<vmem>>, vector<1x1x128xf32>,
    %56 = arith.mulf %45, %45 : vector<256x128xf32>
    %cst_50 = arith.constant dense<0.000000e+00> : vector<128xf32>
    %57 = vector.multi_reduction <add>, %56, %cst_50 [0] : vector<256x128xf32> to vector<128xf32>
    %58 = vector.shape_cast %57 : vector<128xf32> to vector<1x128xf32>
    %c0_51 = arith.constant 0 : index
    %c1_52 = arith.constant 1 : index
    %c0_53 = arith.constant 0 : index
    %59 = vector.load %arg6[%c0_51, %c1_52, %c0_53] : memref<1x2x128xf32, #tpu.memory_space<vmem>>, vector<1x1x128xf32>
    %60 = vector.shape_cast %59 : vector<1x1x128xf32> to vector<1x128xf32>
    %61 = vector.shape_cast %58 : vector<1x128xf32> to vector<1x1x128xf32>
    tpu.vector_store %arg6[%c0_51, %c1_52, %c0_53], %61 {strides = array<i32>} : memref<1x2x128xf32, #tpu.memory_space<vmem>>, vector<1x1x128xf32>,
    return
  }
  func.func @transform_0(%arg0: i32) -> (i32, i32, i32, i32) {
    %c0_i32 = arith.constant 0 : i32
    %c0_i32_0 = arith.constant 0 : i32
    %c0_i32_1 = arith.constant 0 : i32
    %c0_i32_2 = arith.constant 0 : i32
    return %arg0, %c0_i32, %c0_i32_0, %c0_i32_1 : i32, i32, i32, i32
  }
  func.func @transform_1(%arg0: i32) -> (i32, i32) {
    %c0_i32 = arith.constant 0 : i32
    %c0_i32_0 = arith.constant 0 : i32
    %c0_i32_1 = arith.constant 0 : i32
    return %c0_i32, %c0_i32_0 : i32, i32
  }
  func.func @transform_2(%arg0: i32) -> (i32, i32) {
    %c0_i32 = arith.constant 0 : i32
    %c0_i32_0 = arith.constant 0 : i32
    %c0_i32_1 = arith.constant 0 : i32
    return %c0_i32, %c0_i32_0 : i32, i32
  }
  func.func @transform_3(%arg0: i32) -> (i32, i32) {
    %c0_i32 = arith.constant 0 : i32
    %c0_i32_0 = arith.constant 0 : i32
    %c0_i32_1 = arith.constant 0 : i32
    return %c0_i32, %c0_i32_0 : i32, i32
  }
  func.func @transform_4(%arg0: i32) -> (i32, i32, i32, i32) {
    %c0_i32 = arith.constant 0 : i32
    %c0_i32_0 = arith.constant 0 : i32
    %c0_i32_1 = arith.constant 0 : i32
    %c0_i32_2 = arith.constant 0 : i32
    return %arg0, %c0_i32, %c0_i32_0, %c0_i32_1 : i32, i32, i32, i32
  }
  func.func @transform_5(%arg0: i32) -> (i32, i32, i32) {
    %c0_i32 = arith.constant 0 : i32
    %c0_i32_0 = arith.constant 0 : i32
    %c0_i32_1 = arith.constant 0 : i32
    return %arg0, %c0_i32, %c0_i32_0 : i32, i32, i32
  }
}

module attributes {stable_mosaic.version = 11 : i64} {
  func.func @_pass_c_kernel(%arg0: i32, %arg1: memref<1x16x16x128xbf16, #tpu.memory_space<vmem>>, %arg2: memref<1x16x16x128xbf16, #tpu.memory_space<vmem>>, %arg3: memref<1x128xf32, #tpu.memory_space<vmem>>, %arg4: memref<1x128xf32, #tpu.memory_space<vmem>>, %arg5: memref<1x128xf32, #tpu.memory_space<vmem>>, %arg6: memref<1x128xf32, #tpu.memory_space<vmem>>, %arg7: memref<1x16x16x8xf32, #tpu.memory_space<vmem>>) attributes {dimension_semantics = [#tpu.dimension_semantics<parallel>], iteration_bounds = array<i64: 2>, scalar_prefetch = 0 : i64, scratch_operands = 0 : i64, tpu.core_type = #tpu.core_type<tc>, window_params = [{transform_indices = @transform_0, window_bounds = array<i64: 1, 16, 16, 128>}, {transform_indices = @transform_1, window_bounds = array<i64: 1, 16, 16, 128>}, {pipeline_mode = #tpu.pipeline_mode<synchronous>, transform_indices = @transform_2, window_bounds = array<i64: 1, 128>}, {pipeline_mode = #tpu.pipeline_mode<synchronous>, transform_indices = @transform_3, window_bounds = array<i64: 1, 128>}, {pipeline_mode = #tpu.pipeline_mode<synchronous>, transform_indices = @transform_4, window_bounds = array<i64: 1, 128>}, {pipeline_mode = #tpu.pipeline_mode<synchronous>, transform_indices = @transform_5, window_bounds = array<i64: 1, 128>}, {transform_indices = @transform_6, window_bounds = array<i64: 1, 16, 16, 8>}]} {
    %c0 = arith.constant 0 : index
    %c0_0 = arith.constant 0 : index
    %c0_1 = arith.constant 0 : index
    %c0_2 = arith.constant 0 : index
    %0 = vector.load %arg1[%c0, %c0_0, %c0_1, %c0_2] : memref<1x16x16x128xbf16, #tpu.memory_space<vmem>>, vector<1x16x16x128xbf16>
    %1 = vector.shape_cast %0 : vector<1x16x16x128xbf16> to vector<16x16x128xbf16>
    %2 = arith.extf %1 : vector<16x16x128xbf16> to vector<16x16x128xf32>
    %c0_3 = arith.constant 0 : index
    %c0_4 = arith.constant 0 : index
    %3 = vector.load %arg3[%c0_3, %c0_4] : memref<1x128xf32, #tpu.memory_space<vmem>>, vector<1x128xf32>
    %4 = vector.shape_cast %3 : vector<1x128xf32> to vector<1x1x128xf32>
    %5 = vector.broadcast %4 : vector<1x1x128xf32> to vector<16x16x128xf32>
    %6 = arith.mulf %2, %5 : vector<16x16x128xf32>
    %c0_5 = arith.constant 0 : index
    %c0_6 = arith.constant 0 : index
    %7 = vector.load %arg4[%c0_5, %c0_6] : memref<1x128xf32, #tpu.memory_space<vmem>>, vector<1x128xf32>
    %8 = vector.shape_cast %7 : vector<1x128xf32> to vector<1x1x128xf32>
    %9 = vector.broadcast %8 : vector<1x1x128xf32> to vector<16x16x128xf32>
    %10 = arith.addf %6, %9 : vector<16x16x128xf32>
    %c0_7 = arith.constant 0 : index
    %c0_8 = arith.constant 0 : index
    %c0_9 = arith.constant 0 : index
    %c0_10 = arith.constant 0 : index
    %11 = vector.load %arg2[%c0_7, %c0_8, %c0_9, %c0_10] : memref<1x16x16x128xbf16, #tpu.memory_space<vmem>>, vector<1x16x16x128xbf16>
    %12 = vector.shape_cast %11 : vector<1x16x16x128xbf16> to vector<16x16x128xbf16>
    %13 = arith.extf %12 : vector<16x16x128xbf16> to vector<16x16x128xf32>
    %c0_11 = arith.constant 0 : index
    %c0_12 = arith.constant 0 : index
    %14 = vector.load %arg5[%c0_11, %c0_12] : memref<1x128xf32, #tpu.memory_space<vmem>>, vector<1x128xf32>
    %15 = vector.shape_cast %14 : vector<1x128xf32> to vector<1x1x128xf32>
    %16 = vector.broadcast %15 : vector<1x1x128xf32> to vector<16x16x128xf32>
    %17 = arith.mulf %13, %16 : vector<16x16x128xf32>
    %c0_13 = arith.constant 0 : index
    %c0_14 = arith.constant 0 : index
    %18 = vector.load %arg6[%c0_13, %c0_14] : memref<1x128xf32, #tpu.memory_space<vmem>>, vector<1x128xf32>
    %19 = vector.shape_cast %18 : vector<1x128xf32> to vector<1x1x128xf32>
    %20 = vector.broadcast %19 : vector<1x1x128xf32> to vector<16x16x128xf32>
    %21 = arith.addf %17, %20 : vector<16x16x128xf32>
    %22 = arith.addf %10, %21 : vector<16x16x128xf32>
    %23 = vector.extract_strided_slice %22 {offsets = [0, 0, 0], sizes = [16, 16, 8], strides = [1, 1, 1]} : vector<16x16x128xf32> to vector<16x16x8xf32>
    %cst = arith.constant 0.000000e+00 : f32
    %24 = vector.broadcast %cst : f32 to vector<16x16x8xf32>
    %25 = arith.maximumf %23, %24 : vector<16x16x8xf32>
    %c0_15 = arith.constant 0 : index
    %c0_16 = arith.constant 0 : index
    %c0_17 = arith.constant 0 : index
    %c0_18 = arith.constant 0 : index
    %26 = vector.load %arg7[%c0_15, %c0_16, %c0_17, %c0_18] : memref<1x16x16x8xf32, #tpu.memory_space<vmem>>, vector<1x16x16x8xf32>
    %27 = vector.shape_cast %26 : vector<1x16x16x8xf32> to vector<16x16x8xf32>
    %28 = vector.shape_cast %25 : vector<16x16x8xf32> to vector<1x16x16x8xf32>
    tpu.vector_store %arg7[%c0_15, %c0_16, %c0_17, %c0_18], %28 {strides = array<i32>} : memref<1x16x16x8xf32, #tpu.memory_space<vmem>>, vector<1x16x16x8xf32>,
    return
  }
  func.func @transform_0(%arg0: i32) -> (i32, i32, i32, i32) {
    %c0_i32 = arith.constant 0 : i32
    %c0_i32_0 = arith.constant 0 : i32
    %c0_i32_1 = arith.constant 0 : i32
    %c0_i32_2 = arith.constant 0 : i32
    return %arg0, %c0_i32, %c0_i32_0, %c0_i32_1 : i32, i32, i32, i32
  }
  func.func @transform_1(%arg0: i32) -> (i32, i32, i32, i32) {
    %c0_i32 = arith.constant 0 : i32
    %c0_i32_0 = arith.constant 0 : i32
    %c0_i32_1 = arith.constant 0 : i32
    %c0_i32_2 = arith.constant 0 : i32
    return %arg0, %c0_i32, %c0_i32_0, %c0_i32_1 : i32, i32, i32, i32
  }
  func.func @transform_2(%arg0: i32) -> (i32, i32) {
    %c0_i32 = arith.constant 0 : i32
    %c0_i32_0 = arith.constant 0 : i32
    %c0_i32_1 = arith.constant 0 : i32
    return %c0_i32, %c0_i32_0 : i32, i32
  }
  func.func @transform_3(%arg0: i32) -> (i32, i32) {
    %c0_i32 = arith.constant 0 : i32
    %c0_i32_0 = arith.constant 0 : i32
    %c0_i32_1 = arith.constant 0 : i32
    return %c0_i32, %c0_i32_0 : i32, i32
  }
  func.func @transform_4(%arg0: i32) -> (i32, i32) {
    %c0_i32 = arith.constant 0 : i32
    %c0_i32_0 = arith.constant 0 : i32
    %c0_i32_1 = arith.constant 0 : i32
    return %c0_i32, %c0_i32_0 : i32, i32
  }
  func.func @transform_5(%arg0: i32) -> (i32, i32) {
    %c0_i32 = arith.constant 0 : i32
    %c0_i32_0 = arith.constant 0 : i32
    %c0_i32_1 = arith.constant 0 : i32
    return %c0_i32, %c0_i32_0 : i32, i32
  }
  func.func @transform_6(%arg0: i32) -> (i32, i32, i32, i32) {
    %c0_i32 = arith.constant 0 : i32
    %c0_i32_0 = arith.constant 0 : i32
    %c0_i32_1 = arith.constant 0 : i32
    %c0_i32_2 = arith.constant 0 : i32
    return %arg0, %c0_i32, %c0_i32_0, %c0_i32_1 : i32, i32, i32, i32
  }
}

</mosaic_0001>

<bundles_post_ra>
// kernel: _lambda_.5
= control target key start
LH: loop header
LB: loop body
LE: loop exit
PB: predicated region body
PF: predicated region fallthrough
CT: control target
= control target key end

     0   :  { %s949_s21 = smov 0   ;;  %s1223_s0 = inlined_call_operand.vmem [shape: bf16[2,16,16,128], index: 0, kind: input, shape index: {}]   ;;  %s1224_s1 = inlined_call_operand.vmem [shape: bf16[2,16,16,128], index: 1, kind: input, shape index: {}]   ;;  %s1225_s2 = inlined_call_operand.vmem [shape: f32[1,128], index: 2, kind: input, shape index: {}]   ;;  %s1226_s3 = inlined_call_operand.vmem [shape: f32[1,128], index: 3, kind: input, shape index: {}]   ;;  %s1227_s4 = inlined_call_operand.vmem [shape: f32[1,128], index: 4, kind: input, shape index: {}]   ;;  %s1228_s5 = inlined_call_operand.vmem [shape: f32[1,128], index: 5, kind: input, shape index: {}]   ;;  %s1229_s6 = inlined_call_operand.vmem [shape: f32[2,16,16,8], index: 6, kind: output, shape index: {}]  }
   0x1 LB: > { %s720_s22 = sadd.s32 4294967295, %s912_s21   ;;  %p724_p0 = scmp.ge.s32.totalorder %s912_s21, 1  ;;  %s912_s21 = sphi %s949_s21, %s16_s21  }
   0x2   : > { %p222_p1 = scmp.lt.s32.totalorder %s912_s21, 3 }
   0x4   : > { %p223_p2 = pnand %p724_p0, %p222_p1 }
   0x5   : > { %p257_p3 = scmp.lt.s32.totalorder (!%p223_p2), %s720_s22, 1 }
   0x6   : > { %226 = sbr.rel (%p223_p2) target bundleno = 86 (0x56), region = 44 }
   0xb   : > { %s1231_s22 = smov (!%p257_p3, %s720_s22), 1  ;;  %v973_v0 = vld [vmem:[%s1225_s2] ss:$0 sm:$0xff]  ;;  %vm620_vm0 = vcmask 64512  }
   0xc   : > { %s737_s23 = sshll.u32 %s1231_s22, 7  ;;  %v978_v1 = vld [vmem:[%s1227_s4] ss:$0 sm:$0xff]  ;;  %s739_s14 = sshll.u32 %s1231_s22, 8 }
   0xd   : > { %s963_s26 = scalar_lea.vmem %s1223_s0, %s737_s23  ;;  %s968_s29 = scalar_lea.vmem %s1224_s1, %s737_s23  ;;  %v987_v10 = vld [vmem:[%s1226_s3] ss:$0 sm:$0xff] }
   0xe   : > { %v741_v2 = vld [vmem:[%s963_s26] sm:$0xff]   ;;  %v868_v4 = vld [vmem:[%s963_s26 + $0x8] sm:$0xff]   ;;  %v869_v24 = vld [vmem:[%s963_s26 + $0x10] sm:$0xff]   ;;  %s1016_s17 = scalar_lea.vmem %s1229_s6, %s739_s14 }
   0xf   : > { %v805_v3 = vld [vmem:[%s968_s29] sm:$0xff]   ;;  %v742_v5 = vunpack.c.l.bf16 %v741_v2  ;;  %v743_v7 = vunpack.c.h.bf16 %v741_v2  ;;  %v883_v9 = vld [vmem:[%s968_s29 + $0x8] sm:$0xff]   ;;  %v746_v12 = vunpack.c.l.bf16 %v868_v4  ;;  %v747_v14 = vunpack.c.h.bf16 %v868_v4  ;;  %v884_v25 = vld [vmem:[%s968_s29 + $0x10] sm:$0xff]  }
  0x10   : > { %v806_v6 = vunpack.c.l.bf16 %v805_v3  ;;  %v807_v8 = vunpack.c.h.bf16 %v805_v3  ;;  %v992_v11 = vld [vmem:[%s1228_s5] ss:$0 sm:$0xff]  ;;  %v810_v13 = vunpack.c.l.bf16 %v883_v9  ;;  %v811_v15 = vunpack.c.h.bf16 %v883_v9  ;;  %v870_v42 = vld [vmem:[%s963_s26 + $0x18] sm:$0xff]  }
  0x11   : > { %v343_v16 = vmul.f32 %v742_v5, %v973_v0  ;;  %v344_v18 = vmul.f32 %v743_v7, %v973_v0  ;;  %v345_v20 = vmul.f32 %v746_v12, %v973_v0  ;;  %v346_v22 = vmul.f32 %v747_v14, %v973_v0  ;;  %v885_v43 = vld [vmem:[%s968_s29 + $0x18] sm:$0xff]   ;;  %v871_v52 = vld [vmem:[%s963_s26 + $0x20] sm:$0xff]   ;;  %v872_v14 = vld [vmem:[%s963_s26 + $0x28] sm:$0xff]  }
  0x12   : > { %v485_v17 = vmul.f32 %v806_v6, %v978_v1  ;;  %v486_v19 = vmul.f32 %v807_v8, %v978_v1  ;;  %v487_v21 = vmul.f32 %v810_v13, %v978_v1  ;;  %v488_v23 = vmul.f32 %v811_v15, %v978_v1  ;;  %v886_v57 = vld [vmem:[%s968_s29 + $0x20] sm:$0xff]   ;;  %v887_v15 = vld [vmem:[%s968_s29 + $0x28] sm:$0xff]  }
  0x13   : > { %v382_v26 = vadd.f32 %v987_v10, %v343_v16  ;;  %v383_v28 = vadd.f32 %v987_v10, %v344_v18  ;;  %v384_v30 = vadd.f32 %v987_v10, %v345_v20  ;;  %v385_v32 = vadd.f32 %v987_v10, %v346_v22 }
  0x14   : > { %v524_v27 = vadd.f32 %v992_v11, %v485_v17  ;;  %v525_v29 = vadd.f32 %v992_v11, %v486_v19  ;;  %v526_v31 = vadd.f32 %v992_v11, %v487_v21  ;;  %v527_v33 = vadd.f32 %v992_v11, %v488_v23 }
  0x15   : > { %v750_v36 = vunpack.c.l.bf16 %v869_v24  ;;  %v814_v37 = vunpack.c.l.bf16 %v884_v25  ;;  %v751_v40 = vunpack.c.h.bf16 %v869_v24  ;;  %v815_v41 = vunpack.c.h.bf16 %v884_v25 }
  0x16   : > { %v556_v34 = vadd.f32 %v524_v27, %v382_v26  ;;  %v557_v35 = vadd.f32 %v525_v29, %v383_v28  ;;  %v558_v38 = vadd.f32 %v526_v31, %v384_v30  ;;  %v559_v39 = vadd.f32 %v527_v33, %v385_v32  ;;  %v873_v32 = vld [vmem:[%s963_s26 + $0x30] sm:$0xff]  }
  0x17   : > { %v347_v46 = vmul.f32 %v750_v36, %v973_v0  ;;  %v489_v47 = vmul.f32 %v814_v37, %v978_v1  ;;  %v348_v50 = vmul.f32 %v751_v40, %v973_v0  ;;  %v490_v51 = vmul.f32 %v815_v41, %v978_v1  ;;  %v888_v37 = vld [vmem:[%s968_s29 + $0x30] sm:$0xff]  }
  0x18   : > { %v588_v44 = vmax.f32 %v556_v34, 0.0  ;;  %v589_v45 = vmax.f32 %v557_v35, 0.0  ;;  %v590_v48 = vmax.f32 %v558_v38, 0.0  ;;  %v591_v49 = vmax.f32 %v559_v39, 0.0 }
  0x19   : > { %v386_v53 = vadd.f32 %v987_v10, %v347_v46  ;;  %v528_v54 = vadd.f32 %v992_v11, %v489_v47  ;;  %v754_v55 = vunpack.c.l.bf16 %v870_v42  ;;  %v818_v56 = vunpack.c.l.bf16 %v885_v43  ;;  %v874_v46 = vld [vmem:[%s963_s26 + $0x38] sm:$0xff]  }
  0x1a   : > { %621 = vst.msk [vmem:[%s1016_s17] sm:$0xff] %vm620_vm0, %v588_v44  ;;  %622 = vst.msk [vmem:[%s1016_s17 + $0x8] sm:$0xff] %vm620_vm0, %v589_v45  ;;  %v387_v58 = vadd.f32 %v987_v10, %v348_v50  ;;  %v529_v59 = vadd.f32 %v992_v11, %v490_v51  ;;  %v755_v60 = vunpack.c.h.bf16 %v870_v42  ;;  %v819_v61 = vunpack.c.h.bf16 %v885_v43 }
  0x1b   : > { %623 = vst.msk [vmem:[%s1016_s17 + $0x10] sm:$0xff] %vm620_vm0, %v590_v48  ;;  %624 = vst.msk [vmem:[%s1016_s17 + $0x18] sm:$0xff] %vm620_vm0, %v591_v49  ;;  %v560_v62 = vadd.f32 %v528_v54, %v386_v53  ;;  %v349_v63 = vmul.f32 %v754_v55, %v973_v0  ;;  %v491_v2 = vmul.f32 %v818_v56, %v978_v1  ;;  %v758_v3 = vunpack.c.l.bf16 %v871_v52  ;;  %v889_v55 = vld [vmem:[%s968_s29 + $0x38] sm:$0xff]  }
  0x1c   : > { %v561_v4 = vadd.f32 %v529_v59, %v387_v58  ;;  %v350_v5 = vmul.f32 %v755_v60, %v973_v0  ;;  %v492_v6 = vmul.f32 %v819_v61, %v978_v1  ;;  %v822_v7 = vunpack.c.l.bf16 %v886_v57 }
  0x1d   : > { %v592_v8 = vmax.f32 %v560_v62, 0.0  ;;  %v388_v9 = vadd.f32 %v987_v10, %v349_v63  ;;  %v530_v12 = vadd.f32 %v992_v11, %v491_v2  ;;  %v351_v13 = vmul.f32 %v758_v3, %v973_v0 }
  0x1e   : > { %v593_v16 = vmax.f32 %v561_v4, 0.0  ;;  %v389_v17 = vadd.f32 %v987_v10, %v350_v5  ;;  %v531_v18 = vadd.f32 %v992_v11, %v492_v6  ;;  %v493_v19 = vmul.f32 %v822_v7, %v978_v1  ;;  %v875_v6 = vld [vmem:[%s963_s26 + $0x40] sm:$0xff]  }
  0x1f   : > { %625 = vst.msk [vmem:[%s1016_s17 + $0x20] sm:$0xff] %vm620_vm0, %v592_v8  ;;  %v562_v20 = vadd.f32 %v530_v12, %v388_v9  ;;  %v390_v21 = vadd.f32 %v987_v10, %v351_v13  ;;  %v759_v22 = vunpack.c.h.bf16 %v871_v52  ;;  %v823_v23 = vunpack.c.h.bf16 %v886_v57  ;;  %v890_v13 = vld [vmem:[%s968_s29 + $0x40] sm:$0xff]  }
  0x20   : > { %626 = vst.msk [vmem:[%s1016_s17 + $0x28] sm:$0xff] %vm620_vm0, %v593_v16  ;;  %v563_v24 = vadd.f32 %v531_v18, %v389_v17  ;;  %v532_v25 = vadd.f32 %v992_v11, %v493_v19  ;;  %v762_v26 = vunpack.c.l.bf16 %v872_v14  ;;  %v826_v27 = vunpack.c.l.bf16 %v887_v15 }
  0x21   : > { %v594_v28 = vmax.f32 %v562_v20, 0.0  ;;  %v352_v29 = vmul.f32 %v759_v22, %v973_v0  ;;  %v494_v30 = vmul.f32 %v823_v23, %v978_v1  ;;  %v763_v31 = vunpack.c.h.bf16 %v872_v14 }
  0x22   : > { %v595_v33 = vmax.f32 %v563_v24, 0.0  ;;  %v564_v34 = vadd.f32 %v532_v25, %v390_v21  ;;  %v353_v35 = vmul.f32 %v762_v26, %v973_v0  ;;  %v495_v36 = vmul.f32 %v826_v27, %v978_v1  ;;  %v876_v26 = vld [vmem:[%s963_s26 + $0x48] sm:$0xff]  }
  0x23   : > { %627 = vst.msk [vmem:[%s1016_s17 + $0x30] sm:$0xff] %vm620_vm0, %v594_v28  ;;  %v391_v38 = vadd.f32 %v987_v10, %v352_v29  ;;  %v533_v39 = vadd.f32 %v992_v11, %v494_v30  ;;  %v354_v40 = vmul.f32 %v763_v31, %v973_v0  ;;  %v827_v41 = vunpack.c.h.bf16 %v887_v15  ;;  %v891_v27 = vld [vmem:[%s968_s29 + $0x48] sm:$0xff]  }
  0x24   : > { %628 = vst.msk [vmem:[%s1016_s17 + $0x38] sm:$0xff] %vm620_vm0, %v595_v33  ;;  %v596_v42 = vmax.f32 %v564_v34, 0.0  ;;  %v392_v43 = vadd.f32 %v987_v10, %v353_v35  ;;  %v534_v44 = vadd.f32 %v992_v11, %v495_v36  ;;  %v766_v45 = vunpack.c.l.bf16 %v873_v32 }
  0x25   : > { %v565_v47 = vadd.f32 %v533_v39, %v391_v38  ;;  %v393_v48 = vadd.f32 %v987_v10, %v354_v40  ;;  %v496_v49 = vmul.f32 %v827_v41, %v978_v1  ;;  %v830_v50 = vunpack.c.l.bf16 %v888_v37  ;;  %v877_v40 = vld [vmem:[%s963_s26 + $0x50] sm:$0xff]  }
  0x26   : > { %629 = vst.msk [vmem:[%s1016_s17 + $0x40] sm:$0xff] %vm620_vm0, %v596_v42  ;;  %v566_v51 = vadd.f32 %v534_v44, %v392_v43  ;;  %v355_v52 = vmul.f32 %v766_v45, %v973_v0  ;;  %v767_v53 = vunpack.c.h.bf16 %v873_v32  ;;  %v831_v54 = vunpack.c.h.bf16 %v888_v37  ;;  %v892_v45 = vld [vmem:[%s968_s29 + $0x50] sm:$0xff]  }
  0x27   : > { %v597_v56 = vmax.f32 %v565_v47, 0.0  ;;  %v535_v57 = vadd.f32 %v992_v11, %v496_v49  ;;  %v497_v58 = vmul.f32 %v830_v50, %v978_v1  ;;  %v770_v59 = vunpack.c.l.bf16 %v874_v46 }
  0x28   : > { %v598_v60 = vmax.f32 %v566_v51, 0.0  ;;  %v394_v61 = vadd.f32 %v987_v10, %v355_v52  ;;  %v356_v62 = vmul.f32 %v767_v53, %v973_v0  ;;  %v498_v63 = vmul.f32 %v831_v54, %v978_v1 }
  0x29   : > { %630 = vst.msk [vmem:[%s1016_s17 + $0x48] sm:$0xff] %vm620_vm0, %v597_v56  ;;  %v567_v2 = vadd.f32 %v535_v57, %v393_v48  ;;  %v536_v3 = vadd.f32 %v992_v11, %v497_v58  ;;  %v357_v4 = vmul.f32 %v770_v59, %v973_v0  ;;  %v834_v5 = vunpack.c.l.bf16 %v889_v55 }
  0x2a   : > { %631 = vst.msk [vmem:[%s1016_s17 + $0x50] sm:$0xff] %vm620_vm0, %v598_v60  ;;  %v395_v7 = vadd.f32 %v987_v10, %v356_v62  ;;  %v537_v8 = vadd.f32 %v992_v11, %v498_v63  ;;  %v771_v9 = vunpack.c.h.bf16 %v874_v46  ;;  %v835_v12 = vunpack.c.h.bf16 %v889_v55  ;;  %v878_v62 = vld [vmem:[%s963_s26 + $0x58] sm:$0xff]  }
  0x2b   : > { %v599_v14 = vmax.f32 %v567_v2, 0.0  ;;  %v568_v15 = vadd.f32 %v536_v3, %v394_v61  ;;  %v396_v16 = vadd.f32 %v987_v10, %v357_v4  ;;  %v499_v17 = vmul.f32 %v834_v5, %v978_v1  ;;  %v893_v5 = vld [vmem:[%s968_s29 + $0x58] sm:$0xff]  }
  0x2c   : > { %v569_v18 = vadd.f32 %v537_v8, %v395_v7  ;;  %v358_v19 = vmul.f32 %v771_v9, %v973_v0  ;;  %v500_v20 = vmul.f32 %v835_v12, %v978_v1  ;;  %v774_v21 = vunpack.c.l.bf16 %v875_v6 }
  0x2d   : > { %632 = vst.msk [vmem:[%s1016_s17 + $0x58] sm:$0xff] %vm620_vm0, %v599_v14  ;;  %v600_v22 = vmax.f32 %v568_v15, 0.0  ;;  %v538_v23 = vadd.f32 %v992_v11, %v499_v17  ;;  %v838_v24 = vunpack.c.l.bf16 %v890_v13  ;;  %v775_v25 = vunpack.c.h.bf16 %v875_v6 }
  0x2e   : > { %v601_v28 = vmax.f32 %v569_v18, 0.0  ;;  %v397_v29 = vadd.f32 %v987_v10, %v358_v19  ;;  %v539_v30 = vadd.f32 %v992_v11, %v500_v20  ;;  %v359_v31 = vmul.f32 %v774_v21, %v973_v0  ;;  %v879_v20 = vld [vmem:[%s963_s26 + $0x60] sm:$0xff]  }
  0x2f   : > { %633 = vst.msk [vmem:[%s1016_s17 + $0x60] sm:$0xff] %vm620_vm0, %v600_v22  ;;  %v570_v32 = vadd.f32 %v538_v23, %v396_v16  ;;  %v501_v33 = vmul.f32 %v838_v24, %v978_v1  ;;  %v360_v34 = vmul.f32 %v775_v25, %v973_v0  ;;  %v839_v35 = vunpack.c.h.bf16 %v890_v13  ;;  %v894_v25 = vld [vmem:[%s968_s29 + $0x60] sm:$0xff]  }
  0x30   : > { %634 = vst.msk [vmem:[%s1016_s17 + $0x68] sm:$0xff] %vm620_vm0, %v601_v28  ;;  %v571_v36 = vadd.f32 %v539_v30, %v397_v29  ;;  %v398_v37 = vadd.f32 %v987_v10, %v359_v31  ;;  %v778_v38 = vunpack.c.l.bf16 %v876_v26  ;;  %v842_v39 = vunpack.c.l.bf16 %v891_v27 }
  0x31   : > { %v602_v41 = vmax.f32 %v570_v32, 0.0  ;;  %v540_v42 = vadd.f32 %v992_v11, %v501_v33  ;;  %v399_v43 = vadd.f32 %v987_v10, %v360_v34  ;;  %v502_v44 = vmul.f32 %v839_v35, %v978_v1  ;;  %v880_v34 = vld [vmem:[%s963_s26 + $0x68] sm:$0xff]  }
  0x32   : > { %v603_v46 = vmax.f32 %v571_v36, 0.0  ;;  %v361_v47 = vmul.f32 %v778_v38, %v973_v0  ;;  %v503_v48 = vmul.f32 %v842_v39, %v978_v1  ;;  %v779_v49 = vunpack.c.h.bf16 %v876_v26 }
  0x33   : > { %635 = vst.msk [vmem:[%s1016_s17 + $0x70] sm:$0xff] %vm620_vm0, %v602_v41  ;;  %v572_v50 = vadd.f32 %v540_v42, %v398_v37  ;;  %v541_v51 = vadd.f32 %v992_v11, %v502_v44  ;;  %v843_v52 = vunpack.c.h.bf16 %v891_v27  ;;  %v782_v53 = vunpack.c.l.bf16 %v877_v40 }
  0x34   : > { %636 = vst.msk [vmem:[%s1016_s17 + $0x78] sm:$0xff] %vm620_vm0, %v603_v46  ;;  %v400_v54 = vadd.f32 %v987_v10, %v361_v47  ;;  %v542_v55 = vadd.f32 %v992_v11, %v503_v48  ;;  %v362_v56 = vmul.f32 %v779_v49, %v973_v0  ;;  %v846_v57 = vunpack.c.l.bf16 %v892_v45 }
  0x35   : > { %v604_v58 = vmax.f32 %v572_v50, 0.0  ;;  %v573_v59 = vadd.f32 %v541_v51, %v399_v43  ;;  %v504_v60 = vmul.f32 %v843_v52, %v978_v1  ;;  %v363_v61 = vmul.f32 %v782_v53, %v973_v0  ;;  %v895_v43 = vld [vmem:[%s968_s29 + $0x68] sm:$0xff]  }
  0x36   : > { %v574_v63 = vadd.f32 %v542_v55, %v400_v54  ;;  %v401_v2 = vadd.f32 %v987_v10, %v362_v56  ;;  %v505_v3 = vmul.f32 %v846_v57, %v978_v1  ;;  %v783_v4 = vunpack.c.h.bf16 %v877_v40  ;;  %v881_v56 = vld [vmem:[%s963_s26 + $0x70] sm:$0xff]  }
  0x37   : > { %637 = vst.msk [vmem:[%s1016_s17 + $0x80] sm:$0xff] %vm620_vm0, %v604_v58  ;;  %v605_v6 = vmax.f32 %v573_v59, 0.0  ;;  %v543_v7 = vadd.f32 %v992_v11, %v504_v60  ;;  %v402_v8 = vadd.f32 %v987_v10, %v363_v61  ;;  %v847_v9 = vunpack.c.h.bf16 %v892_v45  ;;  %v896_v57 = vld [vmem:[%s968_s29 + $0x70] sm:$0xff]  }
  0x38   : > { %v606_v12 = vmax.f32 %v574_v63, 0.0  ;;  %v544_v13 = vadd.f32 %v992_v11, %v505_v3  ;;  %v364_v14 = vmul.f32 %v783_v4, %v973_v0  ;;  %v786_v15 = vunpack.c.l.bf16 %v878_v62 }
  0x39   : > { %638 = vst.msk [vmem:[%s1016_s17 + $0x88] sm:$0xff] %vm620_vm0, %v605_v6  ;;  %v575_v16 = vadd.f32 %v543_v7, %v401_v2  ;;  %v506_v17 = vmul.f32 %v847_v9, %v978_v1  ;;  %v850_v18 = vunpack.c.l.bf16 %v893_v5  ;;  %v787_v19 = vunpack.c.h.bf16 %v878_v62 }
  0x3a   : > { %639 = vst.msk [vmem:[%s1016_s17 + $0x90] sm:$0xff] %vm620_vm0, %v606_v12  ;;  %v576_v21 = vadd.f32 %v544_v13, %v402_v8  ;;  %v403_v22 = vadd.f32 %v987_v10, %v364_v14  ;;  %v365_v23 = vmul.f32 %v786_v15, %v973_v0  ;;  %v851_v24 = vunpack.c.h.bf16 %v893_v5  ;;  %v882_v14 = vld [vmem:[%s963_s26 + $0x78] sm:$0xff]  }
  0x3b   : > { %v607_v26 = vmax.f32 %v575_v16, 0.0  ;;  %v545_v27 = vadd.f32 %v992_v11, %v506_v17  ;;  %v507_v28 = vmul.f32 %v850_v18, %v978_v1  ;;  %v366_v29 = vmul.f32 %v787_v19, %v973_v0  ;;  %v897_v15 = vld [vmem:[%s968_s29 + $0x78] sm:$0xff]  }
  0x3c   : > { %v608_v30 = vmax.f32 %v576_v21, 0.0  ;;  %v404_v31 = vadd.f32 %v987_v10, %v365_v23  ;;  %v508_v32 = vmul.f32 %v851_v24, %v978_v1  ;;  %v790_v33 = vunpack.c.l.bf16 %v879_v20 }
  0x3d   : > { %640 = vst.msk [vmem:[%s1016_s17 + $0x98] sm:$0xff] %vm620_vm0, %v607_v26  ;;  %v577_v35 = vadd.f32 %v545_v27, %v403_v22  ;;  %v546_v36 = vadd.f32 %v992_v11, %v507_v28  ;;  %v405_v37 = vadd.f32 %v987_v10, %v366_v29  ;;  %v854_v38 = vunpack.c.l.bf16 %v894_v25 }
  0x3e   : > { %641 = vst.msk [vmem:[%s1016_s17 + $0xa0] sm:$0xff] %vm620_vm0, %v608_v30  ;;  %v547_v39 = vadd.f32 %v992_v11, %v508_v32  ;;  %v367_v40 = vmul.f32 %v790_v33, %v973_v0  ;;  %v791_v41 = vunpack.c.h.bf16 %v879_v20  ;;  %v855_v42 = vunpack.c.h.bf16 %v894_v25 }
  0x3f   : > { %v609_v44 = vmax.f32 %v577_v35, 0.0  ;;  %v578_v45 = vadd.f32 %v546_v36, %v404_v31  ;;  %v509_v46 = vmul.f32 %v854_v38, %v978_v1  ;;  %v794_v47 = vunpack.c.l.bf16 %v880_v34 }
  0x40   : > { %v579_v48 = vadd.f32 %v547_v39, %v405_v37  ;;  %v406_v49 = vadd.f32 %v987_v10, %v367_v40  ;;  %v368_v50 = vmul.f32 %v791_v41, %v973_v0  ;;  %v510_v51 = vmul.f32 %v855_v42, %v978_v1 }
  0x41   : > { %642 = vst.msk [vmem:[%s1016_s17 + $0xa8] sm:$0xff] %vm620_vm0, %v609_v44  ;;  %v610_v52 = vmax.f32 %v578_v45, 0.0  ;;  %v548_v53 = vadd.f32 %v992_v11, %v509_v46  ;;  %v369_v54 = vmul.f32 %v794_v47, %v973_v0  ;;  %v858_v55 = vunpack.c.l.bf16 %v895_v43 }
  0x42   : > { %v611_v58 = vmax.f32 %v579_v48, 0.0  ;;  %v407_v59 = vadd.f32 %v987_v10, %v368_v50  ;;  %v549_v60 = vadd.f32 %v992_v11, %v510_v51  ;;  %v795_v61 = vunpack.c.h.bf16 %v880_v34 }
  0x43   : > { %643 = vst.msk [vmem:[%s1016_s17 + $0xb0] sm:$0xff] %vm620_vm0, %v610_v52  ;;  %v580_v62 = vadd.f32 %v548_v53, %v406_v49  ;;  %v408_v63 = vadd.f32 %v987_v10, %v369_v54  ;;  %v511_v2 = vmul.f32 %v858_v55, %v978_v1  ;;  %v859_v3 = vunpack.c.h.bf16 %v895_v43 }
  0x44   : > { %644 = vst.msk [vmem:[%s1016_s17 + $0xb8] sm:$0xff] %vm620_vm0, %v611_v58  ;;  %v581_v4 = vadd.f32 %v549_v60, %v407_v59  ;;  %v370_v5 = vmul.f32 %v795_v61, %v973_v0  ;;  %v798_v6 = vunpack.c.l.bf16 %v881_v56  ;;  %v862_v7 = vunpack.c.l.bf16 %v896_v57 }
  0x45   : > { %v612_v8 = vmax.f32 %v580_v62, 0.0  ;;  %v550_v9 = vadd.f32 %v992_v11, %v511_v2  ;;  %v512_v12 = vmul.f32 %v859_v3, %v978_v1  ;;  %v799_v13 = vunpack.c.h.bf16 %v881_v56 }
  0x46   : > { %v613_v16 = vmax.f32 %v581_v4, 0.0  ;;  %v409_v17 = vadd.f32 %v987_v10, %v370_v5  ;;  %v371_v18 = vmul.f32 %v798_v6, %v973_v0  ;;  %v513_v19 = vmul.f32 %v862_v7, %v978_v1 }
  0x47   : > { %645 = vst.msk [vmem:[%s1016_s17 + $0xc0] sm:$0xff] %vm620_vm0, %v612_v8  ;;  %v582_v20 = vadd.f32 %v550_v9, %v408_v63  ;;  %v551_v21 = vadd.f32 %v992_v11, %v512_v12  ;;  %v372_v22 = vmul.f32 %v799_v13, %v973_v0  ;;  %v863_v23 = vunpack.c.h.bf16 %v896_v57 }
  0x48   : > { %646 = vst.msk [vmem:[%s1016_s17 + $0xc8] sm:$0xff] %vm620_vm0, %v613_v16  ;;  %v410_v24 = vadd.f32 %v987_v10, %v371_v18  ;;  %v552_v25 = vadd.f32 %v992_v11, %v513_v19  ;;  %v802_v26 = vunpack.c.l.bf16 %v882_v14  ;;  %v866_v27 = vunpack.c.l.bf16 %v897_v15 }
  0x49   : > { %v614_v28 = vmax.f32 %v582_v20, 0.0  ;;  %v583_v29 = vadd.f32 %v551_v21, %v409_v17  ;;  %v411_v30 = vadd.f32 %v987_v10, %v372_v22  ;;  %v514_v31 = vmul.f32 %v863_v23, %v978_v1 }
  0x4a   : > { %v584_v32 = vadd.f32 %v552_v25, %v410_v24  ;;  %v373_v33 = vmul.f32 %v802_v26, %v973_v0  ;;  %v515_v34 = vmul.f32 %v866_v27, %v978_v1  ;;  %v803_v35 = vunpack.c.h.bf16 %v882_v14 }
  0x4b   : > { %647 = vst.msk [vmem:[%s1016_s17 + $0xd0] sm:$0xff] %vm620_vm0, %v614_v28  ;;  %v615_v36 = vmax.f32 %v583_v29, 0.0  ;;  %v553_v37 = vadd.f32 %v992_v11, %v514_v31  ;;  %v867_v38 = vunpack.c.h.bf16 %v897_v15 }
  0x4c   : > { %v616_v39 = vmax.f32 %v584_v32, 0.0  ;;  %v412_v40 = vadd.f32 %v987_v10, %v373_v33  ;;  %v554_v41 = vadd.f32 %v992_v11, %v515_v34  ;;  %v374_v42 = vmul.f32 %v803_v35, %v973_v0 }
  0x4d   : > { %648 = vst.msk [vmem:[%s1016_s17 + $0xd8] sm:$0xff] %vm620_vm0, %v615_v36  ;;  %v585_v43 = vadd.f32 %v553_v37, %v411_v30  ;;  %v516_v44 = vmul.f32 %v867_v38, %v978_v1 }
  0x4e   : > { %649 = vst.msk [vmem:[%s1016_s17 + $0xe0] sm:$0xff] %vm620_vm0, %v616_v39  ;;  %v586_v45 = vadd.f32 %v554_v41, %v412_v40  ;;  %v413_v46 = vadd.f32 %v987_v10, %v374_v42 }
  0x4f   : > { %v617_v47 = vmax.f32 %v585_v43, 0.0  ;;  %v555_v48 = vadd.f32 %v992_v11, %v516_v44 }
  0x50   : > { %v618_v49 = vmax.f32 %v586_v45, 0.0 }
  0x51   : > { %650 = vst.msk [vmem:[%s1016_s17 + $0xe8] sm:$0xff] %vm620_vm0, %v617_v47  ;;  %v587_v50 = vadd.f32 %v555_v48, %v413_v46 }
  0x52   : > { %651 = vst.msk [vmem:[%s1016_s17 + $0xf0] sm:$0xff] %vm620_vm0, %v618_v49 }
  0x53   : > { %v619_v0 = vmax.f32 %v587_v50, 0.0 }
  0x55   : > { %652 = vst.msk [vmem:[%s1016_s17 + $0xf8] sm:$0xff] %vm620_vm0, %v619_v0 }
  0x56 PF: > { %s16_s21 = sadd.s32 1, %s912_s21  }
  0x57   : > { %p13_p4 = scmp.ge.s32.totalorder %s16_s21, 4  }
  0x59   :  { %15 = sbr.rel (!%p13_p4) target bundleno = 1 (0x1), region = 77 }

// kernel: _lambda_.4
= control target key start
LH: loop header
LB: loop body
LE: loop exit
PB: predicated region body
PF: predicated region fallthrough
CT: control target
= control target key end

     0   :  { %s3650_s18 = smov 0   ;;  %s4731_s0 = inlined_call_operand.vmem [shape: bf16[2,16,16,128], index: 0, kind: input, shape index: {}]   ;;  %s4732_s1 = inlined_call_operand.vmem [shape: f32[1,128], index: 1, kind: input, shape index: {}]   ;;  %s4733_s2 = inlined_call_operand.vmem [shape: f32[1,128], index: 2, kind: input, shape index: {}]   ;;  %s4734_s3 = inlined_call_operand.vmem [shape: bf16[1152,128], index: 3, kind: input, shape index: {}]   ;;  %s4735_s4 = inlined_call_operand.vmem [shape: bf16[2,16,16,128], index: 4, kind: output, shape index: {0}]   ;;  %s4736_s5 = inlined_call_operand.vmem [shape: f32[2,2,128], index: 5, kind: output, shape index: {1}]  }
   0x1 LB: > { %s2666_s19 = sadd.s32 4294967295, %s3616_s18   ;;  %p2670_p0 = scmp.ge.s32.totalorder %s3616_s18, 1  ;;  %s3616_s18 = sphi %s3650_s18, %s16_s18  }
   0x2   : > { %p190_p1 = scmp.lt.s32.totalorder %s3616_s18, 3 }
   0x4   : > { %p191_p2 = pnand %p2670_p0, %p190_p1 }
   0x6   : > { %194 = sbr.rel (%p191_p2) target bundleno = 551 (0x227), region = 36 }
   0xb   : > { %v3537_v0 = vld [vmem:[%s4734_s3 + $0x78] sm:$0xff]   ;;  %v3618_v2 = vmov 0.0   ;;  %v3539_v3 = vld [vmem:[%s4734_s3 + $0x70] sm:$0xff]   ;;  %p222_p3 = scmp.lt.s32.totalorder %s2666_s19, 1  ;;  %v3541_v5 = vld [vmem:[%s4734_s3 + $0x68] sm:$0xff]  }
   0xc   : > { %v3538_v1 = vld [vmem:[%s4734_s3 + $0x38] sm:$0xff]   ;;  %411 = vst [vmem:[#allocation2] sm:$0xff] %v3618_v2  ;;  %412 = vst [vmem:[#allocation2 + $0x8] sm:$0xff] %v3618_v2  ;;  %2992 = vmatprep.subr.bf16.mxu0 %v3537_v0  ;;  %3512 = vmatprep.subr.bf16.mxu1 %v3537_v0  ;;  %v3540_v4 = vld [vmem:[%s4734_s3 + $0x30] sm:$0xff]  }
   0xd   : > { %413 = vst [vmem:[#allocation2 + $0x10] sm:$0x3] %v3618_v2  ;;  %414 = vst [vmem:[#allocation2 + $0x18] sm:$0xff] %v3618_v2  ;;  %2993 = vmatpush3.bf16.msra.mxu0 %v3538_v1  ;;  %3520 = vmatpush3.bf16.msra.mxu1 %v3538_v1  ;;  %s4760_s19 = smov (!%p222_p3, %s2666_s19), 1  ;;  %v3542_v6 = vld [vmem:[%s4734_s3 + $0x28] sm:$0xff]   ;;  %v3543_v7 = vld [vmem:[%s4734_s3 + $0x60] sm:$0xff]  }
   0xe   : > { %415 = vst [vmem:[#allocation2 + $0x20] sm:$0xff] %v3618_v2  ;;  %416 = vst [vmem:[#allocation2 + $0x28] sm:$0x3] %v3618_v2  ;;  %2994 = vmatprep.subr.bf16.mxu0 %v3539_v3  ;;  %3513 = vmatprep.subr.bf16.mxu1 %v3539_v3  ;;  %s2784_s9 = sshll.u32 %s4760_s19, 7  ;;  %v3544_v8 = vld [vmem:[%s4734_s3 + $0x20] sm:$0xff]   ;;  %v3545_v9 = vld [vmem:[%s4734_s3 + $0x58] sm:$0xff]  }
   0xf   : > { %417 = vst [vmem:[#allocation2 + $0x30] sm:$0xff] %v3618_v2  ;;  %418 = vst [vmem:[#allocation2 + $0x38] sm:$0xff] %v3618_v2  ;;  %s3697_s16 = scalar_lea.vmem %s4731_s0, %s2784_s9  ;;  %v3546_v10 = vld [vmem:[%s4734_s3 + $0x18] sm:$0xff]   ;;  %v3547_v11 = vld [vmem:[%s4734_s3 + $0x50] sm:$0xff]   ;;  %s4630_s24 = scalar_lea.vmem %s4735_s4, %s2784_s9 }
  0x10   : > { %419 = vst [vmem:[#allocation2 + $0x40] sm:$0x3] %v3618_v2  ;;  %420 = vst [vmem:[#allocation2 + $0x48] sm:$0xff] %v3618_v2  ;;  %v2972_v14 = vld [vmem:[%s3697_s16 + $0x58] sm:$0xff]   ;;  %v3709_v18 = vld [vmem:[%s4732_s1] ss:$0 sm:$0xff] }
  0x11   : > { %421 = vst [vmem:[#allocation2 + $0x50] sm:$0xff] %v3618_v2  ;;  %422 = vst [vmem:[#allocation2 + $0x58] sm:$0x3] %v3618_v2  ;;  %2995 = vmatpush3.bf16.msra.mxu0 %v3540_v4  ;;  %3521 = vmatpush3.bf16.msra.mxu1 %v3540_v4  ;;  %v2864_v16 = vunpack.c.l.bf16 %v2972_v14  ;;  %v2865_v17 = vunpack.c.h.bf16 %v2972_v14  ;;  %v3714_v19 = vld [vmem:[%s4733_s2] ss:$0 sm:$0xff]  ;;  %v3548_v20 = vld [vmem:[%s4734_s3 + $0x10] sm:$0xff]  }
  0x12   : > { %423 = vst [vmem:[#allocation2 + $0x60] sm:$0xff] %v3618_v2  ;;  %424 = vst [vmem:[#allocation2 + $0x68] sm:$0xff] %v3618_v2  ;;  %2996 = vmatprep.subr.bf16.mxu0 %v3541_v5  ;;  %3514 = vmatprep.subr.bf16.mxu1 %v3541_v5  ;;  %v3549_v23 = vld [vmem:[%s4734_s3 + $0x48] sm:$0xff]   ;;  %v3551_v27 = vld [vmem:[%s4734_s3 + $0x40] sm:$0xff]   ;;  %v3619_v4 = vmov 0.0|0.0   ;;  %s2675_s9 = sshll.u32 %s4760_s19, 1 }
  0x13   : > { %425 = vst [vmem:[#allocation2 + $0x70] sm:$0x3] %v3618_v2  ;;  %426 = vst [vmem:[#allocation2 + $0x78] sm:$0xff] %v3618_v2  ;;  %v546_v12 = vld [vmem:[#allocation2 + $0x1] sm:$0xff]  ;;  %v330_v21 = vmul.f32 %v2864_v16, %v3709_v18  ;;  %v331_v22 = vmul.f32 %v2865_v17, %v3709_v18  ;;  %v3553_v40 = vld [vmem:[%s4734_s3 + $0xf8] sm:$0xff]   ;;  %s235_s27 = scalar_lea.vmem %s4736_s5, %s2675_s9 }
  0x14   : > { %427 = vst [vmem:[#allocation2 + $0x80] sm:$0xff] %v3618_v2  ;;  %428 = vst [vmem:[#allocation2 + $0x88] sm:$0x3] %v3618_v2  ;;  %v547_v13 = vld [vmem:[#allocation2 + $0x9] sm:$0xff]  ;;  %v2819_v30 = vld [vmem:[%s3697_s16] sm:$0xff]  }
  0x15   : > { %429 = vst [vmem:[#allocation2 + $0x90] sm:$0xff] %v3618_v2  ;;  %430 = vst [vmem:[#allocation2 + $0x98] sm:$0xff] %v3618_v2  ;;  %2997 = vmatpush3.bf16.msra.mxu0 %v3542_v6  ;;  %3522 = vmatpush3.bf16.msra.mxu1 %v3542_v6  ;;  %v578_v15 = vpack.c.bf16 %v547_v13, %v546_v12  ;;  %v369_v24 = vadd.f32 %v3714_v19, %v330_v21  ;;  %v3550_v26 = vld [vmem:[%s4734_s3 + $0x8] sm:$0xff]   ;;  %v2820_v31 = vunpack.c.l.bf16 %v2819_v30  ;;  %v2973_v33 = vld [vmem:[%s3697_s16 + $0x60] sm:$0xff]  }
  0x16   : > { %431 = vst [vmem:[#allocation2 + $0xa0] sm:$0x3] %v3618_v2  ;;  %432 = vst [vmem:[#allocation2 + $0xa8] sm:$0xff] %v3618_v2  ;;  %2998 = vmatprep.subr.bf16.mxu0 %v3543_v7  ;;  %3515 = vmatprep.subr.bf16.mxu1 %v3543_v7  ;;  %v370_v25 = vadd.f32 %v3714_v19, %v331_v22  ;;  %v2821_v32 = vunpack.c.h.bf16 %v2819_v30  ;;  %v2868_v35 = vunpack.c.l.bf16 %v2973_v33  ;;  %v2869_v36 = vunpack.c.h.bf16 %v2973_v33  ;;  %v3552_v37 = vld [vmem:[%s4734_s3] sm:$0xff]   ;;  %v3554_v43 = vld [vmem:[%s4734_s3 + $0x178] sm:$0xff]  }
  0x17   : > { %433 = vst [vmem:[#allocation2 + $0xb0] sm:$0xff] %v3618_v2  ;;  %434 = vst [vmem:[#allocation2 + $0xb8] sm:$0x3] %v3618_v2  ;;  %1539 = vmatprep.mubr.bf16.mxu0 %v578_v15  ;;  %v401_v28 = vmax.f32 %v369_v24, 0.0  ;;  %v308_v38 = vmul.f32 %v2820_v31, %v3709_v18  ;;  %v3556_v48 = vld [vmem:[%s4734_s3 + $0x138] sm:$0xff]   ;;  %v2962_v51 = vld [vmem:[%s3697_s16 + $0x8] sm:$0xff]  }
  0x18   : > { %435 = vst [vmem:[#allocation2 + $0xc0] sm:$0xff] %v3618_v2  ;;  %436 = vst [vmem:[#allocation2 + $0xc8] sm:$0xff] %v3618_v2  ;;  %v402_v29 = vmax.f32 %v370_v25, 0.0  ;;  %v309_v39 = vmul.f32 %v2821_v32, %v3709_v18  ;;  %v332_v41 = vmul.f32 %v2868_v35, %v3709_v18  ;;  %v333_v42 = vmul.f32 %v2869_v36, %v3709_v18  ;;  %v2974_v52 = vld [vmem:[%s3697_s16 + $0x68] sm:$0xff]   ;;  %v3555_v59 = vld [vmem:[%s4734_s3 + $0xb8] sm:$0xff]  }
  0x19   : > { %437 = vst [vmem:[#allocation2 + $0xd0] sm:$0x3] %v3618_v2  ;;  %438 = vst [vmem:[#allocation2 + $0xd8] sm:$0xff] %v3618_v2  ;;  %2999 = vmatpush3.bf16.msra.mxu0 %v3544_v8  ;;  %3523 = vmatpush3.bf16.msra.mxu1 %v3544_v8  ;;  %v347_v44 = vadd.f32 %v3714_v19, %v308_v38  ;;  %v2824_v55 = vunpack.c.l.bf16 %v2962_v51  ;;  %v2825_v56 = vunpack.c.h.bf16 %v2962_v51  ;;  %v2872_v61 = vunpack.c.l.bf16 %v2974_v52  ;;  %v3557_v0 = vld [vmem:[%s4734_s3 + $0xf0] sm:$0xff]   ;;  %v3559_v16 = vld [vmem:[%s4734_s3 + $0xe8] sm:$0xff]  }
  0x1a   : > { %439 = vst [vmem:[#allocation2 + $0xe0] sm:$0xff] %v3618_v2  ;;  %440 = vst [vmem:[#allocation2 + $0xe8] sm:$0x3] %v3618_v2  ;;  %3000 = vmatprep.subr.bf16.mxu0 %v3545_v9  ;;  %3516 = vmatprep.subr.bf16.mxu1 %v3545_v9  ;;  %v590_v34 = vpack.c.bf16 %v402_v29, %v401_v28  ;;  %v348_v45 = vadd.f32 %v3714_v19, %v309_v39  ;;  %v2873_v62 = vunpack.c.h.bf16 %v2974_v52  ;;  %v3558_v5 = vld [vmem:[%s4734_s3 + $0xb0] sm:$0xff]   ;;  %v3560_v24 = vld [vmem:[%s4734_s3 + $0xa8] sm:$0xff]  }
  0x1b   : > { %441 = vst [vmem:[#allocation2 + $0xf0] sm:$0xff] %v3618_v2  ;;  %442 = vst [vmem:[#allocation2 + $0xf8] sm:$0xff] %v3618_v2  ;;  %v371_v46 = vadd.f32 %v3714_v19, %v332_v41  ;;  %v372_v47 = vadd.f32 %v3714_v19, %v333_v42  ;;  %v379_v49 = vmax.f32 %v347_v44, 0.0  ;;  %v311_v3 = vmul.f32 %v2825_v56, %v3709_v18  ;;  %v3562_v6 = vld [vmem:[%s4734_s3 + $0x170] sm:$0xff]   ;;  %v3561_v41 = vld [vmem:[%s4734_s3 + $0xe0] sm:$0xff]  }
  0x1c   : > { %443 = vst [vmem:[#allocation2 + $0x100] sm:$0x3] %v3618_v2  ;;  %444 = vst [vmem:[#allocation2 + $0x108] sm:$0xff] %v3618_v2  ;;  %1635 = vmatprep.mubr.bf16.mxu1 %v590_v34  ;;  %v380_v50 = vmax.f32 %v348_v45, 0.0  ;;  %v334_v7 = vmul.f32 %v2872_v61, %v3709_v18  ;;  %v335_v8 = vmul.f32 %v2873_v62, %v3709_v18  ;;  %v3564_v9 = vld [vmem:[%s4734_s3 + $0x130] sm:$0xff]   ;;  %v2964_v52 = vld [vmem:[%s3697_s16 + $0x18] sm:$0xff]  }
  0x1d   : > { %445 = vst [vmem:[#allocation2 + $0x110] sm:$0xff] %v3618_v2  ;;  %446 = vst [vmem:[#allocation2 + $0x118] sm:$0x3] %v3618_v2  ;;  %3001 = vmatpush3.bf16.msra.mxu0 %v3546_v10  ;;  %3524 = vmatpush3.bf16.msra.mxu1 %v3546_v10  ;;  %v403_v53 = vmax.f32 %v371_v46, 0.0  ;;  %v404_v54 = vmax.f32 %v372_v47, 0.0  ;;  %v2963_v14 = vld [vmem:[%s3697_s16 + $0x10] sm:$0xff]  }
  0x1e   : > { %447 = vst [vmem:[#allocation2 + $0x120] sm:$0xff] %v3618_v2  ;;  %448 = vst [vmem:[#allocation2 + $0x128] sm:$0xff] %v3618_v2  ;;  %3002 = vmatprep.subr.bf16.mxu0 %v3547_v11  ;;  %3517 = vmatprep.subr.bf16.mxu1 %v3547_v11  ;;  %v3759_v60 = vpack.c.bf16 %v380_v50, %v379_v49  ;;  %v350_v11 = vadd.f32 %v3714_v19, %v311_v3  ;;  %v2975_v15 = vld [vmem:[%s3697_s16 + $0x70] sm:$0xff]   ;;  %v2828_v21 = vunpack.c.l.bf16 %v2963_v14  ;;  %v3572_v46 = vld [vmem:[%s4734_s3 + $0x128] sm:$0xff]  }
  0x1f   : > { %449 = vst [vmem:[#allocation2 + $0x130] sm:$0x3] %v3618_v2  ;;  %450 = vst [vmem:[#allocation2 + $0x138] sm:$0xff] %v3618_v2  ;;  %v591_v1 = vpack.c.bf16 %v404_v54, %v403_v53  ;;  %v373_v12 = vadd.f32 %v3714_v19, %v334_v7  ;;  %v374_v13 = vadd.f32 %v3714_v19, %v335_v8  ;;  %v2829_v22 = vunpack.c.h.bf16 %v2963_v14  ;;  %v3567_v3 = vld [vmem:[%s4734_s3 + $0xd0] sm:$0xff]   ;;  %v3577_v7 = vld [vmem:[%s4734_s3 + $0x160] sm:$0xff]  }
  0x20   : > { %451 = vst [vmem:[#allocation2 + $0x140] sm:$0xff] %v3618_v2  ;;  %452 = vst [vmem:[#allocation2 + $0x148] sm:$0x3] %v3618_v2  ;;  %v312_v32 = vmul.f32 %v2828_v21, %v3709_v18  ;;  %v3578_v8 = vld [vmem:[%s4734_s3 + $0x120] sm:$0xff]   ;;  %v2966_v14 = vld [vmem:[%s3697_s16 + $0x28] sm:$0xff]  }
  0x21   : > { %453 = vst [vmem:[#allocation2 + $0x150] sm:$0xff] %v3618_v2  ;;  %454 = vst [vmem:[#allocation2 + $0x158] sm:$0xff] %v3618_v2  ;;  %3003 = vmatpush3.bf16.msra.mxu0 %v3548_v20  ;;  %3525 = vmatpush3.bf16.msra.mxu1 %v3548_v20  ;;  %v382_v20 = vmax.f32 %v350_v11, 0.0  ;;  %v405_v25 = vmax.f32 %v373_v12, 0.0  ;;  %v313_v33 = vmul.f32 %v2829_v22, %v3709_v18  ;;  %v2841_v21 = vunpack.c.h.bf16 %v2966_v14 }
  0x22   : > { %455 = vst [vmem:[#allocation2 + $0x160] sm:$0x3] %v3618_v2  ;;  %456 = vst [vmem:[#allocation2 + $0x168] sm:$0xff] %v3618_v2  ;;  %3004 = vmatprep.subr.bf16.mxu0 %v3549_v23  ;;  %3518 = vmatprep.subr.bf16.mxu1 %v3549_v23  ;;  %v3570_v23 = vld [vmem:[%s4734_s3 + $0x168] sm:$0xff]   ;;  %v351_v42 = vadd.f32 %v3714_v19, %v312_v32 }
  0x23   : > { %457 = vst [vmem:[#allocation2 + $0x170] sm:$0xff] %v3618_v2  ;;  %458 = vst [vmem:[#allocation2 + $0x178] sm:$0x3] %v3618_v2 }
  0x24   : > { %459 = vst [vmem:[#allocation2 + $0x180] sm:$0xff] %v3618_v2  ;;  %460 = vst [vmem:[#allocation2 + $0x188] sm:$0xff] %v3618_v2  ;;  %v383_v47 = vmax.f32 %v351_v42, 0.0  ;;  %v3581_v42 = vld [vmem:[%s4734_s3 + $0x118] sm:$0xff]  }
  0x25   : > { %461 = vst [vmem:[#allocation2 + $0x190] sm:$0x3] %v3618_v2  ;;  %462 = vst [vmem:[#allocation2 + $0x198] sm:$0xff] %v3618_v2  ;;  %3005 = vmatpush3.bf16.msra.mxu0 %v3550_v26  ;;  %3526 = vmatpush3.bf16.msra.mxu1 %v3550_v26  ;;  %v406_v26 = vmax.f32 %v374_v13, 0.0 }
  0x26   : > { %463 = vst [vmem:[#allocation2 + $0x1a0] sm:$0xff] %v3618_v2  ;;  %464 = vst [vmem:[#allocation2 + $0x1a8] sm:$0x3] %v3618_v2  ;;  %3006 = vmatprep.subr.bf16.mxu0 %v3551_v27  ;;  %3519 = vmatprep.subr.bf16.mxu1 %v3551_v27  ;;  %v310_v2 = vmul.f32 %v2824_v55, %v3709_v18  ;;  %v2876_v27 = vunpack.c.l.bf16 %v2975_v15  ;;  %v2833_v55 = vunpack.c.h.bf16 %v2964_v52 }
  0x27   : > { %488 = vst [vmem:[#allocation2 + $0x121] sm:$0xff] %v401_v28  ;;  %489 = vst [vmem:[#allocation2 + $0x129] sm:$0xff] %v402_v29  ;;  %v2877_v28 = vunpack.c.h.bf16 %v2975_v15  ;;  %v3568_v15 = vld [vmem:[%s4734_s3 + $0x90] sm:$0xff]  }
  0x28   : > { %466 = vst [vmem:[#allocation2 + $0x19] sm:$0xff] %v379_v49  ;;  %467 = vst [vmem:[#allocation2 + $0x21] sm:$0xff] %v380_v50  ;;  %v349_v10 = vadd.f32 %v3714_v19, %v310_v2  ;;  %v336_v38 = vmul.f32 %v2876_v27, %v3709_v18  ;;  %v3563_v49 = vld [vmem:[%s4734_s3 + $0xa0] sm:$0xff]  }
  0x29   : > { %3007 = vmatpush3.bf16.msra.mxu0 %v3552_v37  ;;  %3527 = vmatpush3.bf16.msra.mxu1 %v3552_v37  ;;  %490 = vst [vmem:[#allocation2 + $0x139] sm:$0xff] %v403_v53  ;;  %491 = vst [vmem:[#allocation2 + $0x141] sm:$0xff] %v404_v54  ;;  %v592_v37 = vpack.c.bf16 %v406_v26, %v405_v25  ;;  %v337_v39 = vmul.f32 %v2877_v28, %v3709_v18  ;;  %v3565_v53 = vld [vmem:[%s4734_s3 + $0xd8] sm:$0xff]   ;;  %v2832_v54 = vunpack.c.l.bf16 %v2964_v52 }
  0x2a   : > { %3104 = vmatprep.subr.bf16.mxu1 %v3553_v40  ;;  %3216 = vmatprep.subr.bf16.mxu0 %v3554_v43  ;;  %v381_v17 = vmax.f32 %v349_v10, 0.0  ;;  %469 = vst [vmem:[#allocation2 + $0x39] sm:$0xff] %v382_v20  ;;  %492 = vst [vmem:[#allocation2 + $0x151] sm:$0xff] %v405_v25  ;;  %v352_v43 = vadd.f32 %v3714_v19, %v313_v33  ;;  %v375_v44 = vadd.f32 %v3714_v19, %v336_v38  ;;  %v3571_v33 = vld [vmem:[%s4734_s3 + $0x88] sm:$0xff]  }
  0x2b   : > { %493 = vst [vmem:[#allocation2 + $0x159] sm:$0xff] %v406_v26  ;;  %v376_v45 = vadd.f32 %v3714_v19, %v337_v39  ;;  %470 = vst [vmem:[#allocation2 + $0x49] sm:$0xff] %v383_v47 }
  0x2c   : > { %1540 = vmatmul.mubr.bf16.vlgmr.msra.gmra.mxu0 %v3619_v4  ;;  %468 = vst [vmem:[#allocation2 + $0x31] sm:$0xff] %v381_v17  ;;  %v3793_v31 = vpack.c.bf16 %v382_v20, %v381_v17  ;;  %v407_v50 = vmax.f32 %v375_v44, 0.0  ;;  %v2840_v20 = vunpack.c.l.bf16 %v2966_v14  ;;  %v594_v44 = vld [vmem:[#allocation2 + $0x2] sm:$0xff] }
  0x2d   : > { %3217 = vmatpush3.bf16.msra.mxu0 %v3556_v48  ;;  %1547 = vmatprep.mubr.bf16.mxu0 %v3759_v60  ;;  %v384_v48 = vmax.f32 %v352_v43, 0.0  ;;  %v408_v51 = vmax.f32 %v376_v45, 0.0  ;;  %v3574_v43 = vld [vmem:[%s4734_s3 + $0x80] sm:$0xff]   ;;  %v595_v45 = vld [vmem:[#allocation2 + $0xa] sm:$0xff] }
  0x2e   : > { %v522_v57 = vld [vmem:[#allocation2 + $0x120] sm:$0xff]  ;;  %v523_v58 = vld [vmem:[#allocation2 + $0x128] sm:$0xff]  ;;  %3218 = vmatprep.subr.bf16.mxu0 %v3562_v6  ;;  %494 = vst [vmem:[#allocation2 + $0x169] sm:$0xff] %v407_v50  ;;  %v318_v28 = vmul.f32 %v2840_v20, %v3709_v18 }
  0x2f   : > { %v542_v63 = vpack.c.bf16 %v523_v58, %v522_v57  ;;  %v500_v29 = vld [vmem:[#allocation2 + $0x18] sm:$0xff]  ;;  %v501_v30 = vld [vmem:[#allocation2 + $0x20] sm:$0xff]  ;;  %471 = vst [vmem:[#allocation2 + $0x51] sm:$0xff] %v384_v48  ;;  %495 = vst [vmem:[#allocation2 + $0x171] sm:$0xff] %v408_v51  ;;  %v593_v4 = vpack.c.bf16 %v408_v51, %v407_v50 }
  0x30   : > { %v3797_v34 = vpack.c.bf16 %v501_v30, %v500_v29  ;;  %v524_v35 = vld [vmem:[#allocation2 + $0x138] sm:$0xff]  ;;  %v525_v36 = vld [vmem:[#allocation2 + $0x140] sm:$0xff]  ;;  %v319_v29 = vmul.f32 %v2841_v21, %v3709_v18  ;;  %v3875_v39 = vadd.f32 %v3714_v19, %v318_v28 }
  0x31   : > { %1636 = vmatmul.mubr.bf16.vlgmr.msra.gmra.mxu1 %v542_v63  ;;  %3219 = vmatpush3.bf16.msra.mxu0 %v3564_v9  ;;  %v543_v40 = vpack.c.bf16 %v525_v36, %v524_v35  ;;  %v3566_v58 = vld [vmem:[%s4734_s3 + $0x98] sm:$0xff]   ;;  %v526_v61 = vld [vmem:[#allocation2 + $0x150] sm:$0xff]  ;;  %v3825_v63 = vpack.c.bf16 %v384_v48, %v383_v47  ;;  %v2965_v9 = vld [vmem:[%s3697_s16 + $0x20] sm:$0xff]  }
  0x32   : > { %3105 = vmatpush3.bf16.msra.mxu1 %v3555_v59  ;;  %1643 = vmatprep.mubr.bf16.mxu1 %v591_v1  ;;  %v527_v62 = vld [vmem:[#allocation2 + $0x158] sm:$0xff]  ;;  %v315_v1 = vmul.f32 %v2833_v55, %v3709_v18  ;;  %v2836_v12 = vunpack.c.l.bf16 %v2965_v9  ;;  %v2837_v13 = vunpack.c.h.bf16 %v2965_v9  ;;  %v389_v47 = vmax.f32 %v3875_v39, 0.0 }
  0x33   : > { %3106 = vmatprep.subr.bf16.mxu1 %v3557_v0  ;;  %3220 = vmatprep.subr.bf16.mxu0 %v3570_v23  ;;  %v502_v56 = vld [vmem:[#allocation2 + $0x30] sm:$0xff]  ;;  %v503_v57 = vld [vmem:[#allocation2 + $0x38] sm:$0xff]  ;;  %v314_v0 = vmul.f32 %v2832_v54, %v3709_v18  ;;  %v3829_v2 = vpack.c.bf16 %v527_v62, %v526_v61 }
  0x34   : > { %1548 = vmatmul.mubr.bf16.gmra.mxu0 %v3797_v34  ;;  %v3823_v59 = vpack.c.bf16 %v503_v57, %v502_v56  ;;  %v354_v6 = vadd.f32 %v3714_v19, %v315_v1  ;;  %v316_v25 = vmul.f32 %v2836_v12, %v3709_v18  ;;  %v317_v27 = vmul.f32 %v2837_v13, %v3709_v18  ;;  %v3579_v30 = vld [vmem:[%s4734_s3 + $0x158] sm:$0xff]  }
  0x35   : > { %1555 = vmatprep.mubr.bf16.mxu0 %v3793_v31  ;;  %3221 = vmatpush3.bf16.msra.mxu0 %v3572_v46  ;;  %v528_v22 = vld [vmem:[#allocation2 + $0x168] sm:$0xff]  ;;  %v3575_v50 = vld [vmem:[%s4734_s3 + $0x1f8] sm:$0xff]   ;;  %476 = vst [vmem:[#allocation2 + $0x91] sm:$0xff] %v389_v47  ;;  %v626_v1 = vpack.c.bf16 %v595_v45, %v594_v44 }
  0x36   : > { %3107 = vmatpush3.bf16.msra.mxu1 %v3558_v5  ;;  %v353_v5 = vadd.f32 %v3714_v19, %v314_v0  ;;  %v386_v11 = vmax.f32 %v354_v6, 0.0  ;;  %v505_v17 = vld [vmem:[#allocation2 + $0x50] sm:$0xff]  ;;  %3222 = vmatprep.subr.bf16.mxu0 %v3577_v7  ;;  %v355_v36 = vadd.f32 %v3714_v19, %v316_v25  ;;  %v356_v38 = vadd.f32 %v3714_v19, %v317_v27  ;;  %v597_v25 = vld [vmem:[#allocation2 + $0x22] sm:$0xff] }
  0x37   : > { %3108 = vmatprep.subr.bf16.mxu1 %v3559_v16  ;;  %v504_v16 = vld [vmem:[#allocation2 + $0x48] sm:$0xff]  ;;  %v529_v23 = vld [vmem:[#allocation2 + $0x170] sm:$0xff] }
  0x38   : > { %v385_v10 = vmax.f32 %v353_v5, 0.0  ;;  %473 = vst [vmem:[#allocation2 + $0x69] sm:$0xff] %v386_v11  ;;  %v3854_v26 = vpack.c.bf16 %v505_v17, %v504_v16  ;;  %v3862_v32 = vpack.c.bf16 %v529_v23, %v528_v22  ;;  %v388_v46 = vmax.f32 %v356_v38, 0.0  ;;  %v3580_v7 = vld [vmem:[%s4734_s3 + $0x1f0] sm:$0xff]   ;;  %v3587_v17 = vld [vmem:[%s4734_s3 + $0x148] sm:$0xff]   ;;  %v596_v22 = vld [vmem:[#allocation2 + $0x1a] sm:$0xff] }
  0x39   : > { %1644 = vmatmul.mubr.bf16.gmra.mxu1 %v543_v40  ;;  %3223 = vmatpush3.bf16.msra.mxu0 %v3578_v8  ;;  %v3878_v40 = vadd.f32 %v3714_v19, %v319_v29  ;;  %v3582_v27 = vld [vmem:[%s4734_s3 + $0x1b0] sm:$0xff]   ;;  %v3586_v45 = vld [vmem:[%s4734_s3 + $0x1a8] sm:$0xff]  }
  0x3a   : > { %3109 = vmatpush3.bf16.msra.mxu1 %v3560_v24  ;;  %1651 = vmatprep.mubr.bf16.mxu1 %v592_v37  ;;  %v3569_v24 = vld [vmem:[%s4734_s3 + $0xc8] sm:$0xff]   ;;  %472 = vst [vmem:[#allocation2 + $0x61] sm:$0xff] %v385_v10  ;;  %v3867_v35 = vpack.c.bf16 %v386_v11, %v385_v10  ;;  %v3573_v37 = vld [vmem:[%s4734_s3 + $0xc0] sm:$0xff]   ;;  %475 = vst [vmem:[#allocation2 + $0x81] sm:$0xff] %v388_v46 }
  0x3b   : > { %3110 = vmatprep.subr.bf16.mxu1 %v3561_v41  ;;  %3224 = vmatprep.subr.bf16.mxu0 %v3579_v30  ;;  %v387_v41 = vmax.f32 %v355_v36, 0.0  ;;  %v390_v48 = vmax.f32 %v3878_v40, 0.0  ;;  %v2969_v10 = vld [vmem:[%s3697_s16 + $0x40] sm:$0xff]   ;;  %v3585_v30 = vld [vmem:[%s4734_s3 + $0x1e8] sm:$0xff]  }
  0x3c   : > { %1556 = vmatmul.mubr.bf16.gmra.mxu0 %v3823_v59  ;;  %v2852_v13 = vunpack.c.l.bf16 %v2969_v10  ;;  %v2853_v14 = vunpack.c.h.bf16 %v2969_v10 }
  0x3d   : > { %1563 = vmatprep.mubr.bf16.mxu0 %v3825_v63  ;;  %474 = vst [vmem:[#allocation2 + $0x79] sm:$0xff] %v387_v41  ;;  %477 = vst [vmem:[#allocation2 + $0x99] sm:$0xff] %v390_v48  ;;  %3225 = vmatpush3.bf16.msra.mxu0 %v3581_v42  ;;  %v3978_v44 = vpack.c.bf16 %v390_v48, %v389_v47  ;;  %v3591_v47 = vld [vmem:[%s4734_s3 + $0x140] sm:$0xff]   ;;  %v510_v48 = vld [vmem:[#allocation2 + $0x90] sm:$0xff] }
  0x3e   : > { %3111 = vmatpush3.bf16.msra.mxu1 %v3563_v49  ;;  %v2967_v49 = vld [vmem:[%s3697_s16 + $0x30] sm:$0xff]   ;;  %v324_v23 = vmul.f32 %v2852_v13, %v3709_v18  ;;  %v4038_v13 = vld [vmem:[%s4734_s3 + $0x238] sm:$0xff]  }
  0x3f   : > { %3112 = vmatprep.subr.bf16.mxu1 %v3565_v53  ;;  %v2844_v51 = vunpack.c.l.bf16 %v2967_v49  ;;  %v2845_v52 = vunpack.c.h.bf16 %v2967_v49  ;;  %v3583_v53 = vld [vmem:[%s4734_s3 + $0x150] sm:$0xff]  }
  0x40   : > { %3226 = vmatprep.subr.bf16.mxu0 %v3583_v53 }
  0x41   : > { %1652 = vmatmul.mubr.bf16.gmra.mxu1 %v3829_v2  ;;  %v506_v54 = vld [vmem:[#allocation2 + $0x60] sm:$0xff]  ;;  %v507_v55 = vld [vmem:[#allocation2 + $0x68] sm:$0xff]  ;;  %v320_v56 = vmul.f32 %v2844_v51, %v3709_v18  ;;  %v321_v57 = vmul.f32 %v2845_v52, %v3709_v18  ;;  %v598_v51 = vld [vmem:[#allocation2 + $0x32] sm:$0xff] }
  0x42   : > { %3113 = vmatpush3.bf16.msra.mxu1 %v3566_v58  ;;  %1659 = vmatprep.mubr.bf16.mxu1 %v593_v4  ;;  %v2968_v58 = vld [vmem:[%s3697_s16 + $0x38] sm:$0xff]   ;;  %v3909_v61 = vpack.c.bf16 %v507_v55, %v506_v54  ;;  %v3914_v4 = vpack.c.bf16 %v388_v46, %v387_v41  ;;  %v3592_v55 = vld [vmem:[%s4734_s3 + $0x100] sm:$0xff]  }
  0x43   : > { %3114 = vmatprep.subr.bf16.mxu1 %v3567_v3  ;;  %v2848_v62 = vunpack.c.l.bf16 %v2968_v58  ;;  %v2849_v0 = vunpack.c.h.bf16 %v2968_v58  ;;  %v3576_v3 = vld [vmem:[%s4734_s3 + $0x1b8] sm:$0xff]   ;;  %v3917_v5 = vadd.f32 %v3714_v19, %v320_v56  ;;  %v3920_v6 = vadd.f32 %v3714_v19, %v321_v57  ;;  %v3590_v57 = vld [vmem:[%s4734_s3 + $0x1a0] sm:$0xff]  }
  0x44   : > { %1564 = vmatmul.mubr.bf16.gmra.mxu0 %v3854_v26  ;;  %v508_v20 = vld [vmem:[#allocation2 + $0x78] sm:$0xff]  ;;  %v509_v21 = vld [vmem:[#allocation2 + $0x80] sm:$0xff] }
  0x45   : > { %1571 = vmatprep.mubr.bf16.mxu0 %v3867_v35  ;;  %v322_v8 = vmul.f32 %v2848_v62, %v3709_v18  ;;  %v323_v9 = vmul.f32 %v2849_v0, %v3709_v18  ;;  %v391_v11 = vmax.f32 %v3917_v5, 0.0  ;;  %v392_v12 = vmax.f32 %v3920_v6, 0.0  ;;  %v599_v52 = vld [vmem:[#allocation2 + $0x3a] sm:$0xff]  ;;  %v600_v6 = vld [vmem:[#allocation2 + $0x4a] sm:$0xff] }
  0x46   : > { %3115 = vmatpush3.bf16.msra.mxu1 %v3568_v15  ;;  %v3966_v38 = vpack.c.bf16 %v509_v21, %v508_v20  ;;  %v511_v56 = vld [vmem:[#allocation2 + $0x98] sm:$0xff] }
  0x47   : > { %3116 = vmatprep.subr.bf16.mxu1 %v3569_v24  ;;  %v3932_v15 = vadd.f32 %v3714_v19, %v322_v8  ;;  %v3935_v16 = vadd.f32 %v3714_v19, %v323_v9  ;;  %478 = vst [vmem:[#allocation2 + $0xa9] sm:$0xff] %v391_v11  ;;  %479 = vst [vmem:[#allocation2 + $0xb1] sm:$0xff] %v392_v12  ;;  %v325_v24 = vmul.f32 %v2853_v14, %v3709_v18  ;;  %v3593_v8 = vld [vmem:[%s4734_s3 + $0x1d8] sm:$0xff]  }
  0x48   : > { %v4027_v9 = vpack.c.bf16 %v599_v52, %v598_v51  ;;  %v4033_v10 = vpack.c.bf16 %v392_v12, %v391_v11  ;;  %v3595_v5 = vld [vmem:[%s4734_s3 + $0x198] sm:$0xff]  }
  0x49   : > { %1660 = vmatmul.mubr.bf16.gmra.mxu1 %v3862_v32  ;;  %v393_v28 = vmax.f32 %v3932_v15, 0.0  ;;  %v394_v29 = vmax.f32 %v3935_v16, 0.0  ;;  %v3960_v36 = vadd.f32 %v3714_v19, %v325_v24  ;;  %v603_v15 = vld [vmem:[#allocation2 + $0x6a] sm:$0xff] }
  0x4a   : > { %3117 = vmatpush3.bf16.msra.mxu1 %v3571_v33  ;;  %1700 = vmatprep.mubr.bf16.mxu1 %v3797_v34  ;;  %v3584_v34 = vld [vmem:[%s4734_s3 + $0x110] sm:$0xff]   ;;  %v3957_v33 = vadd.f32 %v3714_v19, %v324_v23  ;;  %v3601_v16 = vld [vmem:[%s4734_s3 + $0x188] sm:$0xff]  }
  0x4b   : > { %3118 = vmatprep.subr.bf16.mxu1 %v3573_v37  ;;  %3227 = vmatpush3.bf16.msra.mxu0 %v3584_v34  ;;  %v2970_v37 = vld [vmem:[%s3697_s16 + $0x48] sm:$0xff]   ;;  %480 = vst [vmem:[#allocation2 + $0xc1] sm:$0xff] %v393_v28  ;;  %481 = vst [vmem:[#allocation2 + $0xc9] sm:$0xff] %v394_v29  ;;  %v396_v49 = vmax.f32 %v3960_v36, 0.0  ;;  %v2971_v34 = vld [vmem:[%s3697_s16 + $0x50] sm:$0xff]  }
  0x4c   : > { %1572 = vmatmul.mubr.bf16.gmra.mxu0 %v3909_v61  ;;  %3228 = vmatprep.subr.bf16.mxu0 %v3587_v17  ;;  %v2856_v41 = vunpack.c.l.bf16 %v2970_v37  ;;  %v2857_v42 = vunpack.c.h.bf16 %v2970_v37  ;;  %v395_v46 = vmax.f32 %v3957_v33, 0.0  ;;  %v2860_v0 = vunpack.c.l.bf16 %v2971_v34  ;;  %v601_v23 = vld [vmem:[#allocation2 + $0x52] sm:$0xff] }
  0x4d   : > { %1579 = vmatprep.mubr.bf16.mxu0 %v3914_v4  ;;  %483 = vst [vmem:[#allocation2 + $0xe1] sm:$0xff] %v396_v49 }
  0x4e   : > { %3119 = vmatpush3.bf16.msra.mxu1 %v3574_v43  ;;  %v3972_v43 = vpack.c.bf16 %v597_v25, %v596_v22  ;;  %v326_v39 = vmul.f32 %v2856_v41, %v3709_v18  ;;  %v327_v40 = vmul.f32 %v2857_v42, %v3709_v18  ;;  %482 = vst [vmem:[#allocation2 + $0xd9] sm:$0xff] %v395_v46  ;;  %v512_v20 = vld [vmem:[#allocation2 + $0xa8] sm:$0xff]  ;;  %v513_v21 = vld [vmem:[#allocation2 + $0xb0] sm:$0xff] }
  0x4f   : > { %3328 = vmatprep.subr.bf16.mxu1 %v3575_v50  ;;  %v3589_v50 = vld [vmem:[%s4734_s3 + $0x1e0] sm:$0xff]   ;;  %v3596_v22 = vld [vmem:[%s4734_s3 + $0x1d0] sm:$0xff]   ;;  %v4063_v24 = vpack.c.bf16 %v513_v21, %v512_v20 }
  0x50   : > { %v3999_v53 = vadd.f32 %v3714_v19, %v326_v39  ;;  %v4002_v54 = vadd.f32 %v3714_v19, %v327_v40  ;;  %v3598_v25 = vld [vmem:[%s4734_s3 + $0x190] sm:$0xff]   ;;  %v602_v42 = vld [vmem:[#allocation2 + $0x62] sm:$0xff]  ;;  %v2976_v40 = vld [vmem:[%s3697_s16 + $0x78] sm:$0xff]  }
  0x51   : > { %1701 = vmatmul.mubr.bf16.vlgmr.msra.gmra.mxu1 %v626_v1  ;;  %v2861_v1 = vunpack.c.h.bf16 %v2971_v34  ;;  %v3604_v39 = vld [vmem:[%s4734_s3 + $0x180] sm:$0xff]   ;;  %v608_v21 = vld [vmem:[#allocation2 + $0xaa] sm:$0xff] }
  0x52   : > { %3329 = vmatpush3.bf16.msra.mxu1 %v3576_v3  ;;  %1708 = vmatprep.mubr.bf16.mxu1 %v3823_v59  ;;  %v3588_v59 = vld [vmem:[%s4734_s3 + $0x108] sm:$0xff]   ;;  %v397_v58 = vmax.f32 %v3999_v53, 0.0  ;;  %v398_v62 = vmax.f32 %v4002_v54, 0.0  ;;  %v4016_v3 = vpack.c.bf16 %v511_v56, %v510_v48  ;;  %v514_v37 = vld [vmem:[#allocation2 + $0xc0] sm:$0xff]  ;;  %v2881_v48 = vunpack.c.h.bf16 %v2976_v40 }
  0x53   : > { %3330 = vmatprep.subr.bf16.mxu1 %v3580_v7  ;;  %3229 = vmatpush3.bf16.msra.mxu0 %v3588_v59  ;;  %v329_v7 = vmul.f32 %v2861_v1, %v3709_v18  ;;  %v3599_v59 = vld [vmem:[%s4734_s3 + $0x1c8] sm:$0xff]   ;;  %v607_v53 = vld [vmem:[#allocation2 + $0x9a] sm:$0xff] }
  0x54   : > { %1580 = vmatmul.mubr.bf16.gmra.mxu0 %v3966_v38  ;;  %3230 = vmatprep.subr.bf16.mxu0 %v3591_v47  ;;  %484 = vst [vmem:[#allocation2 + $0xf1] sm:$0xff] %v397_v58  ;;  %485 = vst [vmem:[#allocation2 + $0xf9] sm:$0xff] %v398_v62  ;;  %v515_v41 = vld [vmem:[#allocation2 + $0xc8] sm:$0xff]  ;;  %v2880_v47 = vunpack.c.l.bf16 %v2976_v40  ;;  %v339_v52 = vmul.f32 %v2881_v48, %v3709_v18  ;;  %v666_v40 = vld [vmem:[#allocation2 + $0x138] sm:$0xff] }
  0x55   : > { %1587 = vmatprep.mubr.bf16.mxu0 %v3978_v44  ;;  %v4044_v17 = vadd.f32 %v3714_v19, %v329_v7  ;;  %v516_v33 = vld [vmem:[#allocation2 + $0xd8] sm:$0xff]  ;;  %v517_v36 = vld [vmem:[#allocation2 + $0xe0] sm:$0xff]  ;;  %v3607_v48 = vld [vmem:[%s4734_s3 + $0x208] sm:$0xff]  }
  0x56   : > { %3331 = vmatpush3.bf16.msra.mxu1 %v3582_v27  ;;  %v4068_v27 = vpack.c.bf16 %v601_v23, %v600_v6  ;;  %v338_v51 = vmul.f32 %v2880_v47, %v3709_v18  ;;  %v606_v7 = vld [vmem:[#allocation2 + $0x92] sm:$0xff]  ;;  %v667_v47 = vld [vmem:[#allocation2 + $0x140] sm:$0xff] }
  0x57   : > { %3332 = vmatprep.subr.bf16.mxu1 %v3585_v30  ;;  %3231 = vmatpush3.bf16.msra.mxu0 %v3592_v55  ;;  %v400_v12 = vmax.f32 %v4044_v17, 0.0  ;;  %v4074_v30 = vpack.c.bf16 %v394_v29, %v393_v28  ;;  %v4086_v28 = vpack.c.bf16 %v515_v41, %v514_v37  ;;  %v4088_v29 = vpack.c.bf16 %v603_v15, %v602_v42  ;;  %v610_v17 = vld [vmem:[#allocation2 + $0xc2] sm:$0xff]  ;;  %v3597_v23 = vld [vmem:[%s4734_s3 + $0x230] sm:$0xff]   ;;  %v3605_v15 = vld [vmem:[%s4734_s3 + $0x218] sm:$0xff]  }
  0x58   : > { %3464 = vmatprep.subr.bf16.mxu0 %v4038_v13  ;;  %v4109_v55 = vpack.c.bf16 %v517_v36, %v516_v33  ;;  %v377_v56 = vadd.f32 %v3714_v19, %v338_v51  ;;  %v4127_v54 = vpack.c.bf16 %v607_v53, %v606_v7  ;;  %v664_v41 = vld [vmem:[#allocation2 + $0x120] sm:$0xff]  ;;  %v665_v42 = vld [vmem:[#allocation2 + $0x128] sm:$0xff]  ;;  %v4190_v36 = vpack.c.bf16 %v667_v47, %v666_v40  ;;  %v625_v7 = vld [vmem:[#allocation2 + $0x172] sm:$0xff] }
  0x59   : > { %1709 = vmatmul.mubr.bf16.gmra.mxu1 %v3972_v43  ;;  %487 = vst [vmem:[#allocation2 + $0x111] sm:$0xff] %v400_v12  ;;  %v620_v51 = vld [vmem:[#allocation2 + $0x13a] sm:$0xff]  ;;  %v835_v53 = vld [vmem:[#allocation2 + $0x31] sm:$0xff] }
  0x5a   : > { %1716 = vmatprep.mubr.bf16.mxu1 %v3854_v26  ;;  %3333 = vmatpush3.bf16.msra.mxu1 %v3586_v45  ;;  %v328_v26 = vmul.f32 %v2860_v0, %v3709_v18  ;;  %v4094_v45 = vpack.c.bf16 %v396_v49, %v395_v46  ;;  %v604_v46 = vld [vmem:[#allocation2 + $0x7a] sm:$0xff]  ;;  %v605_v49 = vld [vmem:[#allocation2 + $0x82] sm:$0xff]  ;;  %v4119_v0 = vpack.c.bf16 %v398_v62, %v397_v58  ;;  %v409_v1 = vmax.f32 %v377_v56, 0.0 }
  0x5b   : > { %3334 = vmatprep.subr.bf16.mxu1 %v3589_v50  ;;  %v3602_v50 = vld [vmem:[%s4734_s3 + $0x1c0] sm:$0xff]   ;;  %v4113_v34 = vpack.c.bf16 %v605_v49, %v604_v46  ;;  %v518_v18 = vld [vmem:[#allocation2 + $0xf0] sm:$0xff] }
  0x5c   : > { %v4041_v14 = vadd.f32 %v3714_v19, %v328_v26  ;;  %1588 = vmatmul.mubr.bf16.gmra.mxu0 %v4016_v3  ;;  %496 = vst [vmem:[#allocation2 + $0x181] sm:$0xff] %v409_v1  ;;  %v619_v46 = vld [vmem:[#allocation2 + $0x12a] sm:$0xff] }
  0x5d   : > { %1595 = vmatprep.mubr.bf16.mxu0 %v4033_v10 }
  0x5e   : > { %3335 = vmatpush3.bf16.msra.mxu1 %v3590_v57  ;;  %v399_v11 = vmax.f32 %v4041_v14, 0.0  ;;  %v378_v57 = vadd.f32 %v3714_v19, %v339_v52  ;;  %v519_v19 = vld [vmem:[#allocation2 + $0xf8] sm:$0xff]  ;;  %v621_v52 = vld [vmem:[#allocation2 + $0x142] sm:$0xff] }
  0x5f   : > { %3336 = vmatprep.subr.bf16.mxu1 %v3593_v8  ;;  %v4125_v8 = vpack.c.bf16 %v519_v19, %v518_v18  ;;  %v4205_v56 = vpack.c.bf16 %v621_v52, %v620_v51 }
  0x60   : > { %486 = vst [vmem:[#allocation2 + $0x109] sm:$0xff] %v399_v11  ;;  %v410_v26 = vmax.f32 %v378_v57, 0.0  ;;  %v4133_v58 = vpack.c.bf16 %v400_v12, %v399_v11  ;;  %v611_v11 = vld [vmem:[#allocation2 + $0xca] sm:$0xff]  ;;  %v622_v57 = vld [vmem:[#allocation2 + $0x152] sm:$0xff] }
  0x61   : > { %1717 = vmatmul.mubr.bf16.gmra.mxu1 %v4027_v9  ;;  %v4149_v12 = vpack.c.bf16 %v611_v11, %v610_v17  ;;  %v837_v17 = vld [vmem:[#allocation2 + $0x49] sm:$0xff]  ;;  %v838_v11 = vld [vmem:[#allocation2 + $0x51] sm:$0xff] }
  0x62   : > { %1724 = vmatprep.mubr.bf16.mxu1 %v3909_v61  ;;  %3337 = vmatpush3.bf16.msra.mxu1 %v3595_v5  ;;  %497 = vst [vmem:[#allocation2 + $0x189] sm:$0xff] %v410_v26  ;;  %v609_v5 = vld [vmem:[#allocation2 + $0xb2] sm:$0xff]  ;;  %v4143_v14 = vpack.c.bf16 %v410_v26, %v409_v1 }
  0x63   : > { %3338 = vmatprep.subr.bf16.mxu1 %v3596_v22  ;;  %v4141_v22 = vpack.c.bf16 %v609_v5, %v608_v21  ;;  %v672_v1 = vld [vmem:[#allocation2 + $0x180] sm:$0xff]  ;;  %v787_v21 = vld [vmem:[#allocation2 + $0x30] sm:$0xff]  ;;  %v788_v5 = vld [vmem:[#allocation2 + $0x38] sm:$0xff] }
  0x64   : > { %1596 = vmatmul.mubr.bf16.gmra.mxu0 %v4063_v24 }
  0x65   : > { %1603 = vmatprep.mubr.bf16.mxu0 %v4074_v30 }
  0x66   : > { %3339 = vmatpush3.bf16.msra.mxu1 %v3598_v25  ;;  %v613_v25 = vld [vmem:[#allocation2 + $0xe2] sm:$0xff] }
  0x67   : > { %3340 = vmatprep.subr.bf16.mxu1 %v3599_v59  ;;  %v520_v62 = vld [vmem:[#allocation2 + $0x108] sm:$0xff]  ;;  %v521_v20 = vld [vmem:[#allocation2 + $0x110] sm:$0xff] }
  0x68   : > { %v4139_v6 = vpack.c.bf16 %v521_v20, %v520_v62  ;;  %v3600_v59 = vld [vmem:[%s4734_s3 + $0x228] sm:$0xff]  }
  0x69   : > { %1725 = vmatmul.mubr.bf16.gmra.mxu1 %v4068_v27  ;;  %v673_v26 = vld [vmem:[#allocation2 + $0x188] sm:$0xff] }
  0x6a   : > { %1732 = vmatprep.mubr.bf16.mxu1 %v3966_v38  ;;  %3341 = vmatpush3.bf16.msra.mxu1 %v3601_v16  ;;  %v4213_v19 = vpack.c.bf16 %v673_v26, %v672_v1  ;;  %v768_v26 = vld [vmem:[#allocation2 + $0x182] sm:$0xff] }
  0x6b   : > { %3342 = vmatprep.subr.bf16.mxu1 %v3602_v50  ;;  %v4176_v50 = vpack.c.bf16 %v665_v42, %v664_v41  ;;  %v714_v42 = vld [vmem:[#allocation2 + $0x139] sm:$0xff] }
  0x6c   : > { %1604 = vmatmul.mubr.bf16.gmra.mxu0 %v4086_v28 }
  0x6d   : > { %1611 = vmatprep.mubr.bf16.mxu0 %v4094_v45 }
  0x6e   : > { %3343 = vmatpush3.bf16.msra.mxu1 %v3604_v39  ;;  %v617_v39 = vld [vmem:[#allocation2 + $0x112] sm:$0xff] }
  0x71   : > { %1733 = vmatmul.mubr.bf16.gmra.mxu1 %v4088_v29 }
  0x72   : > { %1740 = vmatprep.mubr.bf16.mxu1 %v4016_v3 }
  0x74   : > { %1612 = vmatmul.mubr.bf16.gmra.mxu0 %v4109_v55 }
  0x75   : > { %1619 = vmatprep.mubr.bf16.mxu0 %v4119_v0 }
  0x79   : > { %1741 = vmatmul.mubr.bf16.gmra.mxu1 %v4113_v34 }
  0x7a   : > { %1748 = vmatprep.mubr.bf16.mxu1 %v4063_v24 }
  0x7c   : > { %1620 = vmatmul.mubr.bf16.gmra.mxu0 %v4125_v8 }
  0x7d   : > { %1627 = vmatprep.mubr.bf16.mxu0 %v4133_v58 }
  0x81   : > { %1749 = vmatmul.mubr.bf16.gmra.mxu1 %v4127_v54 }
  0x82   : > { %1756 = vmatprep.mubr.bf16.mxu1 %v4086_v28 }
  0x84   : > { %1628 = vmatmul.mubr.bf16.gmra.mxu0 %v4139_v6 }
  0x85   : > { %1861 = vmatprep.mubr.bf16.mxu0 %v3972_v43  ;;  %v612_v43 = vld [vmem:[#allocation2 + $0xda] sm:$0xff] }
  0x86   : > { %v4162_v37 = vpack.c.bf16 %v613_v25, %v612_v43  ;;  %v868_v43 = vpack.c.bf16 %v838_v11, %v837_v17  ;;  %v789_v25 = vld [vmem:[#allocation2 + $0x48] sm:$0xff] }
  0x89   : > { %1757 = vmatmul.mubr.bf16.gmra.mxu1 %v4141_v22 }
  0x8a   : > { %1764 = vmatprep.mubr.bf16.mxu1 %v4109_v55 }
  0x8c   : > { %1862 = vmatmul.mubr.bf16.vlgmr.msra.gmra.mxu0 %v3759_v60  ;;  %v3603_v60 = vld [vmem:[%s4734_s3 + $0x220] sm:$0xff]  }
  0x8d   : > { %3465 = vmatpush3.bf16.msra.mxu0 %v4038_v13  ;;  %1869 = vmatprep.mubr.bf16.mxu0 %v4027_v9  ;;  %v614_v9 = vld [vmem:[#allocation2 + $0xf2] sm:$0xff]  ;;  %v615_v13 = vld [vmem:[#allocation2 + $0xfa] sm:$0xff] }
  0x8e   : > { %3466 = vmatprep.subr.bf16.mxu0 %v3597_v23  ;;  %v4174_v16 = vpack.c.bf16 %v615_v13, %v614_v9  ;;  %v712_v9 = vld [vmem:[#allocation2 + $0x121] sm:$0xff]  ;;  %v713_v13 = vld [vmem:[#allocation2 + $0x129] sm:$0xff] }
  0x8f   : > { %v4233_v41 = vpack.c.bf16 %v713_v13, %v712_v9  ;;  %v884_v9 = vld [vmem:[#allocation2 + $0x3a] sm:$0xff] }
  0x91   : > { %1765 = vmatmul.mubr.bf16.gmra.mxu1 %v4149_v12  ;;  %3467 = vmatpush3.bf16.msra.mxu0 %v3597_v23  ;;  %v819_v23 = vpack.c.bf16 %v788_v5, %v787_v21 }
  0x92   : > { %1772 = vmatprep.mubr.bf16.mxu1 %v4125_v8  ;;  %3468 = vmatprep.subr.bf16.mxu0 %v3600_v59 }
  0x94   : > { %1870 = vmatmul.mubr.bf16.gmra.mxu0 %v3793_v31  ;;  %v3606_v31 = vld [vmem:[%s4734_s3 + $0x210] sm:$0xff]  }
  0x95   : > { %1877 = vmatprep.mubr.bf16.mxu0 %v4068_v27  ;;  %3469 = vmatpush3.bf16.msra.mxu0 %v3600_v59  ;;  %v616_v27 = vld [vmem:[#allocation2 + $0x10a] sm:$0xff] }
  0x96   : > { %3470 = vmatprep.subr.bf16.mxu0 %v3603_v60  ;;  %v4188_v33 = vpack.c.bf16 %v617_v39, %v616_v27  ;;  %v790_v59 = vld [vmem:[#allocation2 + $0x50] sm:$0xff]  ;;  %v717_v27 = vld [vmem:[#allocation2 + $0x159] sm:$0xff] }
  0x99   : > { %1773 = vmatmul.mubr.bf16.gmra.mxu1 %v4162_v37  ;;  %3471 = vmatpush3.bf16.msra.mxu0 %v3603_v60  ;;  %v820_v60 = vpack.c.bf16 %v790_v59, %v789_v25 }
  0x9a   : > { %1780 = vmatprep.mubr.bf16.mxu1 %v4139_v6  ;;  %3472 = vmatprep.subr.bf16.mxu0 %v3605_v15 }
  0x9c   : > { %1878 = vmatmul.mubr.bf16.gmra.mxu0 %v3825_v63  ;;  %v3608_v63 = vld [vmem:[%s4734_s3 + $0x200] sm:$0xff]  }
  0x9d   : > { %1885 = vmatprep.mubr.bf16.mxu0 %v4088_v29  ;;  %3473 = vmatpush3.bf16.msra.mxu0 %v3605_v15  ;;  %v618_v29 = vld [vmem:[#allocation2 + $0x122] sm:$0xff] }
  0x9e   : > { %3474 = vmatprep.subr.bf16.mxu0 %v3606_v31  ;;  %v4199_v49 = vpack.c.bf16 %v619_v46, %v618_v29 }
  0xa1   : > { %1781 = vmatmul.mubr.bf16.gmra.mxu1 %v4174_v16  ;;  %3475 = vmatpush3.bf16.msra.mxu0 %v3606_v31 }
  0xa2   : > { %1788 = vmatprep.mubr.bf16.mxu1 %v4176_v50  ;;  %3476 = vmatprep.subr.bf16.mxu0 %v3607_v48 }
  0xa4   : > { %1886 = vmatmul.mubr.bf16.gmra.mxu0 %v3867_v35 }
  0xa5   : > { %1893 = vmatprep.mubr.bf16.mxu0 %v4113_v34  ;;  %3477 = vmatpush3.bf16.msra.mxu0 %v3607_v48  ;;  %v623_v34 = vld [vmem:[#allocation2 + $0x15a] sm:$0xff] }
  0xa6   : > { %3478 = vmatprep.subr.bf16.mxu0 %v3608_v63  ;;  %v4211_v18 = vpack.c.bf16 %v623_v34, %v622_v57  ;;  %v719_v34 = vld [vmem:[#allocation2 + $0x171] sm:$0xff] }
  0xa9   : > { %1789 = vmatmul.mubr.bf16.gmra.mxu1 %v4188_v33  ;;  %3479 = vmatpush3.bf16.msra.mxu0 %v3608_v63 }
  0xaa   : > { %1796 = vmatprep.mubr.bf16.mxu1 %v4190_v36 }
  0xac   : > { %1894 = vmatmul.mubr.bf16.gmra.mxu0 %v3914_v4 }
  0xad   : > { %1901 = vmatprep.mubr.bf16.mxu0 %v4127_v54 }
  0xb1   : > { %1797 = vmatmul.mubr.bf16.gmra.mxu1 %v4199_v49 }
  0xb2   : > { %1804 = vmatprep.mubr.bf16.mxu1 %v3829_v2  ;;  %v624_v2 = vld [vmem:[#allocation2 + $0x16a] sm:$0xff] }
  0xb3   : > { %v4219_v62 = vpack.c.bf16 %v625_v7, %v624_v2  ;;  %v769_v2 = vld [vmem:[#allocation2 + $0x18a] sm:$0xff] }
  0xb4   : > { %1902 = vmatmul.mubr.bf16.gmra.mxu0 %v3978_v44  ;;  %v4265_v17 = vpack.c.bf16 %v769_v2, %v768_v26 }
  0xb5   : > { %1909 = vmatprep.mubr.bf16.mxu0 %v4141_v22 }
  0xb9   : > { %1805 = vmatmul.mubr.bf16.gmra.mxu1 %v4205_v56 }
  0xba   : > { %1812 = vmatprep.mubr.bf16.mxu1 %v3862_v32  ;;  %v836_v32 = vld [vmem:[#allocation2 + $0x39] sm:$0xff] }
  0xbb   : > { %v867_v20 = vpack.c.bf16 %v836_v32, %v835_v53 }
  0xbc   : > { %1910 = vmatmul.mubr.bf16.gmra.mxu0 %v4033_v10 }
  0xbd   : > { %1917 = vmatprep.mubr.bf16.mxu0 %v4149_v12 }
  0xc1   : > { %1813 = vmatmul.mubr.bf16.gmra.mxu1 %v4211_v18 }
  0xc2   : > { %1820 = vmatprep.mubr.bf16.mxu1 %v4213_v19 }
  0xc4   : > { %1918 = vmatmul.mubr.bf16.gmra.mxu0 %v4074_v30 }
  0xc5   : > { %1925 = vmatprep.mubr.bf16.mxu0 %v4162_v37 }
  0xc9   : > { %1821 = vmatmul.mubr.bf16.gmra.mxu1 %v4219_v62 }
  0xca   : > { %2022 = vmatprep.mubr.bf16.mxu1 %v867_v20 }
  0xcc   : > { %1926 = vmatmul.mubr.bf16.gmra.mxu0 %v4094_v45 }
  0xcd   : > { %1933 = vmatprep.mubr.bf16.mxu0 %v4174_v16 }
  0xd1   : > { %2023 = vmatmul.mubr.bf16.vlgmr.msra.gmra.mxu1 %v819_v23 }
  0xd2   : > { %2030 = vmatprep.mubr.bf16.mxu1 %v868_v43 }
  0xd4   : > { %1934 = vmatmul.mubr.bf16.gmra.mxu0 %v4119_v0 }
  0xd5   : > { %1941 = vmatprep.mubr.bf16.mxu0 %v4188_v33 }
  0xd9   : > { %2031 = vmatmul.mubr.bf16.gmra.mxu1 %v820_v60  ;;  %v883_v60 = vld [vmem:[#allocation2 + $0x32] sm:$0xff] }
  0xda   : > { %2038 = vmatprep.mubr.bf16.mxu1 %v3867_v35  ;;  %v715_v35 = vld [vmem:[#allocation2 + $0x141] sm:$0xff] }
  0xdb   : > { %v4239_v15 = vpack.c.bf16 %v715_v35, %v714_v42 }
  0xdc   : > { %1942 = vmatmul.mubr.bf16.gmra.mxu0 %v4133_v58 }
  0xdd   : > { %1949 = vmatprep.mubr.bf16.mxu0 %v4199_v49 }
  0xe1   : > { %2039 = vmatmul.mubr.bf16.gmra.mxu1 %v3909_v61 }
  0xe2   : > { %2046 = vmatprep.mubr.bf16.mxu1 %v3914_v4  ;;  %v716_v4 = vld [vmem:[#allocation2 + $0x151] sm:$0xff] }
  0xe3   : > { %v4249_v48 = vpack.c.bf16 %v717_v27, %v716_v4  ;;  %v915_v4 = vpack.c.bf16 %v884_v9, %v883_v60 }
  0xe4   : > { %1950 = vmatmul.mubr.bf16.gmra.mxu0 %v4233_v41 }
  0xe5   : > { %1957 = vmatprep.mubr.bf16.mxu0 %v4205_v56 }
  0xe9   : > { %2047 = vmatmul.mubr.bf16.gmra.mxu1 %v3966_v38 }
  0xea   : > { %2054 = vmatprep.mubr.bf16.mxu1 %v3978_v44 }
  0xec   : > { %v3008_v61 = vpop.f32.mrf.mxu0  ;;  %1958 = vmatmul.mubr.bf16.gmra.mxu0 %v4239_v15 }
  0xed   : > { %1965 = vmatprep.mubr.bf16.mxu0 %v4211_v18 }
  0xee   : > { %v3009_v39 = vpop.f32.mrf.mxu0 }
  0xef   : > { %v4245_v38 = vadd.f32 %v3009_v39, %v3008_v61 }
  0xf0   : > { %v3011_v44 = vpop.f32.mrf.mxu0 }
  0xf1   : > { %v3080_v31 = vpop.f32.mrf.mxu1  ;;  %2055 = vmatmul.mubr.bf16.gmra.mxu1 %v4016_v3 }
  0xf2   : > { %2062 = vmatprep.mubr.bf16.mxu1 %v4033_v10  ;;  %v3012_v29 = vpop.f32.mrf.mxu0  ;;  %v718_v10 = vld [vmem:[#allocation2 + $0x169] sm:$0xff] }
  0xf3   : > { %v3081_v40 = vpop.f32.mrf.mxu1  ;;  %v4251_v46 = vadd.f32 %v3012_v29, %v3011_v44  ;;  %v4263_v21 = vpack.c.bf16 %v719_v34, %v718_v10  ;;  %v886_v29 = vld [vmem:[#allocation2 + $0x52] sm:$0xff] }
  0xf4   : > { %v4247_v47 = vadd.f32 %v3081_v40, %v3080_v31  ;;  %v3014_v52 = vpop.f32.mrf.mxu0  ;;  %1966 = vmatmul.mubr.bf16.gmra.mxu0 %v4249_v48 }
  0xf5   : > { %v3083_v63 = vpop.f32.mrf.mxu1  ;;  %1973 = vmatprep.mubr.bf16.mxu0 %v4219_v62 }
  0xf6   : > { %v3015_v1 = vpop.f32.mrf.mxu0 }
  0xf7   : > { %v3084_v3 = vpop.f32.mrf.mxu1  ;;  %v4259_v7 = vadd.f32 %v3015_v1, %v3014_v52  ;;  %v887_v52 = vld [vmem:[#allocation2 + $0x62] sm:$0xff] }
  0xf8   : > { %v4253_v51 = vadd.f32 %v3084_v3, %v3083_v63  ;;  %v3017_v20 = vpop.f32.mrf.mxu0  ;;  %v885_v63 = vld [vmem:[#allocation2 + $0x4a] sm:$0xff] }
  0xf9   : > { %v3086_v57 = vpop.f32.mrf.mxu1  ;;  %2063 = vmatmul.mubr.bf16.gmra.mxu1 %v4063_v24  ;;  %v916_v2 = vpack.c.bf16 %v886_v29, %v885_v63 }
  0xfa   : > { %2070 = vmatprep.mubr.bf16.mxu1 %v4074_v30  ;;  %v3018_v24 = vpop.f32.mrf.mxu0 }
  0xfb   : > { %v3087_v53 = vpop.f32.mrf.mxu1  ;;  %v4267_v11 = vadd.f32 %v3018_v24, %v3017_v20 }
  0xfc   : > { %v4261_v32 = vadd.f32 %v3087_v53, %v3086_v57  ;;  %v3020_v30 = vpop.f32.mrf.mxu0  ;;  %1974 = vmatmul.mubr.bf16.gmra.mxu0 %v4263_v21  ;;  %v888_v57 = vld [vmem:[#allocation2 + $0x6a] sm:$0xff] }
  0xfd   : > { %v3089_v5 = vpop.f32.mrf.mxu1  ;;  %1981 = vmatprep.mubr.bf16.mxu0 %v4265_v17  ;;  %v917_v20 = vpack.c.bf16 %v888_v57, %v887_v52 }
  0xfe   : > { %v3021_v59 = vpop.f32.mrf.mxu0 }
  0xff   : > { %v3090_v23 = vpop.f32.mrf.mxu1  ;;  %v4275_v13 = vadd.f32 %v3021_v59, %v3020_v30  ;;  %v890_v59 = vld [vmem:[#allocation2 + $0x82] sm:$0xff] }
 0x100   : > { %v4269_v43 = vadd.f32 %v3090_v23, %v3089_v5  ;;  %v3023_v61 = vpop.f32.mrf.mxu0 }
 0x101   : > { %v3092_v25 = vpop.f32.mrf.mxu1  ;;  %2071 = vmatmul.mubr.bf16.gmra.mxu1 %v4086_v28 }
 0x102   : > { %2078 = vmatprep.mubr.bf16.mxu1 %v4094_v45  ;;  %v3024_v27 = vpop.f32.mrf.mxu0 }
 0x103   : > { %v3093_v42 = vpop.f32.mrf.mxu1  ;;  %v4279_v39 = vadd.f32 %v3024_v27, %v3023_v61 }
 0x104   : > { %v4277_v35 = vadd.f32 %v3093_v42, %v3092_v25  ;;  %v3026_v44 = vpop.f32.mrf.mxu0  ;;  %1982 = vmatmul.mubr.bf16.gmra.mxu0 %v4143_v14  ;;  %v889_v25 = vld [vmem:[#allocation2 + $0x7a] sm:$0xff] }
 0x105   : > { %v3095_v31 = vpop.f32.mrf.mxu1  ;;  %3480 = vmatprep.mubr.bf16.mxu0 %v915_v4  ;;  %v918_v4 = vpack.c.bf16 %v890_v59, %v889_v25 }
 0x106   : > { %v3027_v3 = vpop.f32.mrf.mxu0 }
 0x107   : > { %v3096_v40 = vpop.f32.mrf.mxu1  ;;  %v4286_v10 = vadd.f32 %v3027_v3, %v3026_v44 }
 0x108   : > { %v4281_v28 = vadd.f32 %v3096_v40, %v3095_v31  ;;  %v3029_v26 = vpop.f32.mrf.mxu0 }
 0x109   : > { %v3098_v45 = vpop.f32.mrf.mxu1  ;;  %2079 = vmatmul.mubr.bf16.gmra.mxu1 %v4109_v55 }
 0x10a   : > { %2086 = vmatprep.mubr.bf16.mxu1 %v4119_v0  ;;  %v3030_v5 = vpop.f32.mrf.mxu0 }
 0x10b   : > { %v3099_v34 = vpop.f32.mrf.mxu1  ;;  %v4290_v24 = vadd.f32 %v3030_v5, %v3029_v26 }
 0x10c   : > { %v4288_v1 = vadd.f32 %v3099_v34, %v3098_v45  ;;  %v3032_v30 = vpop.f32.mrf.mxu0  ;;  %3481 = vmatmul.mubr.bf16.vlgmr.msra.gmra.mxu0 %v916_v2 }
 0x10d   : > { %v3101_v53 = vpop.f32.mrf.mxu1  ;;  %3484 = vmatprep.mubr.bf16.mxu0 %v917_v20 }
 0x10e   : > { %v3033_v60 = vpop.f32.mrf.mxu0 }
 0x10f   : > { %v3102_v55 = vpop.f32.mrf.mxu1  ;;  %v4296_v9 = vadd.f32 %v3033_v60, %v3032_v30 }
 0x110   : > { %v4292_v23 = vadd.f32 %v3102_v55, %v3101_v53  ;;  %v3035_v31 = vpop.f32.mrf.mxu0 }
 0x111   : > { %v3120_v0 = vpop.f32.mrf.mxu1  ;;  %2087 = vmatmul.mubr.bf16.gmra.mxu1 %v4125_v8 }
 0x112   : > { %2094 = vmatprep.mubr.bf16.mxu1 %v4133_v58  ;;  %v3036_v44 = vpop.f32.mrf.mxu0 }
 0x113   : > { %v3121_v42 = vpop.f32.mrf.mxu1  ;;  %v4301_v45 = vadd.f32 %v3036_v44, %v3035_v31 }
 0x114   : > { %v3122_v61 = vadd.f32 %v3121_v42, %v3120_v0  ;;  %v3038_v29 = vpop.f32.mrf.mxu0  ;;  %3485 = vmatmul.mubr.bf16.gmra.mxu0 %v918_v4 }
 0x115   : > { %v3123_v27 = vpop.f32.mrf.mxu1  ;;  %3488 = vmatprep.mubr.bf16.mxu0 %v4127_v54 }
 0x116   : > { %v4299_v40 = vadd.f32 %v3122_v61, %v4245_v38  ;;  %v3039_v52 = vpop.f32.mrf.mxu0 }
 0x117   : > { %v3124_v8 = vpop.f32.mrf.mxu1  ;;  %v4309_v38 = vadd.f32 %v3039_v52, %v3038_v29 }
 0x118   : > { %v3125_v63 = vadd.f32 %v3124_v8, %v3123_v27  ;;  %v3041_v26 = vpop.f32.mrf.mxu0  ;;  %v812_v27 = vld [vmem:[#allocation2 + $0x158] sm:$0xff] }
 0x119   : > { %v3126_v3 = vpop.f32.mrf.mxu1  ;;  %2095 = vmatmul.mubr.bf16.gmra.mxu1 %v4139_v6 }
 0x11a   : > { %v4306_v58 = vadd.f32 %v3125_v63, %v4251_v46  ;;  %2102 = vmatprep.mubr.bf16.mxu1 %v4233_v41  ;;  %v3042_v20 = vpop.f32.mrf.mxu0 }
 0x11b   : > { %v3127_v57 = vpop.f32.mrf.mxu1  ;;  %v4314_v5 = vadd.f32 %v3042_v20, %v3041_v26  ;;  %v814_v20 = vld [vmem:[#allocation2 + $0x170] sm:$0xff] }
 0x11c   : > { %v3128_v34 = vadd.f32 %v3127_v57, %v3126_v3  ;;  %v3044_v55 = vpop.f32.mrf.mxu0  ;;  %3489 = vmatmul.mubr.bf16.gmra.mxu0 %v4141_v22 }
 0x11d   : > { %v3129_v2 = vpop.f32.mrf.mxu1  ;;  %3492 = vmatprep.mubr.bf16.mxu0 %v4149_v12 }
 0x11e   : > { %v4312_v53 = vadd.f32 %v3128_v34, %v4259_v7  ;;  %v3045_v30 = vpop.f32.mrf.mxu0 }
 0x11f   : > { %v3130_v6 = vpop.f32.mrf.mxu1  ;;  %v4323_v7 = vadd.f32 %v3045_v30, %v3044_v55 }
 0x120   : > { %v3131_v54 = vadd.f32 %v3130_v6, %v3129_v2  ;;  %v3047_v59 = vpop.f32.mrf.mxu0 }
 0x121   : > { %v3132_v46 = vpop.f32.mrf.mxu1  ;;  %2103 = vmatmul.mubr.bf16.gmra.mxu1 %v4176_v50 }
 0x122   : > { %v4320_v41 = vadd.f32 %v3131_v54, %v4267_v11  ;;  %2110 = vmatprep.mubr.bf16.mxu1 %v4239_v15  ;;  %v3048_v22 = vpop.f32.mrf.mxu0 }
 0x123   : > { %v3133_v0 = vpop.f32.mrf.mxu1  ;;  %v4328_v61 = vadd.f32 %v3048_v22, %v3047_v59 }
 0x124   : > { %v3134_v25 = vadd.f32 %v3133_v0, %v3132_v46  ;;  %v3050_v31 = vpop.f32.mrf.mxu0  ;;  %3493 = vmatmul.mubr.bf16.gmra.mxu0 %v4162_v37 }
 0x125   : > { %v3135_v60 = vpop.f32.mrf.mxu1  ;;  %3496 = vmatprep.mubr.bf16.mxu0 %v4174_v16 }
 0x126   : > { %v4326_v42 = vadd.f32 %v3134_v25, %v4275_v13  ;;  %v3051_v4 = vpop.f32.mrf.mxu0  ;;  %v811_v13 = vld [vmem:[#allocation2 + $0x150] sm:$0xff] }
 0x127   : > { %v3136_v50 = vpop.f32.mrf.mxu1  ;;  %v4337_v44 = vadd.f32 %v3051_v4, %v3050_v31  ;;  %v831_v37 = vpack.c.bf16 %v812_v27, %v811_v13  ;;  %v865_v31 = vld [vmem:[#allocation2 + $0x199] sm:$0xff] }
 0x128   : > { %v3137_v12 = vadd.f32 %v3136_v50, %v3135_v60  ;;  %v3053_v29 = vpop.f32.mrf.mxu0 }
 0x129   : > { %v3138_v11 = vpop.f32.mrf.mxu1  ;;  %2111 = vmatmul.mubr.bf16.gmra.mxu1 %v4190_v36 }
 0x12a   : > { %v4334_v15 = vadd.f32 %v3137_v12, %v4279_v39  ;;  %2118 = vmatprep.mubr.bf16.mxu1 %v4249_v48  ;;  %v3054_v36 = vpop.f32.mrf.mxu0 }
 0x12b   : > { %v3139_v8 = vpop.f32.mrf.mxu1  ;;  %v4342_v16 = vadd.f32 %v3054_v36, %v3053_v29  ;;  %v914_v36 = vld [vmem:[#allocation2 + $0x1a2] sm:$0xff] }
 0x12c   : > { %v3140_v63 = vadd.f32 %v3139_v8, %v3138_v11  ;;  %v3056_v34 = vpop.f32.mrf.mxu0  ;;  %3497 = vmatmul.mubr.bf16.gmra.mxu0 %v4188_v33  ;;  %v866_v11 = vld [vmem:[#allocation2 + $0x1a1] sm:$0xff] }
 0x12d   : > { %v3141_v3 = vpop.f32.mrf.mxu1  ;;  %3500 = vmatprep.mubr.bf16.mxu0 %v4199_v49 }
 0x12e   : > { %v4340_v52 = vadd.f32 %v3140_v63, %v4286_v10  ;;  %v3057_v2 = vpop.f32.mrf.mxu0  ;;  %v813_v10 = vld [vmem:[#allocation2 + $0x168] sm:$0xff]  ;;  %v882_v63 = vpack.c.bf16 %v866_v11, %v865_v31 }
 0x12f   : > { %v3142_v39 = vpop.f32.mrf.mxu1  ;;  %v4350_v6 = vadd.f32 %v3057_v2, %v3056_v34  ;;  %v832_v0 = vpack.c.bf16 %v814_v20, %v813_v10 }
 0x130   : > { %v3143_v57 = vadd.f32 %v3142_v39, %v3141_v3  ;;  %v3059_v46 = vpop.f32.mrf.mxu0 }
 0x131   : > { %v3144_v48 = vpop.f32.mrf.mxu1  ;;  %2119 = vmatmul.mubr.bf16.gmra.mxu1 %v831_v37  ;;  %v913_v37 = vld [vmem:[#allocation2 + $0x19a] sm:$0xff] }
 0x132   : > { %v4347_v26 = vadd.f32 %v3143_v57, %v4290_v24  ;;  %2126 = vmatprep.mubr.bf16.mxu1 %v4263_v21  ;;  %v3060_v25 = vpop.f32.mrf.mxu0  ;;  %v930_v10 = vpack.c.bf16 %v914_v36, %v913_v37 }
 0x133   : > { %v3145_v54 = vpop.f32.mrf.mxu1  ;;  %v4355_v49 = vadd.f32 %v3060_v25, %v3059_v46 }
 0x134   : > { %v3146_v55 = vadd.f32 %v3145_v54, %v3144_v48  ;;  %v3062_v60 = vpop.f32.mrf.mxu0  ;;  %3501 = vmatmul.mubr.bf16.gmra.mxu0 %v4205_v56 }
 0x135   : > { %v3147_v30 = vpop.f32.mrf.mxu1  ;;  %3504 = vmatprep.mubr.bf16.mxu0 %v4211_v18 }
 0x136   : > { %v4353_v33 = vadd.f32 %v3146_v55, %v4296_v9  ;;  %v3063_v50 = vpop.f32.mrf.mxu0 }
 0x137   : > { %v3148_v24 = vpop.f32.mrf.mxu1  ;;  %v4363_v9 = vadd.f32 %v3063_v50, %v3062_v60 }
 0x138   : > { %v3149_v59 = vadd.f32 %v3148_v24, %v3147_v30  ;;  %v3065_v13 = vpop.f32.mrf.mxu0 }
 0x139   : > { %v3150_v21 = vpop.f32.mrf.mxu1  ;;  %2127 = vmatmul.mubr.bf16.gmra.mxu1 %v832_v0 }
 0x13a   : > { %v4360_v22 = vadd.f32 %v3149_v59, %v4301_v45  ;;  %2134 = vmatprep.mubr.bf16.mxu1 %v4143_v14  ;;  %v3066_v8 = vpop.f32.mrf.mxu0 }
 0x13b   : > { %v3151_v12 = vpop.f32.mrf.mxu1  ;;  %v4368_v18 = vadd.f32 %v3066_v8, %v3065_v13 }
 0x13c   : > { %v3152_v4 = vadd.f32 %v3151_v12, %v3150_v21  ;;  %v3068_v3 = vpop.f32.mrf.mxu0  ;;  %3505 = vmatmul.mubr.bf16.gmra.mxu0 %v4219_v62  ;;  %v3609_v62 = vld [vmem:[#allocation2] sm:$0xff] }
 0x13d   : > { %v3153_v27 = vpop.f32.mrf.mxu1  ;;  %3508 = vmatprep.mubr.bf16.mxu0 %v4265_v17  ;;  %v834_v54 = vpack.c.bf16 %v3609_v62, %v3609_v62 }
 0x13e   : > { %v4366_v56 = vadd.f32 %v3152_v4, %v4309_v38  ;;  %v3069_v38 = vpop.f32.mrf.mxu0 }
 0x13f   : > { %v3154_v45 = vpop.f32.mrf.mxu1  ;;  %v4376_v57 = vadd.f32 %v3069_v38, %v3068_v3 }
 0x140   : > { %v3155_v29 = vadd.f32 %v3154_v45, %v3153_v27  ;;  %v3071_v2 = vpop.f32.mrf.mxu0 }
 0x141   : > { %v3156_v14 = vpop.f32.mrf.mxu1  ;;  %2135 = vmatmul.mubr.bf16.gmra.mxu1 %v4213_v19 }
 0x142   : > { %v4374_v39 = vadd.f32 %v3155_v29, %v4314_v5  ;;  %2142 = vmatprep.mubr.bf16.mxu1 %v882_v63  ;;  %v3072_v17 = vpop.f32.mrf.mxu0 }
 0x143   : > { %v3157_v34 = vpop.f32.mrf.mxu1  ;;  %v4381_v55 = vadd.f32 %v3072_v17, %v3071_v2 }
 0x144   : > { %v3158_v48 = vadd.f32 %v3157_v34, %v3156_v14  ;;  %v3074_v30 = vpop.f32.mrf.mxu0  ;;  %3509 = vmatmul.mubr.bf16.gmra.mxu0 %v930_v10 }
 0x145   : > { %v3159_v20 = vpop.f32.mrf.mxu1 }
 0x146   : > { %v4379_v19 = vadd.f32 %v3158_v48, %v4323_v7  ;;  %v3075_v24 = vpop.f32.mrf.mxu0 }
 0x147   : > { %v3160_v46 = vpop.f32.mrf.mxu1  ;;  %v4386_v59 = vadd.f32 %v3075_v24, %v3074_v30 }
 0x148   : > { %v3161_v5 = vadd.f32 %v3160_v46, %v3159_v20  ;;  %v3077_v50 = vpop.f32.mrf.mxu0 }
 0x149   : > { %v3162_v0 = vpop.f32.mrf.mxu1  ;;  %2143 = vmatmul.mubr.bf16.gmra.mxu1 %v834_v54 }
 0x14a   : > { %v4384_v25 = vadd.f32 %v3161_v5, %v4328_v61  ;;  %v3078_v31 = vpop.f32.mrf.mxu0 }
 0x14b   : > { %v3163_v60 = vpop.f32.mrf.mxu1  ;;  %v4391_v11 = vadd.f32 %v3078_v31, %v3077_v50 }
 0x14c   : > { %v3164_v21 = vadd.f32 %v3163_v60, %v3162_v0  ;;  %v3232_v27 = vpop.f32.mrf.mxu0 }
 0x14d   : > { %v3165_v7 = vpop.f32.mrf.mxu1 }
 0x14e   : > { %v4389_v12 = vadd.f32 %v3164_v21, %v4337_v44  ;;  %v3233_v63 = vpop.f32.mrf.mxu0 }
 0x14f   : > { %v3166_v4 = vpop.f32.mrf.mxu1  ;;  %v3234_v29 = vadd.f32 %v3233_v63, %v3232_v27 }
 0x150   : > { %v3167_v13 = vadd.f32 %v3166_v4, %v3165_v7  ;;  %v3235_v14 = vpop.f32.mrf.mxu0 }
 0x151   : > { %v3168_v8 = vpop.f32.mrf.mxu1  ;;  %v4397_v37 = vadd.f32 %v3234_v29, %v4299_v40 }
 0x152   : > { %v4394_v61 = vadd.f32 %v3167_v13, %v4342_v16  ;;  %v3236_v38 = vpop.f32.mrf.mxu0 }
 0x153   : > { %v3169_v45 = vpop.f32.mrf.mxu1  ;;  %v3237_v48 = vadd.f32 %v3236_v38, %v3235_v14 }
 0x154   : > { %v3170_v3 = vadd.f32 %v3169_v45, %v3168_v8  ;;  %v3238_v10 = vpop.f32.mrf.mxu0 }
 0x155   : > { %v3171_v44 = vpop.f32.mrf.mxu1  ;;  %v4403_v16 = vadd.f32 %v3237_v48, %v4306_v58 }
 0x156   : > { %v4400_v36 = vadd.f32 %v3170_v3, %v4350_v6  ;;  %v3239_v54 = vpop.f32.mrf.mxu0 }
 0x157   : > { %v3172_v34 = vpop.f32.mrf.mxu1  ;;  %v3240_v40 = vadd.f32 %v3239_v54, %v3238_v10 }
 0x158   : > { %v3173_v2 = vadd.f32 %v3172_v34, %v3171_v44  ;;  %v3241_v5 = vpop.f32.mrf.mxu0 }
 0x159   : > { %v3174_v20 = vpop.f32.mrf.mxu1  ;;  %v4409_v6 = vadd.f32 %v3240_v40, %v4312_v53 }
 0x15a   : > { %v4406_v62 = vadd.f32 %v3173_v2, %v4355_v49  ;;  %v3242_v24 = vpop.f32.mrf.mxu0 }
 0x15b   : > { %v3175_v17 = vpop.f32.mrf.mxu1  ;;  %v3243_v58 = vadd.f32 %v3242_v24, %v3241_v5 }
 0x15c   : > { %v3176_v46 = vadd.f32 %v3175_v17, %v3174_v20  ;;  %v3244_v50 = vpop.f32.mrf.mxu0 }
 0x15d   : > { %v3177_v30 = vpop.f32.mrf.mxu1  ;;  %v4415_v49 = vadd.f32 %v3243_v58, %v4320_v41 }
 0x15e   : > { %v4412_v0 = vadd.f32 %v3176_v46, %v4363_v9  ;;  %v3245_v4 = vpop.f32.mrf.mxu0 }
 0x15f   : > { %v3178_v60 = vpop.f32.mrf.mxu1  ;;  %v3246_v53 = vadd.f32 %v3245_v4, %v3244_v50 }
 0x160   : > { %v3179_v21 = vadd.f32 %v3178_v60, %v3177_v30  ;;  %v3247_v8 = vpop.f32.mrf.mxu0 }
 0x161   : > { %v3180_v7 = vpop.f32.mrf.mxu1  ;;  %v4421_v9 = vadd.f32 %v3246_v53, %v4326_v42 }
 0x162   : > { %v4418_v31 = vadd.f32 %v3179_v21, %v4368_v18  ;;  %v3248_v29 = vpop.f32.mrf.mxu0 }
 0x163   : > { %v3181_v13 = vpop.f32.mrf.mxu1  ;;  %v3249_v41 = vadd.f32 %v3248_v29, %v3247_v8 }
 0x164   : > { %v3182_v27 = vadd.f32 %v3181_v13, %v3180_v7  ;;  %v3250_v44 = vpop.f32.mrf.mxu0 }
 0x165   : > { %v3183_v63 = vpop.f32.mrf.mxu1  ;;  %v4427_v18 = vadd.f32 %v3249_v41, %v4334_v15 }
 0x166   : > { %v4424_v45 = vadd.f32 %v3182_v27, %v4376_v57  ;;  %v3251_v48 = vpop.f32.mrf.mxu0 }
 0x167   : > { %v3184_v3 = vpop.f32.mrf.mxu1  ;;  %v3252_v42 = vadd.f32 %v3251_v48, %v3250_v44 }
 0x168   : > { %v3185_v14 = vadd.f32 %v3184_v3, %v3183_v63  ;;  %v3253_v20 = vpop.f32.mrf.mxu0 }
 0x169   : > { %v3186_v38 = vpop.f32.mrf.mxu1  ;;  %v4433_v57 = vadd.f32 %v3252_v42, %v4340_v52 }
 0x16a   : > { %v4430_v34 = vadd.f32 %v3185_v14, %v4381_v55  ;;  %v3254_v40 = vpop.f32.mrf.mxu0 }
 0x16b   : > { %v3187_v2 = vpop.f32.mrf.mxu1  ;;  %v3255_v15 = vadd.f32 %v3254_v40, %v3253_v20 }
 0x16c   : > { %v3188_v10 = vadd.f32 %v3187_v2, %v3186_v38  ;;  %v3256_v30 = vpop.f32.mrf.mxu0 }
 0x16d   : > { %v3189_v54 = vpop.f32.mrf.mxu1  ;;  %v4439_v55 = vadd.f32 %v3255_v15, %v4347_v26 }
 0x16e   : > { %v4436_v17 = vadd.f32 %v3188_v10, %v4386_v59  ;;  %v3257_v58 = vpop.f32.mrf.mxu0 }
 0x16f   : > { %v3190_v46 = vpop.f32.mrf.mxu1  ;;  %v3258_v52 = vadd.f32 %v3257_v58, %v3256_v30 }
 0x170   : > { %v3191_v5 = vadd.f32 %v3190_v46, %v3189_v54  ;;  %v3259_v7 = vpop.f32.mrf.mxu0 }
 0x171   : > { %v3192_v24 = vpop.f32.mrf.mxu1  ;;  %v4445_v59 = vadd.f32 %v3258_v52, %v4353_v33 }
 0x172   : > { %v4442_v60 = vadd.f32 %v3191_v5, %v4391_v11  ;;  %v3260_v53 = vpop.f32.mrf.mxu0 }
 0x173   : > { %v3193_v21 = vpop.f32.mrf.mxu1  ;;  %v3261_v26 = vadd.f32 %v3260_v53, %v3259_v7 }
 0x174   : > { %v3194_v50 = vadd.f32 %v3193_v21, %v3192_v24  ;;  %v3262_v63 = vpop.f32.mrf.mxu0 }
 0x175   : > { %v3195_v4 = vpop.f32.mrf.mxu1  ;;  %v4451_v11 = vadd.f32 %v3261_v26, %v4360_v22 }
 0x176   : > { %v4448_v13 = vadd.f32 %v3194_v50, %v4247_v47  ;;  %v3263_v41 = vpop.f32.mrf.mxu0 }
 0x177   : > { %v3196_v27 = vpop.f32.mrf.mxu1  ;;  %v3264_v33 = vadd.f32 %v3263_v41, %v3262_v63 }
 0x178   : > { %v3197_v8 = vadd.f32 %v3196_v27, %v3195_v4  ;;  %v3265_v38 = vpop.f32.mrf.mxu0 }
 0x179   : > { %v3198_v29 = vpop.f32.mrf.mxu1  ;;  %v4457_v47 = vadd.f32 %v3264_v33, %v4366_v56 }
 0x17a   : > { %v4454_v3 = vadd.f32 %v3197_v8, %v4253_v51  ;;  %v3266_v42 = vpop.f32.mrf.mxu0 }
 0x17b   : > { %v3199_v14 = vpop.f32.mrf.mxu1  ;;  %v3267_v22 = vadd.f32 %v3266_v42, %v3265_v38 }
 0x17c   : > { %v3200_v44 = vadd.f32 %v3199_v14, %v3198_v29  ;;  %v3268_v54 = vpop.f32.mrf.mxu0 }
 0x17d   : > { %v3201_v48 = vpop.f32.mrf.mxu1  ;;  %v4463_v51 = vadd.f32 %v3267_v22, %v4374_v39 }
 0x17e   : > { %v4460_v2 = vadd.f32 %v3200_v44, %v4261_v32  ;;  %v3269_v15 = vpop.f32.mrf.mxu0 }
 0x17f   : > { %v3202_v10 = vpop.f32.mrf.mxu1  ;;  %v3270_v56 = vadd.f32 %v3269_v15, %v3268_v54 }
 0x180   : > { %v3203_v20 = vadd.f32 %v3202_v10, %v3201_v48  ;;  %v3271_v24 = vpop.f32.mrf.mxu0 }
 0x181   : > { %v3204_v40 = vpop.f32.mrf.mxu1  ;;  %v4469_v32 = vadd.f32 %v3270_v56, %v4379_v19 }
 0x182   : > { %v4466_v46 = vadd.f32 %v3203_v20, %v4269_v43  ;;  %v3272_v52 = vpop.f32.mrf.mxu0 }
 0x183   : > { %v3205_v5 = vpop.f32.mrf.mxu1  ;;  %v3273_v39 = vadd.f32 %v3272_v52, %v3271_v24 }
 0x184   : > { %v3206_v30 = vadd.f32 %v3205_v5, %v3204_v40  ;;  %v3274_v4 = vpop.f32.mrf.mxu0 }
 0x185   : > { %v3207_v58 = vpop.f32.mrf.mxu1  ;;  %v4475_v43 = vadd.f32 %v3273_v39, %v4384_v25 }
 0x186   : > { %v4472_v21 = vadd.f32 %v3206_v30, %v4277_v35  ;;  %v3275_v26 = vpop.f32.mrf.mxu0 }
 0x187   : > { %v3208_v50 = vpop.f32.mrf.mxu1  ;;  %v3276_v19 = vadd.f32 %v3275_v26, %v3274_v4 }
 0x188   : > { %v3209_v7 = vadd.f32 %v3208_v50, %v3207_v58  ;;  %v3277_v29 = vpop.f32.mrf.mxu0 }
 0x189   : > { %v3210_v53 = vpop.f32.mrf.mxu1  ;;  %v4481_v35 = vadd.f32 %v3276_v19, %v4389_v12 }
 0x18a   : > { %v4478_v27 = vadd.f32 %v3209_v7, %v4281_v28  ;;  %v3278_v33 = vpop.f32.mrf.mxu0 }
 0x18b   : > { %v3211_v8 = vpop.f32.mrf.mxu1  ;;  %v3279_v25 = vadd.f32 %v3278_v33, %v3277_v29 }
 0x18c   : > { %v3212_v63 = vadd.f32 %v3211_v8, %v3210_v53  ;;  %v3280_v48 = vpop.f32.mrf.mxu0 }
 0x18d   : > { %v3213_v41 = vpop.f32.mrf.mxu1  ;;  %v4487_v28 = vadd.f32 %v3279_v25, %v4394_v61 }
 0x18e   : > { %v4484_v14 = vadd.f32 %v3212_v63, %v4288_v1  ;;  %v3281_v22 = vpop.f32.mrf.mxu0 }
 0x18f   : > { %v3214_v44 = vpop.f32.mrf.mxu1  ;;  %v3282_v20 = vadd.f32 %v3281_v22, %v3280_v48 }
 0x190   : > { %v3215_v38 = vadd.f32 %v3214_v44, %v3213_v41  ;;  %v3283_v40 = vpop.f32.mrf.mxu0 }
 0x191   : > { %v3344_v42 = vpop.f32.mrf.mxu1  ;;  %v4493_v1 = vadd.f32 %v3282_v20, %v4400_v36 }
 0x192   : > { %v4490_v10 = vadd.f32 %v3215_v38, %v4292_v23  ;;  %v3284_v5 = vpop.f32.mrf.mxu0 }
 0x193   : > { %v3345_v12 = vpop.f32.mrf.mxu1  ;;  %v3285_v61 = vadd.f32 %v3284_v5, %v3283_v40 }
 0x194   : > { %v3346_v54 = vadd.f32 %v3345_v12, %v3344_v42  ;;  %v3286_v24 = vpop.f32.mrf.mxu0 }
 0x195   : > { %v4495_v15 = vpop.f32.mrf.mxu1  ;;  %v4503_v23 = vadd.f32 %v3285_v61, %v4406_v62 }
 0x196   : > { %v4498_v56 = vadd.f32 %v3346_v54, %v4397_v37  ;;  %v3287_v52 = vpop.f32.mrf.mxu0 }
 0x197   : > { %v4500_v30 = vpop.f32.mrf.mxu1  ;;  %v3288_v50 = vadd.f32 %v3287_v52, %v3286_v24 }
 0x198   : > { %v3289_v36 = vpop.f32.mrf.mxu0 }
 0x199   : > { %v4505_v58 = vpop.f32.mrf.mxu1  ;;  %v4510_v7 = vadd.f32 %v3288_v50, %v4412_v0 }
 0x19a   : > { %v3290_v37 = vpop.f32.mrf.mxu0 }
 0x19b   : > { %v4507_v39 = vpop.f32.mrf.mxu1  ;;  %v3291_v53 = vadd.f32 %v3290_v37, %v3289_v36 }
 0x19c   : > { %v3292_v8 = vpop.f32.mrf.mxu0 }
 0x19d   : > { %v4512_v4 = vpop.f32.mrf.mxu1  ;;  %v4517_v62 = vadd.f32 %v3291_v53, %v4418_v31 }
 0x19e   : > { %v3293_v63 = vpop.f32.mrf.mxu0 }
 0x19f   : > { %v4514_v26 = vpop.f32.mrf.mxu1  ;;  %v3294_v29 = vadd.f32 %v3293_v63, %v3292_v8 }
 0x1a0   : > { %v3295_v33 = vpop.f32.mrf.mxu0 }
 0x1a1   : > { %v4519_v19 = vpop.f32.mrf.mxu1  ;;  %v4524_v0 = vadd.f32 %v3294_v29, %v4424_v45 }
 0x1a2   : > { %v3296_v25 = vpop.f32.mrf.mxu0 }
 0x1a3   : > { %v4521_v41 = vpop.f32.mrf.mxu1  ;;  %v3297_v38 = vadd.f32 %v3296_v25, %v3295_v33 }
 0x1a4   : > { %v3298_v42 = vpop.f32.mrf.mxu0 }
 0x1a5   : > { %v4526_v44 = vpop.f32.mrf.mxu1  ;;  %v4531_v31 = vadd.f32 %v3297_v38, %v4430_v34 }
 0x1a6   : > { %v3299_v20 = vpop.f32.mrf.mxu0 }
 0x1a7   : > { %v4528_v48 = vpop.f32.mrf.mxu1  ;;  %4737 = vst [vmem:[#allocation3_spill] sm:$0xff] %v4531_v31  ;;  %v3300_v12 = vadd.f32 %v3299_v20, %v3298_v42 }
 0x1a8   : > { %v3301_v40 = vpop.f32.mrf.mxu0 }
 0x1a9   : > { %v4533_v22 = vpop.f32.mrf.mxu1  ;;  %v4538_v45 = vadd.f32 %v3300_v12, %v4436_v17 }
 0x1aa   : > { %v3302_v61 = vpop.f32.mrf.mxu0 }
 0x1ab   : > { %v4535_v54 = vpop.f32.mrf.mxu1  ;;  %4738 = vst [vmem:[#allocation4_spill] sm:$0xff] %v4538_v45  ;;  %v3303_v24 = vadd.f32 %v3302_v61, %v3301_v40 }
 0x1ac   : > { %v3304_v50 = vpop.f32.mrf.mxu0 }
 0x1ad   : > { %v4540_v5 = vpop.f32.mrf.mxu1  ;;  %v4545_v34 = vadd.f32 %v3303_v24, %v4442_v60 }
 0x1ae   : > { %v3305_v37 = vpop.f32.mrf.mxu0 }
 0x1af   : > { %v4542_v52 = vpop.f32.mrf.mxu1  ;;  %4739 = vst [vmem:[#allocation5_spill] sm:$0xff] %v4545_v34  ;;  %v3306_v53 = vadd.f32 %v3305_v37, %v3304_v50 }
 0x1b0   : > { %v3307_v63 = vpop.f32.mrf.mxu0 }
 0x1b1   : > { %v4547_v36 = vpop.f32.mrf.mxu1  ;;  %v4552_v17 = vadd.f32 %v3306_v53, %v4448_v13 }
 0x1b2   : > { %v3308_v33 = vpop.f32.mrf.mxu0 }
 0x1b3   : > { %v4549_v8 = vpop.f32.mrf.mxu1  ;;  %4740 = vst [vmem:[#allocation6_spill] sm:$0xff] %v4552_v17  ;;  %v3309_v25 = vadd.f32 %v3308_v33, %v3307_v63 }
 0x1b4   : > { %v3310_v42 = vpop.f32.mrf.mxu0 }
 0x1b5   : > { %v4554_v29 = vpop.f32.mrf.mxu1  ;;  %v4559_v60 = vadd.f32 %v3309_v25, %v4454_v3 }
 0x1b6   : > { %v3311_v12 = vpop.f32.mrf.mxu0 }
 0x1b7   : > { %v4556_v38 = vpop.f32.mrf.mxu1  ;;  %4741 = vst [vmem:[#allocation7_spill] sm:$0xff] %v4559_v60  ;;  %v3312_v40 = vadd.f32 %v3311_v12, %v3310_v42 }
 0x1b8   : > { %v3313_v24 = vpop.f32.mrf.mxu0 }
 0x1b9   : > { %v4561_v20 = vpop.f32.mrf.mxu1  ;;  %v4566_v13 = vadd.f32 %v3312_v40, %v4460_v2 }
 0x1ba   : > { %v3314_v37 = vpop.f32.mrf.mxu0 }
 0x1bb   : > { %v4563_v61 = vpop.f32.mrf.mxu1  ;;  %4742 = vst [vmem:[#allocation8_spill] sm:$0xff] %v4566_v13  ;;  %v3315_v53 = vadd.f32 %v3314_v37, %v3313_v24 }
 0x1bc   : > { %v3316_v33 = vpop.f32.mrf.mxu0 }
 0x1bd   : > { %v4568_v50 = vpop.f32.mrf.mxu1  ;;  %v4573_v3 = vadd.f32 %v3315_v53, %v4466_v46 }
 0x1be   : > { %v3317_v60 = vpop.f32.mrf.mxu0 }
 0x1bf   : > { %v4570_v63 = vpop.f32.mrf.mxu1  ;;  %4743 = vst [vmem:[#allocation9_spill] sm:$0xff] %v4573_v3  ;;  %v3318_v42 = vadd.f32 %v3317_v60, %v3316_v33 }
 0x1c0   : > { %v3319_v17 = vpop.f32.mrf.mxu0 }
 0x1c1   : > { %v4575_v25 = vpop.f32.mrf.mxu1  ;;  %v4580_v2 = vadd.f32 %v3318_v42, %v4472_v21 }
 0x1c2   : > { %v3320_v13 = vpop.f32.mrf.mxu0 }
 0x1c3   : > { %v4577_v12 = vpop.f32.mrf.mxu1  ;;  %4744 = vst [vmem:[#allocation10_spill] sm:$0xff] %v4580_v2  ;;  %v3321_v24 = vadd.f32 %v3320_v13, %v3319_v17  ;;  %v3352_v17 = vadd.f32 %v4507_v39, %v4505_v58 }
 0x1c4   : > { %v3322_v31 = vpop.f32.mrf.mxu0 }
 0x1c5   : > { %v4582_v40 = vpop.f32.mrf.mxu1  ;;  %v4587_v46 = vadd.f32 %v3321_v24, %v4478_v27  ;;  %v3355_v27 = vadd.f32 %v4514_v26, %v4512_v4  ;;  %v3358_v4 = vadd.f32 %v4521_v41, %v4519_v19 }
 0x1c6   : > { %v3323_v3 = vpop.f32.mrf.mxu0 }
 0x1c7   : > { %v4584_v37 = vpop.f32.mrf.mxu1  ;;  %4745 = vst [vmem:[#allocation11_spill] sm:$0xff] %v4587_v46  ;;  %v3324_v60 = vadd.f32 %v3323_v3, %v3322_v31  ;;  %v3349_v31 = vadd.f32 %v4500_v30, %v4495_v15  ;;  %v2036_v39 = vadd.f32 %v3355_v27, %v4415_v49 }
 0x1c8   : > { %v3325_v34 = vpop.f32.mrf.mxu0 }
 0x1c9   : > { %v4589_v53 = vpop.f32.mrf.mxu1  ;;  %v4594_v21 = vadd.f32 %v3324_v60, %v4484_v14 }
 0x1ca   : > { %v3326_v2 = vpop.f32.mrf.mxu0 }
 0x1cb   : > { %v4591_v33 = vpop.f32.mrf.mxu1  ;;  %4746 = vst [vmem:[#allocation12_spill] sm:$0xff] %v4594_v21  ;;  %v3327_v13 = vadd.f32 %v3326_v2, %v3325_v34  ;;  %v2033_v21 = vadd.f32 %v3352_v17, %v4409_v6  ;;  %v2028_v2 = vadd.f32 %v3349_v31, %v4403_v16  ;;  %v3367_v6 = vadd.f32 %v4542_v52, %v4540_v5 }
 0x1cc   : > { %v3482_v46 = vpop.f32.mrf.mxu0  ;;  %v3361_v17 = vadd.f32 %v4528_v48, %v4526_v44  ;;  %v3379_v48 = vadd.f32 %v4570_v63, %v4568_v50 }
 0x1cd   : > { %v4596_v42 = vpop.f32.mrf.mxu1  ;;  %v4607_v14 = vadd.f32 %v3327_v13, %v4490_v10  ;;  %v2194_v34 = vadd.f32 %v3482_v46, %v2033_v21  ;;  %v3364_v13 = vadd.f32 %v4535_v54, %v4533_v22  ;;  %v2041_v46 = vadd.f32 %v3358_v4, %v4421_v9 }
 0x1ce   : > { %v2185_v60 = vpop.f32.mrf.mxu0 }
 0x1cf   : > { %v4602_v24 = vpop.f32.mrf.mxu1  ;;  %4747 = vst [vmem:[#allocation13_spill] sm:$0xff] %v4607_v14  ;;  %v2186_v15 = vadd.f32 %v2185_v60, %v4498_v56  ;;  %v2049_v27 = vadd.f32 %v3364_v13, %v4433_v57  ;;  %v2052_v60 = vadd.f32 %v3367_v6, %v4439_v55  ;;  %v3370_v57 = vadd.f32 %v4549_v8, %v4547_v36 }
 0x1d0   : > { %v3483_v26 = vpop.f32.mrf.mxu0  ;;  %v3376_v55 = vadd.f32 %v4563_v61, %v4561_v20  ;;  %v3373_v36 = vadd.f32 %v4556_v38, %v4554_v29 }
 0x1d1   : > { %v4609_v3 = vpop.f32.mrf.mxu1  ;;  %v2197_v10 = vadd.f32 %v3483_v26, %v2036_v39  ;;  %v2510_v22 = vmul.f32 %v2186_v15, %v2186_v15  ;;  %v2512_v39 = vmul.f32 %v2194_v34, %v2194_v34  ;;  %v2057_v63 = vadd.f32 %v3370_v57, %v4445_v59 }
 0x1d2   : > { %v2188_v49 = vpop.f32.mrf.mxu0  ;;  %v3382_v59 = vadd.f32 %v4577_v12, %v4575_v25  ;;  %v3391_v57 = vadd.f32 %v4602_v24, %v4596_v42  ;;  %v3385_v25 = vadd.f32 %v4584_v37, %v4582_v40 }
 0x1d3   : > { %v4612_v58 = vpop.f32.mrf.mxu1  ;;  %v2890_v56 = vpack.c.bf16 %v2197_v10, %v2194_v34  ;;  %v2189_v41 = vadd.f32 %v2188_v49, %v2028_v2  ;;  %v2513_v49 = vmul.f32 %v2197_v10, %v2197_v10 }
 0x1d4   : > { %v3486_v16 = vpop.f32.mrf.mxu0  ;;  %v2073_v42 = vadd.f32 %v3382_v59, %v4469_v32  ;;  %v3394_v32 = vadd.f32 %v4612_v58, %v4609_v3 }
 0x1d5   : > { %v4618_v30 = vpop.f32.mrf.mxu1  ;;  %2977 = vst [vmem:[%s4630_s24 + $0x8] sm:$0xff] %v2890_v56   ;;  %v2885_v54 = vpack.c.bf16 %v2189_v41, %v2186_v15  ;;  %v2472_v5 = vadd.f32 %v2189_v41, %v2186_v15  ;;  %v2511_v52 = vmul.f32 %v2189_v41, %v2189_v41  ;;  %v2210_v41 = vadd.f32 %v3486_v16, %v2049_v27 }
 0x1d6   : > { %v2201_v31 = vpop.f32.mrf.mxu0  ;;  %v2068_v27 = vadd.f32 %v3379_v48, %v4463_v51 }
 0x1d7   : > { %v4632_v19 = vpop.f32.mrf.mxu1  ;;  %2886 = vst [vmem:[%s4630_s24] sm:$0xff] %v2885_v54   ;;  %v2473_v26 = vadd.f32 %v2472_v5, %v2194_v34  ;;  %v2542_v2 = vadd.f32 %v2511_v52, %v2510_v22  ;;  %v2202_v4 = vadd.f32 %v2201_v31, %v2041_v46  ;;  %v2044_v34 = vadd.f32 %v3361_v17, %v4427_v18 }
 0x1d8   : > { %v3487_v15 = vpop.f32.mrf.mxu0  ;;  %v2065_v52 = vadd.f32 %v3376_v55, %v4457_v47  ;;  %v2516_v31 = vmul.f32 %v2210_v41, %v2210_v41  ;;  %v3397_v3 = vadd.f32 %v4632_v19, %v4618_v30 }
 0x1d9   : > { %v4636_v21 = vpop.f32.mrf.mxu1  ;;  %v2543_v56 = vadd.f32 %v2542_v2, %v2512_v39  ;;  %v2474_v14 = vadd.f32 %v2473_v26, %v2197_v10  ;;  %v2213_v44 = vadd.f32 %v3487_v15, %v2052_v60  ;;  %v2514_v46 = vmul.f32 %v2202_v4, %v2202_v4 }
 0x1da   : > { %v2204_v13 = vpop.f32.mrf.mxu0 }
 0x1db   : > { %v4643_v9 = vpop.f32.mrf.mxu1  ;;  %v2475_v6 = vadd.f32 %v2474_v14, %v2202_v4  ;;  %v2544_v16 = vadd.f32 %v2543_v56, %v2513_v49  ;;  %v2900_v10 = vpack.c.bf16 %v2213_v44, %v2210_v41  ;;  %v2205_v54 = vadd.f32 %v2204_v13, %v2044_v34 }
 0x1dc   : > { %v3490_v5 = vpop.f32.mrf.mxu0  ;;  %v2060_v49 = vadd.f32 %v3373_v36, %v4451_v11  ;;  %v2517_v47 = vmul.f32 %v2213_v44, %v2213_v44 }
 0x1dd   : > { %v4645_v45 = vpop.f32.mrf.mxu1  ;;  %v2545_v8 = vadd.f32 %v2544_v16, %v2514_v46  ;;  %2979 = vst [vmem:[%s4630_s24 + $0x18] sm:$0xff] %v2900_v10   ;;  %v2895_v61 = vpack.c.bf16 %v2205_v54, %v2202_v4  ;;  %v2476_v50 = vadd.f32 %v2475_v6, %v2205_v54  ;;  %v2515_v18 = vmul.f32 %v2205_v54, %v2205_v54 }
 0x1de   : > { %v2217_v14 = vpop.f32.mrf.mxu0  ;;  %v2226_v26 = vadd.f32 %v3490_v5, %v2065_v52  ;;  %v2084_v5 = vadd.f32 %v3391_v57, %v4487_v28  ;;  %v3400_v28 = vadd.f32 %v4643_v9, %v4636_v21  ;;  %v2089_v9 = vadd.f32 %v3394_v32, %v4493_v1 }
 0x1df   : > { %v4654_v22 = vpop.f32.mrf.mxu1  ;;  %2978 = vst [vmem:[%s4630_s24 + $0x10] sm:$0xff] %v2895_v61   ;;  %v2477_v60 = vadd.f32 %v2476_v50, %v2210_v41  ;;  %v2546_v29 = vadd.f32 %v2545_v8, %v2515_v18  ;;  %v2218_v38 = vadd.f32 %v2217_v14, %v2057_v63  ;;  %v3388_v41 = vadd.f32 %v4591_v33, %v4589_v53 }
 0x1e0   : > { %v3491_v39 = vpop.f32.mrf.mxu0  ;;  %v2520_v36 = vmul.f32 %v2226_v26, %v2226_v26  ;;  %v2076_v14 = vadd.f32 %v3385_v25, %v4475_v43 }
 0x1e1   : > { %v4659_v20 = vpop.f32.mrf.mxu1  ;;  %v2229_v4 = vadd.f32 %v3491_v39, %v2068_v27  ;;  %v2547_v15 = vadd.f32 %v2546_v29, %v2516_v31  ;;  %v2478_v56 = vadd.f32 %v2477_v60, %v2213_v44  ;;  %v2518_v13 = vmul.f32 %v2218_v38, %v2218_v38 }
 0x1e2   : > { %v2220_v51 = vpop.f32.mrf.mxu0  ;;  %v2081_v10 = vadd.f32 %v3388_v41, %v4481_v35  ;;  %v3403_v60 = vadd.f32 %v4654_v22, %v4645_v45  ;;  %v2097_v22 = vadd.f32 %v3400_v28, %v4510_v7 }
 0x1e3   : > { %v4663_v17 = vpop.f32.mrf.mxu1  ;;  %v2910_v55 = vpack.c.bf16 %v2229_v4, %v2226_v26  ;;  %v2221_v34 = vadd.f32 %v2220_v51, %v2060_v49  ;;  %v2479_v11 = vadd.f32 %v2478_v56, %v2218_v38  ;;  %v2548_v6 = vadd.f32 %v2547_v15, %v2517_v47 }
 0x1e4   : > { %v3494_v46 = vpop.f32.mrf.mxu0  ;;  %v2521_v52 = vmul.f32 %v2229_v4, %v2229_v4  ;;  %v2100_v51 = vadd.f32 %v3403_v60, %v4517_v62  ;;  %v3406_v1 = vadd.f32 %v4663_v17, %v4659_v20  ;;  %v4750_v60 = vld [vmem:[#allocation3_spill] sm:$0xff] }
 0x1e5   : > { %v4667_v2 = vpop.f32.mrf.mxu1  ;;  %2981 = vst [vmem:[%s4630_s24 + $0x28] sm:$0xff] %v2910_v55   ;;  %v2905_v12 = vpack.c.bf16 %v2221_v34, %v2218_v38  ;;  %v2519_v44 = vmul.f32 %v2221_v34, %v2221_v34  ;;  %v2549_v53 = vadd.f32 %v2548_v6, %v2518_v13  ;;  %v2480_v33 = vadd.f32 %v2479_v11, %v2221_v34 }
 0x1e6   : > { %v2233_v24 = vpop.f32.mrf.mxu0  ;;  %v2242_v37 = vadd.f32 %v3494_v46, %v2081_v10  ;;  %v2092_v6 = vadd.f32 %v3397_v3, %v4503_v23 }
 0x1e7   : > { %v4676_v48 = vpop.f32.mrf.mxu1  ;;  %2980 = vst [vmem:[%s4630_s24 + $0x20] sm:$0xff] %v2905_v12   ;;  %v2481_v8 = vadd.f32 %v2480_v33, %v2226_v26  ;;  %v2550_v61 = vadd.f32 %v2549_v53, %v2519_v44  ;;  %v2234_v50 = vadd.f32 %v2233_v24, %v2073_v42 }
 0x1e8   : > { %v3495_v40 = vpop.f32.mrf.mxu0  ;;  %v2524_v41 = vmul.f32 %v2242_v37, %v2242_v37  ;;  %v3409_v23 = vadd.f32 %v4676_v48, %v4667_v2 }
 0x1e9   : > { %v3410_v16 = vpop.f32.mrf.mxu1  ;;  %v2245_v63 = vadd.f32 %v3495_v40, %v2084_v5  ;;  %v2551_v27 = vadd.f32 %v2550_v61, %v2520_v36  ;;  %v2482_v35 = vadd.f32 %v2481_v8, %v2229_v4  ;;  %v2522_v43 = vmul.f32 %v2234_v50, %v2234_v50  ;;  %v4748_v40 = vld [vmem:[#allocation4_spill] sm:$0xff] }
 0x1ea   : > { %v2236_v31 = vpop.f32.mrf.mxu0 }
 0x1eb   : > { %v3411_v54 = vpop.f32.mrf.mxu1  ;;  %v2920_v29 = vpack.c.bf16 %v2245_v63, %v2242_v37  ;;  %v2237_v39 = vadd.f32 %v2236_v31, %v2076_v14  ;;  %v2483_v26 = vadd.f32 %v2482_v35, %v2234_v50  ;;  %v2552_v49 = vadd.f32 %v2551_v27, %v2521_v52 }
 0x1ec   : > { %v3498_v59 = vpop.f32.mrf.mxu0  ;;  %v2525_v46 = vmul.f32 %v2245_v63, %v2245_v63  ;;  %v3412_v44 = vadd.f32 %v3411_v54, %v3410_v16  ;;  %v2105_v16 = vadd.f32 %v3406_v1, %v4524_v0  ;;  %v4753_v1 = vld [vmem:[#allocation9_spill] sm:$0xff] }
 0x1ed   : > { %v3413_v18 = vpop.f32.mrf.mxu1  ;;  %2983 = vst [vmem:[%s4630_s24 + $0x38] sm:$0xff] %v2920_v29   ;;  %v2915_v58 = vpack.c.bf16 %v2237_v39, %v2234_v50  ;;  %v2523_v4 = vmul.f32 %v2237_v39, %v2237_v39  ;;  %v2553_v15 = vadd.f32 %v2552_v49, %v2522_v43  ;;  %v2484_v21 = vadd.f32 %v2483_v26, %v2237_v39 }
 0x1ee   : > { %v2249_v45 = vpop.f32.mrf.mxu0  ;;  %v2258_v19 = vadd.f32 %v3498_v59, %v2097_v22  ;;  %v2108_v29 = vadd.f32 %v3409_v23, %v4750_v60 }
 0x1ef   : > { %v3414_v38 = vpop.f32.mrf.mxu1  ;;  %2982 = vst [vmem:[%s4630_s24 + $0x30] sm:$0xff] %v2915_v58   ;;  %v2485_v57 = vadd.f32 %v2484_v21, %v2242_v37  ;;  %v2554_v55 = vadd.f32 %v2553_v15, %v2523_v4  ;;  %v2250_v34 = vadd.f32 %v2249_v45, %v2089_v9  ;;  %v2113_v37 = vadd.f32 %v3412_v44, %v4748_v40 }
 0x1f0   : > { %v3499_v30 = vpop.f32.mrf.mxu0  ;;  %v3415_v62 = vadd.f32 %v3414_v38, %v3413_v18  ;;  %v2528_v32 = vmul.f32 %v2258_v19, %v2258_v19 }
 0x1f1   : > { %v3416_v47 = vpop.f32.mrf.mxu1  ;;  %v2261_v13 = vadd.f32 %v3499_v30, %v2100_v51  ;;  %v2555_v25 = vadd.f32 %v2554_v55, %v2524_v41  ;;  %v2486_v7 = vadd.f32 %v2485_v57, %v2245_v63  ;;  %v2526_v10 = vmul.f32 %v2250_v34, %v2250_v34  ;;  %v4749_v63 = vld [vmem:[#allocation5_spill] sm:$0xff]  ;;  %v4751_v55 = vld [vmem:[#allocation6_spill] sm:$0xff] }
 0x1f2   : > { %v2252_v12 = vpop.f32.mrf.mxu0  ;;  %v2116_v14 = vadd.f32 %v3415_v62, %v4749_v63 }
 0x1f3   : > { %v3417_v56 = vpop.f32.mrf.mxu1  ;;  %v2930_v53 = vpack.c.bf16 %v2261_v13, %v2258_v19  ;;  %v2253_v42 = vadd.f32 %v2252_v12, %v2092_v6  ;;  %v2487_v24 = vadd.f32 %v2486_v7, %v2250_v34  ;;  %v2556_v5 = vadd.f32 %v2555_v25, %v2525_v46 }
 0x1f4   : > { %v3502_v36 = vpop.f32.mrf.mxu0  ;;  %v3418_v38 = vadd.f32 %v3417_v56, %v3416_v47  ;;  %v2529_v0 = vmul.f32 %v2261_v13, %v2261_v13 }
 0x1f5   : > { %v3419_v11 = vpop.f32.mrf.mxu1  ;;  %2985 = vst [vmem:[%s4630_s24 + $0x48] sm:$0xff] %v2930_v53   ;;  %v2925_v8 = vpack.c.bf16 %v2253_v42, %v2250_v34  ;;  %v2527_v20 = vmul.f32 %v2253_v42, %v2253_v42  ;;  %v2557_v61 = vadd.f32 %v2556_v5, %v2526_v10  ;;  %v2488_v50 = vadd.f32 %v2487_v24, %v2253_v42  ;;  %v4754_v24 = vld [vmem:[#allocation7_spill] sm:$0xff] }
 0x1f6   : > { %v2265_v54 = vpop.f32.mrf.mxu0  ;;  %v2274_v48 = vadd.f32 %v3502_v36, %v2113_v37  ;;  %v2121_v34 = vadd.f32 %v3418_v38, %v4751_v55 }
 0x1f7   : > { %v3420_v33 = vpop.f32.mrf.mxu1  ;;  %2984 = vst [vmem:[%s4630_s24 + $0x40] sm:$0xff] %v2925_v8   ;;  %v2489_v52 = vadd.f32 %v2488_v50, %v2258_v19  ;;  %v2558_v27 = vadd.f32 %v2557_v61, %v2527_v20  ;;  %v2266_v35 = vadd.f32 %v2265_v54, %v2105_v16  ;;  %v4752_v19 = vld [vmem:[#allocation8_spill] sm:$0xff] }
 0x1f8   : > { %v3503_v2 = vpop.f32.mrf.mxu0  ;;  %v3421_v22 = vadd.f32 %v3420_v33, %v3419_v11  ;;  %v2532_v25 = vmul.f32 %v2274_v48, %v2274_v48 }
 0x1f9   : > { %v3422_v17 = vpop.f32.mrf.mxu1  ;;  %v2277_v28 = vadd.f32 %v3503_v2, %v2116_v14  ;;  %v2559_v39 = vadd.f32 %v2558_v27, %v2528_v32  ;;  %v2490_v26 = vadd.f32 %v2489_v52, %v2261_v13  ;;  %v2530_v15 = vmul.f32 %v2266_v35, %v2266_v35  ;;  %v4755_v32 = vld [vmem:[#allocation10_spill] sm:$0xff] }
 0x1fa   : > { %v2268_v43 = vpop.f32.mrf.mxu0  ;;  %v2124_v10 = vadd.f32 %v3421_v22, %v4754_v24 }
 0x1fb   : > { %v3423_v18 = vpop.f32.mrf.mxu1  ;;  %v2940_v59 = vpack.c.bf16 %v2277_v28, %v2274_v48  ;;  %v2269_v58 = vadd.f32 %v2268_v43, %v2108_v29  ;;  %v2491_v4 = vadd.f32 %v2490_v26, %v2266_v35  ;;  %v2560_v21 = vadd.f32 %v2559_v39, %v2529_v0  ;;  %v4756_v26 = vld [vmem:[#allocation11_spill] sm:$0xff] }
 0x1fc   : > { %v3424_v49 = vadd.f32 %v3423_v18, %v3422_v17  ;;  %v3506_v45 = vpop.f32.mrf.mxu0  ;;  %v2533_v5 = vmul.f32 %v2277_v28, %v2277_v28 }
 0x1fd   : > { %v3425_v31 = vpop.f32.mrf.mxu1  ;;  %2987 = vst [vmem:[%s4630_s24 + $0x58] sm:$0xff] %v2940_v59   ;;  %v2935_v51 = vpack.c.bf16 %v2269_v58, %v2266_v35  ;;  %v2531_v41 = vmul.f32 %v2269_v58, %v2269_v58  ;;  %v2561_v47 = vadd.f32 %v2560_v21, %v2530_v15  ;;  %v2492_v56 = vadd.f32 %v2491_v4, %v2269_v58 }
 0x1fe   : > { %v2281_v30 = vpop.f32.mrf.mxu0  ;;  %v2129_v13 = vadd.f32 %v3424_v49, %v4752_v19 }
 0x1ff   : > { %v3426_v3 = vpop.f32.mrf.mxu1  ;;  %2986 = vst [vmem:[%s4630_s24 + $0x50] sm:$0xff] %v2935_v51   ;;  %v2493_v7 = vadd.f32 %v2492_v56, %v2274_v48  ;;  %v2562_v12 = vadd.f32 %v2561_v47, %v2531_v41  ;;  %v2282_v44 = vadd.f32 %v2281_v30, %v2121_v34  ;;  %v4758_v34 = vld [vmem:[#allocation13_spill] sm:$0xff] }
 0x200   : > { %v3427_v9 = vadd.f32 %v3426_v3, %v3425_v31  ;;  %v3507_v11 = vpop.f32.mrf.mxu0  ;;  %v2290_v62 = vadd.f32 %v3506_v45, %v2129_v13  ;;  %v4757_v3 = vld [vmem:[#allocation12_spill] sm:$0xff] }
 0x201   : > { %v3428_v57 = vpop.f32.mrf.mxu1  ;;  %v2563_v36 = vadd.f32 %v2562_v12, %v2532_v25  ;;  %v2494_v23 = vadd.f32 %v2493_v7, %v2277_v28  ;;  %v2534_v16 = vmul.f32 %v2282_v44, %v2282_v44 }
 0x202   : > { %v2132_v46 = vadd.f32 %v3427_v9, %v4753_v1  ;;  %v2284_v8 = vpop.f32.mrf.mxu0  ;;  %v2536_v28 = vmul.f32 %v2290_v62, %v2290_v62 }
 0x203   : > { %v3429_v6 = vpop.f32.mrf.mxu1  ;;  %v2285_v61 = vadd.f32 %v2284_v8, %v2124_v10  ;;  %v2495_v50 = vadd.f32 %v2494_v23, %v2282_v44  ;;  %v2564_v54 = vadd.f32 %v2563_v36, %v2533_v5 }
 0x204   : > { %v3430_v53 = vadd.f32 %v3429_v6, %v3428_v57  ;;  %v2293_v42 = vadd.f32 %v3507_v11, %v2132_v46  ;;  %v3510_v40 = vpop.f32.mrf.mxu0 }
 0x205   : > { %v3431_v33 = vpop.f32.mrf.mxu1  ;;  %v2945_v18 = vpack.c.bf16 %v2285_v61, %v2282_v44  ;;  %v2535_v63 = vmul.f32 %v2285_v61, %v2285_v61  ;;  %v2565_v27 = vadd.f32 %v2564_v54, %v2534_v16  ;;  %v2496_v35 = vadd.f32 %v2495_v50, %v2285_v61 }
 0x206   : > { %v2950_v20 = vpack.c.bf16 %v2293_v42, %v2290_v62  ;;  %v2137_v52 = vadd.f32 %v3430_v53, %v4755_v32  ;;  %v2297_v2 = vpop.f32.mrf.mxu0  ;;  %v2537_v49 = vmul.f32 %v2293_v42, %v2293_v42 }
 0x207   : > { %v3432_v17 = vpop.f32.mrf.mxu1  ;;  %2988 = vst [vmem:[%s4630_s24 + $0x60] sm:$0xff] %v2945_v18   ;;  %v2497_v60 = vadd.f32 %v2496_v35, %v2290_v62  ;;  %v2566_v29 = vadd.f32 %v2565_v27, %v2535_v63 }
 0x208   : > { %2989 = vst [vmem:[%s4630_s24 + $0x68] sm:$0xff] %v2950_v20   ;;  %v3433_v37 = vadd.f32 %v3432_v17, %v3431_v33  ;;  %v2298_v31 = vadd.f32 %v2297_v2, %v2137_v52  ;;  %v3511_v0 = vpop.f32.mrf.mxu0 }
 0x209   : > { %v3434_v14 = vpop.f32.mrf.mxu1  ;;  %v2567_v59 = vadd.f32 %v2566_v29, %v2536_v28  ;;  %v2498_v4 = vadd.f32 %v2497_v60, %v2293_v42 }
 0x20a   : > { %v2140_v43 = vadd.f32 %v3433_v37, %v4756_v26  ;;  %v2300_v15 = vpop.f32.mrf.mxu0  ;;  %v2538_v21 = vmul.f32 %v2298_v31, %v2298_v31 }
 0x20b   : > { %v3435_v48 = vpop.f32.mrf.mxu1  ;;  %v2499_v51 = vadd.f32 %v2498_v4, %v2298_v31  ;;  %v2568_v41 = vadd.f32 %v2567_v59, %v2537_v49 }
 0x20c   : > { %v3436_v38 = vadd.f32 %v3435_v48, %v3434_v14  ;;  %v2301_v45 = vadd.f32 %v2300_v15, %v2140_v43 }
 0x20d   : > { %v3437_v39 = vpop.f32.mrf.mxu1  ;;  %v2569_v55 = vadd.f32 %v2568_v41, %v2538_v21 }
 0x20e   : > { %v2145_v58 = vadd.f32 %v3436_v38, %v4757_v3  ;;  %v2955_v47 = vpack.c.bf16 %v2301_v45, %v2298_v31  ;;  %v2539_v56 = vmul.f32 %v2301_v45, %v2301_v45  ;;  %v2500_v19 = vadd.f32 %v2499_v51, %v2301_v45 }
 0x20f   : > { %v3438_v9 = vpop.f32.mrf.mxu1 }
 0x210   : > { %v2306_v22 = vadd.f32 %v3510_v40, %v2145_v58  ;;  %v3439_v57 = vadd.f32 %v3438_v9, %v3437_v39  ;;  %2990 = vst [vmem:[%s4630_s24 + $0x70] sm:$0xff] %v2955_v47   ;;  %v2570_v46 = vadd.f32 %v2569_v55, %v2539_v56 }
 0x212   : > { %v2148_v30 = vadd.f32 %v3439_v57, %v4758_v34  ;;  %v2540_v13 = vmul.f32 %v2306_v22, %v2306_v22  ;;  %v2501_v1 = vadd.f32 %v2500_v19, %v2306_v22 }
 0x214   : > { %v2309_v6 = vadd.f32 %v3511_v0, %v2148_v30  ;;  %v2571_v44 = vadd.f32 %v2570_v46, %v2540_v13 }
 0x216   : > { %v2960_v25 = vpack.c.bf16 %v2309_v6, %v2306_v22  ;;  %v2541_v7 = vmul.f32 %v2309_v6, %v2309_v6  ;;  %v2502_v12 = vadd.f32 %v2501_v1, %v2309_v6 }
 0x218   : > { %2991 = vst [vmem:[%s4630_s24 + $0x78] sm:$0xff] %v2960_v25   ;;  %v2503_v11 = vrot.slane %v2502_v12, 4  ;;  %v2572_v62 = vadd.f32 %v2571_v44, %v2541_v7 }
 0x21a   : > { %v2504_v53 = vadd.f32 %v2503_v11, %v2502_v12  ;;  %v2573_v33 = vrot.slane %v2572_v62, 4 }
 0x21c   : > { %v2505_v42 = vrot.slane %v2504_v53, 2  ;;  %v2574_v24 = vadd.f32 %v2573_v33, %v2572_v62 }
 0x21e   : > { %v2506_v10 = vadd.f32 %v2505_v42, %v2504_v53  ;;  %v2575_v5 = vrot.slane %v2574_v24, 2 }
 0x220   : > { %v2507_v36 = vrot.slane %v2506_v10, 1  ;;  %v2576_v23 = vadd.f32 %v2575_v5, %v2574_v24 }
 0x222   : > { %v2508_v8 = vadd.f32 %v2507_v36, %v2506_v10  ;;  %v2577_v20 = vrot.slane %v2576_v23, 1 }
 0x224   : > { %2509 = vst [vmem:[%s235_s27] sm:$0x1] %v2508_v8  ;;  %v2578_v17 = vadd.f32 %v2577_v20, %v2576_v23 }
 0x226   : > { %2579 = vst [vmem:[%s235_s27 + $0x1] sm:$0x1] %v2578_v17 }
 0x227 PF: > { %s16_s18 = sadd.s32 1, %s3616_s18  }
 0x228   : > { %p13_p4 = scmp.ge.s32.totalorder %s16_s18, 4  }
 0x22a   :  { %15 = sbr.rel (!%p13_p4) target bundleno = 1 (0x1), region = 80 }

// kernel: _lambda_.3
= control target key start
LH: loop header
LB: loop body
LE: loop exit
PB: predicated region body
PF: predicated region fallthrough
CT: control target
= control target key end

     0   :  { %s4322_s21 = smov 0   ;;  %s5131_s0 = inlined_call_operand.vmem [shape: f32[2,16,16,4], index: 0, kind: input, shape index: {}]   ;;  %s5132_s1 = inlined_call_operand.vmem [shape: bf16[1152,128], index: 1, kind: input, shape index: {}]   ;;  %s5133_s2 = inlined_call_operand.vmem [shape: bf16[128,128], index: 2, kind: input, shape index: {}]   ;;  %s5134_s3 = inlined_call_operand.vmem [shape: bf16[2,16,16,128], index: 3, kind: output, shape index: {0}]   ;;  %s5135_s4 = inlined_call_operand.vmem [shape: f32[2,2,128], index: 4, kind: output, shape index: {1}]   ;;  %s5136_s5 = inlined_call_operand.vmem [shape: bf16[2,16,16,128], index: 5, kind: output, shape index: {2}]   ;;  %s5137_s6 = inlined_call_operand.vmem [shape: f32[2,2,128], index: 6, kind: output, shape index: {3}]  }
   0x1 LB: > { %s3179_s22 = sadd.s32 4294967295, %s4283_s21   ;;  %p3183_p0 = scmp.ge.s32.totalorder %s4283_s21, 1  ;;  %s4283_s21 = sphi %s4322_s21, %s17_s21  }
   0x2   : > { %p219_p1 = scmp.lt.s32.totalorder %s4283_s21, 3 }
   0x4   : > { %p220_p2 = pnand %p3183_p0, %p219_p1 }
   0x5   : > { %p262_p3 = scmp.lt.s32.totalorder (!%p220_p2), %s3179_s22, 1 }
   0x6   : > { %223 = sbr.rel (%p220_p2) target bundleno = 583 (0x247), region = 32 }
   0xb   : > { %v4196_v0 = vld [vmem:[%s5132_s1 + $0x78] sm:$0xff]   ;;  %v4285_v2 = vmov 0.0   ;;  %v4200_v5 = vld [vmem:[%s5132_s1 + $0x70] sm:$0xff]   ;;  %v4204_v9 = vld [vmem:[%s5132_s1 + $0x68] sm:$0xff]   ;;  %s5139_s22 = smov (!%p262_p3, %s3179_s22), 1  ;;  %vm373_vm0 = vcmask 31744  }
   0xc   : > { %v4197_v1 = vld [vmem:[%s5132_s1 + $0xf8] sm:$0xff]   ;;  %286 = vst [vmem:[#allocation2] sm:$0xff] %v4285_v2  ;;  %287 = vst [vmem:[#allocation2 + $0x8] sm:$0xff] %v4285_v2  ;;  %3595 = vmatprep.subr.bf16.mxu0 %v4196_v0  ;;  %v4201_v6 = vld [vmem:[%s5132_s1 + $0xf0] sm:$0xff]   ;;  %s3338_s9 = sshll.u32 %s5139_s22, 8  ;;  %v4286_v40 = vmov 0.0|0.0  }
   0xd   : > { %288 = vst [vmem:[#allocation2 + $0x10] sm:$0x3] %v4285_v2  ;;  %289 = vst [vmem:[#allocation2 + $0x18] sm:$0xff] %v4285_v2  ;;  %v4198_v3 = vld [vmem:[%s5132_s1 + $0x38] sm:$0xff]   ;;  %3707 = vmatprep.subr.bf16.mxu1 %v4197_v1  ;;  %v4202_v7 = vld [vmem:[%s5132_s1 + $0x30] sm:$0xff]   ;;  %s4430_s18 = scalar_lea.vmem %s5131_s0, %s3338_s9  ;;  %s3339_s11 = sshll.u32 %s5139_s22, 7 }
   0xe   : > { %290 = vst [vmem:[#allocation2 + $0x20] sm:$0xff] %v4285_v2  ;;  %291 = vst [vmem:[#allocation2 + $0x28] sm:$0x3] %v4285_v2  ;;  %v4199_v4 = vld [vmem:[%s5132_s1 + $0xb8] sm:$0xff]   ;;  %3596 = vmatpush3.bf16.msra.mxu0 %v4198_v3  ;;  %v4203_v8 = vld [vmem:[%s5132_s1 + $0xb0] sm:$0xff]   ;;  %s5035_s14 = scalar_lea.vmem %s5134_s3, %s3339_s11  ;;  %s5048_s17 = scalar_lea.vmem %s5136_s5, %s3339_s11 }
   0xf   : > { %292 = vst [vmem:[#allocation2 + $0x30] sm:$0xff] %v4285_v2  ;;  %293 = vst [vmem:[#allocation2 + $0x38] sm:$0xff] %v4285_v2  ;;  %3708 = vmatpush3.bf16.msra.mxu1 %v4199_v4  ;;  %3597 = vmatprep.subr.bf16.mxu0 %v4200_v5  ;;  %v4205_v10 = vld [vmem:[%s5132_s1 + $0xe8] sm:$0xff]   ;;  %v4208_v13 = vld [vmem:[%s5132_s1 + $0x60] sm:$0xff]   ;;  %s3188_s19 = sshll.u32 %s5139_s22, 1 }
  0x10   : > { %294 = vst [vmem:[#allocation2 + $0x40] sm:$0x3] %v4285_v2  ;;  %295 = vst [vmem:[#allocation2 + $0x48] sm:$0xff] %v4285_v2  ;;  %3709 = vmatprep.subr.bf16.mxu1 %v4201_v6  ;;  %v4206_v11 = vld [vmem:[%s5132_s1 + $0x28] sm:$0xff]   ;;  %v4209_v14 = vld [vmem:[%s5132_s1 + $0xe0] sm:$0xff]   ;;  %s275_s24 = scalar_lea.vmem %s5135_s4, %s3188_s19  ;;  %s284_s27 = scalar_lea.vmem %s5137_s6, %s3188_s19 }
  0x11   : > { %296 = vst [vmem:[#allocation2 + $0x50] sm:$0xff] %v4285_v2  ;;  %297 = vst [vmem:[#allocation2 + $0x58] sm:$0x3] %v4285_v2  ;;  %v4207_v12 = vld [vmem:[%s5132_s1 + $0xa8] sm:$0xff]   ;;  %v4210_v15 = vld [vmem:[%s5132_s1 + $0x20] sm:$0xff]  }
  0x12   : > { %298 = vst [vmem:[#allocation2 + $0x60] sm:$0xff] %v4285_v2  ;;  %299 = vst [vmem:[#allocation2 + $0x68] sm:$0xff] %v4285_v2  ;;  %3598 = vmatpush3.bf16.msra.mxu0 %v4202_v7  ;;  %v4211_v16 = vld [vmem:[%s5132_s1 + $0xa0] sm:$0xff]   ;;  %v4212_v17 = vld [vmem:[%s5132_s1 + $0x58] sm:$0xff]  }
  0x13   : > { %300 = vst [vmem:[#allocation2 + $0x70] sm:$0x3] %v4285_v2  ;;  %301 = vst [vmem:[#allocation2 + $0x78] sm:$0xff] %v4285_v2  ;;  %3710 = vmatpush3.bf16.msra.mxu1 %v4203_v8  ;;  %3599 = vmatprep.subr.bf16.mxu0 %v4204_v9  ;;  %v4213_v18 = vld [vmem:[%s5132_s1 + $0xd8] sm:$0xff]   ;;  %v4216_v21 = vld [vmem:[%s5132_s1 + $0x50] sm:$0xff]  }
  0x14   : > { %302 = vst [vmem:[#allocation2 + $0x80] sm:$0xff] %v4285_v2  ;;  %303 = vst [vmem:[#allocation2 + $0x88] sm:$0x3] %v4285_v2  ;;  %3711 = vmatprep.subr.bf16.mxu1 %v4205_v10  ;;  %v4214_v19 = vld [vmem:[%s5132_s1 + $0x18] sm:$0xff]   ;;  %v4217_v22 = vld [vmem:[%s5132_s1 + $0xd0] sm:$0xff]  }
  0x15   : > { %304 = vst [vmem:[#allocation2 + $0x90] sm:$0xff] %v4285_v2  ;;  %305 = vst [vmem:[#allocation2 + $0x98] sm:$0xff] %v4285_v2  ;;  %v4215_v20 = vld [vmem:[%s5132_s1 + $0x98] sm:$0xff]   ;;  %v4218_v23 = vld [vmem:[%s5132_s1 + $0x10] sm:$0xff]  }
  0x16   : > { %306 = vst [vmem:[#allocation2 + $0xa0] sm:$0x3] %v4285_v2  ;;  %307 = vst [vmem:[#allocation2 + $0xa8] sm:$0xff] %v4285_v2  ;;  %3600 = vmatpush3.bf16.msra.mxu0 %v4206_v11  ;;  %v4219_v24 = vld [vmem:[%s5132_s1 + $0x90] sm:$0xff]   ;;  %v4220_v25 = vld [vmem:[%s5132_s1 + $0x48] sm:$0xff]  }
  0x17   : > { %308 = vst [vmem:[#allocation2 + $0xb0] sm:$0xff] %v4285_v2  ;;  %309 = vst [vmem:[#allocation2 + $0xb8] sm:$0x3] %v4285_v2  ;;  %3712 = vmatpush3.bf16.msra.mxu1 %v4207_v12  ;;  %3601 = vmatprep.subr.bf16.mxu0 %v4208_v13  ;;  %v4221_v26 = vld [vmem:[%s5132_s1 + $0xc8] sm:$0xff]   ;;  %v4224_v29 = vld [vmem:[%s5132_s1 + $0x40] sm:$0xff]  }
  0x18   : > { %310 = vst [vmem:[#allocation2 + $0xc0] sm:$0xff] %v4285_v2  ;;  %311 = vst [vmem:[#allocation2 + $0xc8] sm:$0xff] %v4285_v2  ;;  %3713 = vmatprep.subr.bf16.mxu1 %v4209_v14  ;;  %v4222_v27 = vld [vmem:[%s5132_s1 + $0x8] sm:$0xff]   ;;  %v4225_v30 = vld [vmem:[%s5132_s1 + $0xc0] sm:$0xff]  }
  0x19   : > { %312 = vst [vmem:[#allocation2 + $0xd0] sm:$0x3] %v4285_v2  ;;  %313 = vst [vmem:[#allocation2 + $0xd8] sm:$0xff] %v4285_v2  ;;  %v4223_v28 = vld [vmem:[%s5132_s1 + $0x88] sm:$0xff]   ;;  %v4226_v31 = vld [vmem:[%s5132_s1] sm:$0xff]  }
  0x1a   : > { %314 = vst [vmem:[#allocation2 + $0xe0] sm:$0xff] %v4285_v2  ;;  %315 = vst [vmem:[#allocation2 + $0xe8] sm:$0x3] %v4285_v2  ;;  %3602 = vmatpush3.bf16.msra.mxu0 %v4210_v15  ;;  %v4227_v32 = vld [vmem:[%s5132_s1 + $0x80] sm:$0xff]   ;;  %v455_v34 = vld [vmem:[#allocation2 + $0x9] sm:$0xff] }
  0x1b   : > { %316 = vst [vmem:[#allocation2 + $0xf0] sm:$0xff] %v4285_v2  ;;  %317 = vst [vmem:[#allocation2 + $0xf8] sm:$0xff] %v4285_v2  ;;  %3714 = vmatpush3.bf16.msra.mxu1 %v4211_v16  ;;  %3603 = vmatprep.subr.bf16.mxu0 %v4212_v17  ;;  %v454_v33 = vld [vmem:[#allocation2 + $0x1] sm:$0xff]  ;;  %v4228_v38 = vld [vmem:[%s5132_s1 + $0x178] sm:$0xff]  }
  0x1c   : > { %318 = vst [vmem:[#allocation2 + $0x100] sm:$0x3] %v4285_v2  ;;  %319 = vst [vmem:[#allocation2 + $0x108] sm:$0xff] %v4285_v2  ;;  %3715 = vmatprep.subr.bf16.mxu1 %v4213_v18  ;;  %v340_v35 = vld [vmem:[%s4430_s18] sm:$0xff]  ;;  %v486_v36 = vpack.c.bf16 %v455_v34, %v454_v33  ;;  %v341_v37 = vld [vmem:[%s4430_s18 + $0x8] sm:$0xff] }
  0x1d   : > { %320 = vst [vmem:[#allocation2 + $0x110] sm:$0xff] %v4285_v2  ;;  %321 = vst [vmem:[#allocation2 + $0x118] sm:$0x3] %v4285_v2  ;;  %v4229_v39 = vld [vmem:[%s5132_s1 + $0x138] sm:$0xff]   ;;  %v502_v41 = vld [vmem:[#allocation2 + $0x2] sm:$0xff] }
  0x1e   : > { %322 = vst [vmem:[#allocation2 + $0x120] sm:$0xff] %v4285_v2  ;;  %323 = vst [vmem:[#allocation2 + $0x128] sm:$0xff] %v4285_v2  ;;  %3604 = vmatpush3.bf16.msra.mxu0 %v4214_v19  ;;  %1447 = vmatprep.mubr.bf16.mxu0 %v486_v36  ;;  %v4230_v42 = vld [vmem:[%s5132_s1 + $0x1f8] sm:$0xff]   ;;  %v503_v43 = vld [vmem:[#allocation2 + $0xa] sm:$0xff] }
  0x1f   : > { %324 = vst [vmem:[#allocation2 + $0x130] sm:$0x3] %v4285_v2  ;;  %325 = vst [vmem:[#allocation2 + $0x138] sm:$0xff] %v4285_v2  ;;  %3716 = vmatpush3.bf16.msra.mxu1 %v4215_v20  ;;  %3605 = vmatprep.subr.bf16.mxu0 %v4216_v21  ;;  %v342_v44 = vld [vmem:[%s4430_s18 + $0x10] sm:$0xff]  ;;  %v343_v45 = vld [vmem:[%s4430_s18 + $0x18] sm:$0xff]  ;;  %v534_v52 = vpack.c.bf16 %v503_v43, %v502_v41 }
  0x20   : > { %326 = vst [vmem:[#allocation2 + $0x140] sm:$0xff] %v4285_v2  ;;  %327 = vst [vmem:[#allocation2 + $0x148] sm:$0x3] %v4285_v2  ;;  %3717 = vmatprep.subr.bf16.mxu1 %v4217_v22  ;;  %v344_v46 = vld [vmem:[%s4430_s18 + $0x20] sm:$0xff]  ;;  %v345_v47 = vld [vmem:[%s4430_s18 + $0x28] sm:$0xff] }
  0x21   : > { %328 = vst [vmem:[#allocation2 + $0x150] sm:$0xff] %v4285_v2  ;;  %329 = vst [vmem:[#allocation2 + $0x158] sm:$0xff] %v4285_v2  ;;  %v4232_v50 = vld [vmem:[%s5132_s1 + $0x170] sm:$0xff]   ;;  %v4231_v55 = vld [vmem:[%s5132_s1 + $0x1b8] sm:$0xff]  }
  0x22   : > { %330 = vst [vmem:[#allocation2 + $0x160] sm:$0x3] %v4285_v2  ;;  %331 = vst [vmem:[#allocation2 + $0x168] sm:$0xff] %v4285_v2  ;;  %3606 = vmatpush3.bf16.msra.mxu0 %v4218_v23  ;;  %v4233_v57 = vld [vmem:[%s5132_s1 + $0x130] sm:$0xff]   ;;  %v347_v63 = vld [vmem:[%s4430_s18 + $0x38] sm:$0xff] }
  0x23   : > { %332 = vst [vmem:[#allocation2 + $0x170] sm:$0xff] %v4285_v2  ;;  %333 = vst [vmem:[#allocation2 + $0x178] sm:$0x3] %v4285_v2  ;;  %3718 = vmatpush3.bf16.msra.mxu1 %v4219_v24  ;;  %3607 = vmatprep.subr.bf16.mxu0 %v4220_v25  ;;  %v4234_v60 = vld [vmem:[%s5132_s1 + $0x1f0] sm:$0xff]   ;;  %v348_v13 = vld [vmem:[%s4430_s18 + $0x40] sm:$0xff] }
  0x24   : > { %334 = vst [vmem:[#allocation2 + $0x180] sm:$0xff] %v4285_v2  ;;  %335 = vst [vmem:[#allocation2 + $0x188] sm:$0xff] %v4285_v2  ;;  %3719 = vmatprep.subr.bf16.mxu1 %v4221_v26  ;;  %v4235_v61 = vld [vmem:[%s5132_s1 + $0x1b0] sm:$0xff]   ;;  %v349_v14 = vld [vmem:[%s4430_s18 + $0x48] sm:$0xff] }
  0x25   : > { %336 = vst [vmem:[#allocation2 + $0x190] sm:$0x3] %v4285_v2  ;;  %337 = vst [vmem:[#allocation2 + $0x198] sm:$0xff] %v4285_v2  ;;  %v346_v62 = vld [vmem:[%s4430_s18 + $0x30] sm:$0xff]  ;;  %v4236_v15 = vld [vmem:[%s5132_s1 + $0x168] sm:$0xff]  }
  0x26   : > { %338 = vst [vmem:[#allocation2 + $0x1a0] sm:$0xff] %v4285_v2  ;;  %339 = vst [vmem:[#allocation2 + $0x1a8] sm:$0x3] %v4285_v2  ;;  %3608 = vmatpush3.bf16.msra.mxu0 %v4222_v27  ;;  %v4237_v16 = vld [vmem:[%s5132_s1 + $0x128] sm:$0xff]   ;;  %v350_v25 = vld [vmem:[%s4430_s18 + $0x50] sm:$0xff] }
  0x27   : > { %3720 = vmatpush3.bf16.msra.mxu1 %v4223_v28  ;;  %3609 = vmatprep.subr.bf16.mxu0 %v4224_v29  ;;  %374 = vst.msk [vmem:[#allocation2 + $0x19] sm:$0xff] %vm373_vm0, %v340_v35  ;;  %375 = vst.msk [vmem:[#allocation2 + $0x21] sm:$0xff] %vm373_vm0, %v341_v37  ;;  %v4238_v23 = vld [vmem:[%s5132_s1 + $0x1e8] sm:$0xff]   ;;  %v351_v27 = vld [vmem:[%s4430_s18 + $0x58] sm:$0xff] }
  0x28   : > { %3721 = vmatprep.subr.bf16.mxu1 %v4225_v30  ;;  %376 = vst.msk [vmem:[#allocation2 + $0x31] sm:$0xff] %vm373_vm0, %v342_v44  ;;  %377 = vst.msk [vmem:[#allocation2 + $0x39] sm:$0xff] %vm373_vm0, %v343_v45  ;;  %v4239_v24 = vld [vmem:[%s5132_s1 + $0x1a8] sm:$0xff]   ;;  %v352_v28 = vld [vmem:[%s4430_s18 + $0x60] sm:$0xff] }
  0x29   : > { %378 = vst.msk [vmem:[#allocation2 + $0x49] sm:$0xff] %vm373_vm0, %v344_v46  ;;  %379 = vst.msk [vmem:[#allocation2 + $0x51] sm:$0xff] %vm373_vm0, %v345_v47  ;;  %v353_v29 = vld [vmem:[%s4430_s18 + $0x68] sm:$0xff]  ;;  %v4240_v34 = vld [vmem:[%s5132_s1 + $0x160] sm:$0xff]  }
  0x2a   : > { %3610 = vmatpush3.bf16.msra.mxu0 %v4226_v31  ;;  %380 = vst.msk [vmem:[#allocation2 + $0x61] sm:$0xff] %vm373_vm0, %v346_v62  ;;  %381 = vst.msk [vmem:[#allocation2 + $0x69] sm:$0xff] %vm373_vm0, %v347_v63  ;;  %v4243_v41 = vld [vmem:[%s5132_s1 + $0x1a0] sm:$0xff]   ;;  %v355_v46 = vld [vmem:[%s4430_s18 + $0x78] sm:$0xff] }
  0x2b   : > { %3722 = vmatpush3.bf16.msra.mxu1 %v4227_v32  ;;  %3819 = vmatprep.subr.bf16.mxu0 %v4228_v38  ;;  %382 = vst.msk [vmem:[#allocation2 + $0x79] sm:$0xff] %vm373_vm0, %v348_v13  ;;  %383 = vst.msk [vmem:[#allocation2 + $0x81] sm:$0xff] %vm373_vm0, %v349_v14  ;;  %v358_v63 = vld [vmem:[%s4430_s18 + $0x90] sm:$0xff]  ;;  %v361_v13 = vld [vmem:[%s4430_s18 + $0xa8] sm:$0xff] }
  0x2c   : > { %3931 = vmatprep.subr.bf16.mxu1 %v4230_v42  ;;  %384 = vst.msk [vmem:[#allocation2 + $0x91] sm:$0xff] %vm373_vm0, %v350_v25  ;;  %385 = vst.msk [vmem:[#allocation2 + $0x99] sm:$0xff] %vm373_vm0, %v351_v27  ;;  %v354_v42 = vld [vmem:[%s4430_s18 + $0x70] sm:$0xff] }
  0x2d   : > { %1448 = vmatmul.mubr.bf16.vlgmr.msra.gmra.mxu0 %v4286_v40  ;;  %386 = vst.msk [vmem:[#allocation2 + $0xa9] sm:$0xff] %vm373_vm0, %v352_v28  ;;  %387 = vst.msk [vmem:[#allocation2 + $0xb1] sm:$0xff] %vm373_vm0, %v353_v29  ;;  %v4242_v40 = vld [vmem:[%s5132_s1 + $0x1e0] sm:$0xff]   ;;  %v4248_v14 = vld [vmem:[%s5132_s1 + $0x150] sm:$0xff]  }
  0x2e   : > { %3820 = vmatpush3.bf16.msra.mxu0 %v4229_v39  ;;  %v550_v48 = vld [vmem:[#allocation2 + $0x18] sm:$0xff]  ;;  %v551_v51 = vld [vmem:[#allocation2 + $0x20] sm:$0xff]  ;;  %388 = vst.msk [vmem:[#allocation2 + $0xc1] sm:$0xff] %vm373_vm0, %v354_v42  ;;  %389 = vst.msk [vmem:[#allocation2 + $0xc9] sm:$0xff] %vm373_vm0, %v355_v46 }
  0x2f   : > { %v456_v49 = vld [vmem:[#allocation2 + $0x19] sm:$0xff]  ;;  %v457_v53 = vld [vmem:[#allocation2 + $0x21] sm:$0xff]  ;;  %v582_v54 = vpack.c.bf16 %v551_v51, %v550_v48  ;;  %3821 = vmatprep.subr.bf16.mxu0 %v4232_v50  ;;  %v552_v0 = vld [vmem:[#allocation2 + $0x30] sm:$0xff]  ;;  %392 = vst.msk [vmem:[#allocation2 + $0xf1] sm:$0xff] %vm373_vm0, %v358_v63 }
  0x30   : > { %v4465_v56 = vpack.c.bf16 %v457_v53, %v456_v49  ;;  %v504_v58 = vld [vmem:[#allocation2 + $0x1a] sm:$0xff]  ;;  %v505_v59 = vld [vmem:[#allocation2 + $0x22] sm:$0xff]  ;;  %v458_v2 = vld [vmem:[#allocation2 + $0x31] sm:$0xff]  ;;  %395 = vst.msk [vmem:[#allocation2 + $0x111] sm:$0xff] %vm373_vm0, %v361_v13 }
  0x31   : > { %1608 = vmatprep.mubr.bf16.mxu1 %v582_v54  ;;  %v553_v1 = vld [vmem:[#allocation2 + $0x38] sm:$0xff]  ;;  %v554_v5 = vld [vmem:[#allocation2 + $0x48] sm:$0xff]  ;;  %v555_v6 = vld [vmem:[#allocation2 + $0x50] sm:$0xff]  ;;  %v4486_v9 = vpack.c.bf16 %v505_v59, %v504_v58 }
  0x32   : > { %1455 = vmatprep.mubr.bf16.mxu0 %v4465_v56  ;;  %1609 = vmatmul.mubr.bf16.vlgmr.msra.gmra.mxu1 %v534_v52  ;;  %v4481_v3 = vpack.c.bf16 %v553_v1, %v552_v0  ;;  %v459_v4 = vld [vmem:[#allocation2 + $0x39] sm:$0xff]  ;;  %v460_v8 = vld [vmem:[#allocation2 + $0x49] sm:$0xff]  ;;  %v461_v10 = vld [vmem:[#allocation2 + $0x51] sm:$0xff]  ;;  %v4489_v11 = vpack.c.bf16 %v555_v6, %v554_v5 }
  0x33   : > { %3932 = vmatpush3.bf16.msra.mxu1 %v4231_v55  ;;  %3822 = vmatpush3.bf16.msra.mxu0 %v4233_v57  ;;  %v4483_v7 = vpack.c.bf16 %v459_v4, %v458_v2  ;;  %v4491_v12 = vpack.c.bf16 %v461_v10, %v460_v8  ;;  %v506_v17 = vld [vmem:[#allocation2 + $0x32] sm:$0xff]  ;;  %v507_v18 = vld [vmem:[#allocation2 + $0x3a] sm:$0xff]  ;;  %v557_v20 = vld [vmem:[#allocation2 + $0x68] sm:$0xff] }
  0x34   : > { %3933 = vmatprep.subr.bf16.mxu1 %v4234_v60  ;;  %1616 = vmatprep.mubr.bf16.mxu1 %v4481_v3  ;;  %v556_v19 = vld [vmem:[#allocation2 + $0x60] sm:$0xff]  ;;  %v463_v22 = vld [vmem:[#allocation2 + $0x69] sm:$0xff]  ;;  %v4514_v26 = vpack.c.bf16 %v507_v18, %v506_v17  ;;  %v509_v33 = vld [vmem:[#allocation2 + $0x52] sm:$0xff] }
  0x35   : > { %1456 = vmatmul.mubr.bf16.gmra.mxu0 %v582_v54  ;;  %v462_v21 = vld [vmem:[#allocation2 + $0x61] sm:$0xff]  ;;  %3823 = vmatprep.subr.bf16.mxu0 %v4236_v15  ;;  %v4520_v30 = vpack.c.bf16 %v557_v20, %v556_v19  ;;  %v508_v32 = vld [vmem:[#allocation2 + $0x4a] sm:$0xff]  ;;  %v558_v35 = vld [vmem:[#allocation2 + $0x78] sm:$0xff] }
  0x36   : > { %1463 = vmatprep.mubr.bf16.mxu0 %v4483_v7  ;;  %v4522_v31 = vpack.c.bf16 %v463_v22, %v462_v21  ;;  %v559_v36 = vld [vmem:[#allocation2 + $0x80] sm:$0xff]  ;;  %v4544_v43 = vpack.c.bf16 %v509_v33, %v508_v32  ;;  %v511_v48 = vld [vmem:[#allocation2 + $0x6a] sm:$0xff]  ;;  %v561_v51 = vld [vmem:[#allocation2 + $0x98] sm:$0xff] }
  0x37   : > { %3934 = vmatpush3.bf16.msra.mxu1 %v4235_v61  ;;  %3824 = vmatpush3.bf16.msra.mxu0 %v4237_v16  ;;  %v464_v37 = vld [vmem:[#allocation2 + $0x79] sm:$0xff]  ;;  %v465_v38 = vld [vmem:[#allocation2 + $0x81] sm:$0xff]  ;;  %v4547_v44 = vpack.c.bf16 %v559_v36, %v558_v35  ;;  %v560_v50 = vld [vmem:[#allocation2 + $0x90] sm:$0xff] }
  0x38   : > { %3935 = vmatprep.subr.bf16.mxu1 %v4238_v23  ;;  %v4241_v39 = vld [vmem:[%s5132_s1 + $0x120] sm:$0xff]   ;;  %3825 = vmatprep.subr.bf16.mxu0 %v4240_v34  ;;  %v4549_v45 = vpack.c.bf16 %v465_v38, %v464_v37  ;;  %v466_v52 = vld [vmem:[#allocation2 + $0x91] sm:$0xff]  ;;  %v357_v54 = vld [vmem:[%s4430_s18 + $0x88] sm:$0xff]  ;;  %v4575_v61 = vpack.c.bf16 %v561_v51, %v560_v50 }
  0x39   : > { %v510_v47 = vld [vmem:[#allocation2 + $0x62] sm:$0xff]  ;;  %v467_v53 = vld [vmem:[#allocation2 + $0x99] sm:$0xff]  ;;  %391 = vst.msk [vmem:[#allocation2 + $0xe1] sm:$0xff] %vm373_vm0, %v357_v54  ;;  %v563_v6 = vld [vmem:[#allocation2 + $0xb0] sm:$0xff] }
  0x3a   : > { %1617 = vmatmul.mubr.bf16.gmra.mxu1 %v4486_v9  ;;  %v356_v49 = vld [vmem:[%s4430_s18 + $0x80] sm:$0xff]  ;;  %v4244_v55 = vld [vmem:[%s5132_s1 + $0x158] sm:$0xff]   ;;  %v4570_v59 = vpack.c.bf16 %v511_v48, %v510_v47  ;;  %v4577_v62 = vpack.c.bf16 %v467_v53, %v466_v52  ;;  %v562_v5 = vld [vmem:[#allocation2 + $0xa8] sm:$0xff] }
  0x3b   : > { %1624 = vmatprep.mubr.bf16.mxu1 %v4489_v11  ;;  %3936 = vmatpush3.bf16.msra.mxu1 %v4239_v24  ;;  %390 = vst.msk [vmem:[#allocation2 + $0xd9] sm:$0xff] %vm373_vm0, %v356_v49  ;;  %v4245_v57 = vld [vmem:[%s5132_s1 + $0x118] sm:$0xff]   ;;  %v360_v1 = vld [vmem:[%s4430_s18 + $0xa0] sm:$0xff]  ;;  %v468_v8 = vld [vmem:[#allocation2 + $0xa9] sm:$0xff]  ;;  %v4602_v18 = vpack.c.bf16 %v563_v6, %v562_v5 }
  0x3c   : > { %3826 = vmatpush3.bf16.msra.mxu0 %v4241_v39  ;;  %3937 = vmatprep.subr.bf16.mxu1 %v4242_v40  ;;  %v4246_v58 = vld [vmem:[%s5132_s1 + $0x1d8] sm:$0xff]   ;;  %394 = vst.msk [vmem:[#allocation2 + $0x109] sm:$0xff] %vm373_vm0, %v360_v1  ;;  %v513_v4 = vld [vmem:[#allocation2 + $0x82] sm:$0xff]  ;;  %v4249_v15 = vld [vmem:[%s5132_s1 + $0x110] sm:$0xff]  }
  0x3d   : > { %1464 = vmatmul.mubr.bf16.gmra.mxu0 %v4481_v3  ;;  %3827 = vmatprep.subr.bf16.mxu0 %v4244_v55  ;;  %v4247_v60 = vld [vmem:[%s5132_s1 + $0x198] sm:$0xff]   ;;  %v4250_v17 = vld [vmem:[%s5132_s1 + $0x1d0] sm:$0xff]   ;;  %v564_v25 = vld [vmem:[#allocation2 + $0xc0] sm:$0xff] }
  0x3e   : > { %1471 = vmatprep.mubr.bf16.mxu0 %v4491_v12  ;;  %v359_v0 = vld [vmem:[%s4430_s18 + $0x98] sm:$0xff]  ;;  %v4251_v21 = vld [vmem:[%s5132_s1 + $0x190] sm:$0xff]   ;;  %v565_v27 = vld [vmem:[#allocation2 + $0xc8] sm:$0xff] }
  0x3f   : > { %3938 = vmatpush3.bf16.msra.mxu1 %v4243_v41  ;;  %393 = vst.msk [vmem:[#allocation2 + $0xf9] sm:$0xff] %vm373_vm0, %v359_v0  ;;  %v512_v2 = vld [vmem:[#allocation2 + $0x7a] sm:$0xff]  ;;  %v469_v10 = vld [vmem:[#allocation2 + $0xb1] sm:$0xff]  ;;  %v471_v29 = vld [vmem:[#allocation2 + $0xc9] sm:$0xff]  ;;  %v4629_v37 = vpack.c.bf16 %v565_v27, %v564_v25 }
  0x40   : > { %3828 = vmatpush3.bf16.msra.mxu0 %v4245_v57  ;;  %3939 = vmatprep.subr.bf16.mxu1 %v4246_v58  ;;  %v4597_v16 = vpack.c.bf16 %v513_v4, %v512_v2  ;;  %v4604_v19 = vpack.c.bf16 %v469_v10, %v468_v8  ;;  %v514_v20 = vld [vmem:[#allocation2 + $0x92] sm:$0xff]  ;;  %v515_v22 = vld [vmem:[#allocation2 + $0x9a] sm:$0xff]  ;;  %v365_v33 = vld [vmem:[%s4430_s18 + $0xc8] sm:$0xff] }
  0x41   : > { %3829 = vmatprep.subr.bf16.mxu0 %v4248_v14  ;;  %v362_v23 = vld [vmem:[%s4430_s18 + $0xb0] sm:$0xff]  ;;  %v363_v24 = vld [vmem:[%s4430_s18 + $0xb8] sm:$0xff]  ;;  %v470_v28 = vld [vmem:[#allocation2 + $0xc1] sm:$0xff]  ;;  %399 = vst.msk [vmem:[#allocation2 + $0x141] sm:$0xff] %vm373_vm0, %v365_v33  ;;  %v4624_v35 = vpack.c.bf16 %v515_v22, %v514_v20 }
  0x42   : > { %1625 = vmatmul.mubr.bf16.gmra.mxu1 %v4514_v26  ;;  %396 = vst.msk [vmem:[#allocation2 + $0x121] sm:$0xff] %vm373_vm0, %v362_v23  ;;  %397 = vst.msk [vmem:[#allocation2 + $0x129] sm:$0xff] %vm373_vm0, %v363_v24  ;;  %v364_v32 = vld [vmem:[%s4430_s18 + $0xc0] sm:$0xff]  ;;  %v4252_v34 = vld [vmem:[%s5132_s1 + $0x148] sm:$0xff]   ;;  %v4631_v38 = vpack.c.bf16 %v471_v29, %v470_v28 }
  0x43   : > { %1632 = vmatprep.mubr.bf16.mxu1 %v4520_v30  ;;  %3940 = vmatpush3.bf16.msra.mxu1 %v4247_v60  ;;  %398 = vst.msk [vmem:[#allocation2 + $0x139] sm:$0xff] %vm373_vm0, %v364_v32  ;;  %v4253_v36 = vld [vmem:[%s5132_s1 + $0x108] sm:$0xff]   ;;  %v366_v41 = vld [vmem:[%s4430_s18 + $0xd0] sm:$0xff]  ;;  %v367_v42 = vld [vmem:[%s4430_s18 + $0xd8] sm:$0xff] }
  0x44   : > { %3830 = vmatpush3.bf16.msra.mxu0 %v4249_v15  ;;  %3941 = vmatprep.subr.bf16.mxu1 %v4250_v17  ;;  %v4254_v39 = vld [vmem:[%s5132_s1 + $0x1c8] sm:$0xff]   ;;  %v368_v46 = vld [vmem:[%s4430_s18 + $0xe0] sm:$0xff]  ;;  %400 = vst.msk [vmem:[#allocation2 + $0x151] sm:$0xff] %vm373_vm0, %v366_v41  ;;  %401 = vst.msk [vmem:[#allocation2 + $0x159] sm:$0xff] %vm373_vm0, %v367_v42 }
  0x45   : > { %1472 = vmatmul.mubr.bf16.gmra.mxu0 %v4489_v11  ;;  %3831 = vmatprep.subr.bf16.mxu0 %v4252_v34  ;;  %v4255_v40 = vld [vmem:[%s5132_s1 + $0x188] sm:$0xff]   ;;  %402 = vst.msk [vmem:[#allocation2 + $0x169] sm:$0xff] %vm373_vm0, %v368_v46  ;;  %v517_v48 = vld [vmem:[#allocation2 + $0xb2] sm:$0xff]  ;;  %v567_v50 = vld [vmem:[#allocation2 + $0xe0] sm:$0xff] }
  0x46   : > { %1479 = vmatprep.mubr.bf16.mxu0 %v4522_v31  ;;  %v516_v47 = vld [vmem:[#allocation2 + $0xaa] sm:$0xff]  ;;  %v566_v49 = vld [vmem:[#allocation2 + $0xd8] sm:$0xff]  ;;  %v473_v52 = vld [vmem:[#allocation2 + $0xe1] sm:$0xff] }
  0x47   : > { %3942 = vmatpush3.bf16.msra.mxu1 %v4251_v21  ;;  %v472_v51 = vld [vmem:[#allocation2 + $0xd9] sm:$0xff]  ;;  %v4649_v53 = vpack.c.bf16 %v517_v48, %v516_v47  ;;  %v369_v54 = vld [vmem:[%s4430_s18 + $0xe8] sm:$0xff]  ;;  %v4652_v55 = vpack.c.bf16 %v567_v50, %v566_v49  ;;  %v568_v1 = vld [vmem:[#allocation2 + $0xf0] sm:$0xff] }
  0x48   : > { %3832 = vmatpush3.bf16.msra.mxu0 %v4253_v36  ;;  %3943 = vmatprep.subr.bf16.mxu1 %v4254_v39  ;;  %v4654_v57 = vpack.c.bf16 %v473_v52, %v472_v51  ;;  %403 = vst.msk [vmem:[#allocation2 + $0x171] sm:$0xff] %vm373_vm0, %v369_v54  ;;  %v4256_v58 = vld [vmem:[%s5132_s1 + $0x140] sm:$0xff]   ;;  %v519_v0 = vld [vmem:[#allocation2 + $0xca] sm:$0xff]  ;;  %v569_v2 = vld [vmem:[#allocation2 + $0xf8] sm:$0xff] }
  0x49   : > { %v4257_v60 = vld [vmem:[%s5132_s1 + $0x100] sm:$0xff]   ;;  %3833 = vmatprep.subr.bf16.mxu0 %v4256_v58  ;;  %v474_v4 = vld [vmem:[#allocation2 + $0xf1] sm:$0xff]  ;;  %v4679_v15 = vpack.c.bf16 %v569_v2, %v568_v1  ;;  %v570_v24 = vld [vmem:[#allocation2 + $0x108] sm:$0xff] }
  0x4a   : > { %1633 = vmatmul.mubr.bf16.gmra.mxu1 %v4544_v43  ;;  %v518_v63 = vld [vmem:[#allocation2 + $0xc2] sm:$0xff]  ;;  %v475_v6 = vld [vmem:[#allocation2 + $0xf9] sm:$0xff]  ;;  %v370_v10 = vld [vmem:[%s4430_s18 + $0xf0] sm:$0xff] }
  0x4b   : > { %1640 = vmatprep.mubr.bf16.mxu1 %v4547_v44  ;;  %3944 = vmatpush3.bf16.msra.mxu1 %v4255_v40  ;;  %v4258_v5 = vld [vmem:[%s5132_s1 + $0x1c0] sm:$0xff]   ;;  %v371_v13 = vld [vmem:[%s4430_s18 + $0xf8] sm:$0xff]  ;;  %v4675_v14 = vpack.c.bf16 %v519_v0, %v518_v63  ;;  %404 = vst.msk [vmem:[#allocation2 + $0x181] sm:$0xff] %vm373_vm0, %v370_v10  ;;  %v4681_v17 = vpack.c.bf16 %v475_v6, %v474_v4  ;;  %v476_v25 = vld [vmem:[#allocation2 + $0x109] sm:$0xff] }
  0x4c   : > { %3834 = vmatpush3.bf16.msra.mxu0 %v4257_v60  ;;  %v4259_v8 = vld [vmem:[%s5132_s1 + $0x180] sm:$0xff]   ;;  %3945 = vmatprep.subr.bf16.mxu1 %v4258_v5  ;;  %405 = vst.msk [vmem:[#allocation2 + $0x189] sm:$0xff] %vm373_vm0, %v371_v13  ;;  %v4686_v20 = vld [vmem:[%s5132_s1 + $0x238] sm:$0xff]   ;;  %v571_v27 = vld [vmem:[#allocation2 + $0x110] sm:$0xff] }
  0x4d   : > { %1480 = vmatmul.mubr.bf16.gmra.mxu0 %v4520_v30  ;;  %v4691_v21 = vld [vmem:[%s5133_s2 + $0x38] sm:$0xff]   ;;  %v521_v23 = vld [vmem:[#allocation2 + $0xe2] sm:$0xff]  ;;  %4091 = vmatprep.subr.bf16.mxu0 %v4686_v20  ;;  %v4701_v32 = vpack.c.bf16 %v571_v27, %v570_v24  ;;  %v524_v49 = vld [vmem:[#allocation2 + $0x10a] sm:$0xff] }
  0x4e   : > { %1487 = vmatprep.mubr.bf16.mxu0 %v4549_v45  ;;  %v520_v22 = vld [vmem:[#allocation2 + $0xda] sm:$0xff]  ;;  %v477_v28 = vld [vmem:[#allocation2 + $0x111] sm:$0xff]  ;;  %v573_v40 = vld [vmem:[#allocation2 + $0x128] sm:$0xff] }
  0x4f   : > { %3946 = vmatpush3.bf16.msra.mxu1 %v4259_v8  ;;  %v4699_v29 = vpack.c.bf16 %v521_v23, %v520_v22  ;;  %v4703_v33 = vpack.c.bf16 %v477_v28, %v476_v25  ;;  %v522_v34 = vld [vmem:[#allocation2 + $0xf2] sm:$0xff]  ;;  %v523_v36 = vld [vmem:[#allocation2 + $0xfa] sm:$0xff]  ;;  %v479_v42 = vld [vmem:[#allocation2 + $0x129] sm:$0xff] }
  0x50   : > { %4139 = vmatprep.subr.bf16.mxu1 %v4691_v21  ;;  %v572_v39 = vld [vmem:[#allocation2 + $0x120] sm:$0xff]  ;;  %v4709_v46 = vpack.c.bf16 %v523_v36, %v522_v34  ;;  %v525_v50 = vld [vmem:[#allocation2 + $0x112] sm:$0xff]  ;;  %v527_v2 = vld [vmem:[#allocation2 + $0x12a] sm:$0xff] }
  0x51   : > { %v478_v41 = vld [vmem:[#allocation2 + $0x121] sm:$0xff]  ;;  %v4711_v47 = vpack.c.bf16 %v573_v40, %v572_v39  ;;  %v574_v51 = vld [vmem:[#allocation2 + $0x138] sm:$0xff]  ;;  %v4719_v60 = vpack.c.bf16 %v525_v50, %v524_v49  ;;  %v576_v4 = vld [vmem:[#allocation2 + $0x150] sm:$0xff] }
  0x52   : > { %1641 = vmatmul.mubr.bf16.gmra.mxu1 %v4570_v59  ;;  %v4713_v48 = vpack.c.bf16 %v479_v42, %v478_v41  ;;  %v575_v52 = vld [vmem:[#allocation2 + $0x140] sm:$0xff]  ;;  %v577_v5 = vld [vmem:[#allocation2 + $0x158] sm:$0xff]  ;;  %v578_v25 = vld [vmem:[#allocation2 + $0x168] sm:$0xff] }
  0x53   : > { %1648 = vmatprep.mubr.bf16.mxu1 %v4575_v61  ;;  %v480_v54 = vld [vmem:[#allocation2 + $0x139] sm:$0xff]  ;;  %v481_v58 = vld [vmem:[#allocation2 + $0x141] sm:$0xff]  ;;  %v4721_v63 = vpack.c.bf16 %v575_v52, %v574_v51  ;;  %v482_v6 = vld [vmem:[#allocation2 + $0x151] sm:$0xff]  ;;  %v4731_v13 = vpack.c.bf16 %v577_v5, %v576_v4 }
  0x54   : > { %v4723_v0 = vpack.c.bf16 %v481_v58, %v480_v54  ;;  %v526_v1 = vld [vmem:[#allocation2 + $0x122] sm:$0xff]  ;;  %v483_v8 = vld [vmem:[#allocation2 + $0x159] sm:$0xff]  ;;  %v579_v27 = vld [vmem:[#allocation2 + $0x170] sm:$0xff] }
  0x55   : > { %1488 = vmatmul.mubr.bf16.gmra.mxu0 %v4547_v44  ;;  %v4729_v10 = vpack.c.bf16 %v527_v2, %v526_v1  ;;  %v4733_v22 = vpack.c.bf16 %v483_v8, %v482_v6  ;;  %v528_v23 = vld [vmem:[#allocation2 + $0x13a] sm:$0xff]  ;;  %v529_v24 = vld [vmem:[#allocation2 + $0x142] sm:$0xff]  ;;  %v485_v34 = vld [vmem:[#allocation2 + $0x171] sm:$0xff]  ;;  %v4741_v39 = vpack.c.bf16 %v579_v27, %v578_v25 }
  0x56   : > { %1495 = vmatprep.mubr.bf16.mxu0 %v4577_v62  ;;  %v484_v28 = vld [vmem:[#allocation2 + $0x169] sm:$0xff]  ;;  %v4739_v36 = vpack.c.bf16 %v529_v24, %v528_v23  ;;  %v530_v41 = vld [vmem:[#allocation2 + $0x152] sm:$0xff]  ;;  %v531_v42 = vld [vmem:[#allocation2 + $0x15a] sm:$0xff] }
  0x57   : > { %v4743_v40 = vpack.c.bf16 %v485_v34, %v484_v28  ;;  %v580_v49 = vld [vmem:[#allocation2 + $0x180] sm:$0xff]  ;;  %v581_v50 = vld [vmem:[#allocation2 + $0x188] sm:$0xff]  ;;  %v4749_v51 = vpack.c.bf16 %v531_v42, %v530_v41  ;;  %v533_v58 = vld [vmem:[#allocation2 + $0x172] sm:$0xff] }
  0x58   : > { %v4751_v52 = vpack.c.bf16 %v581_v50, %v580_v49  ;;  %v532_v54 = vld [vmem:[#allocation2 + $0x16a] sm:$0xff] }
  0x59   : > { %v4757_v1 = vpack.c.bf16 %v533_v58, %v532_v54  ;;  %v4262_v2 = vld [vmem:[%s5132_s1 + $0x230] sm:$0xff]  }
  0x5a   : > { %1649 = vmatmul.mubr.bf16.gmra.mxu1 %v4597_v16  ;;  %v4263_v4 = vld [vmem:[%s5133_s2 + $0x30] sm:$0xff]  }
  0x5b   : > { %1656 = vmatprep.mubr.bf16.mxu1 %v4602_v18 }
  0x5d   : > { %1496 = vmatmul.mubr.bf16.gmra.mxu0 %v4575_v61 }
  0x5e   : > { %1503 = vmatprep.mubr.bf16.mxu0 %v4604_v19 }
  0x62   : > { %1657 = vmatmul.mubr.bf16.gmra.mxu1 %v4624_v35 }
  0x63   : > { %1664 = vmatprep.mubr.bf16.mxu1 %v4629_v37 }
  0x65   : > { %1504 = vmatmul.mubr.bf16.gmra.mxu0 %v4602_v18 }
  0x66   : > { %1511 = vmatprep.mubr.bf16.mxu0 %v4631_v38 }
  0x6a   : > { %1665 = vmatmul.mubr.bf16.gmra.mxu1 %v4649_v53 }
  0x6b   : > { %1672 = vmatprep.mubr.bf16.mxu1 %v4652_v55 }
  0x6d   : > { %1512 = vmatmul.mubr.bf16.gmra.mxu0 %v4629_v37 }
  0x6e   : > { %1519 = vmatprep.mubr.bf16.mxu0 %v4654_v57 }
  0x72   : > { %1673 = vmatmul.mubr.bf16.gmra.mxu1 %v4675_v14 }
  0x73   : > { %1680 = vmatprep.mubr.bf16.mxu1 %v4679_v15 }
  0x75   : > { %1520 = vmatmul.mubr.bf16.gmra.mxu0 %v4652_v55 }
  0x76   : > { %1527 = vmatprep.mubr.bf16.mxu0 %v4681_v17 }
  0x7a   : > { %1681 = vmatmul.mubr.bf16.gmra.mxu1 %v4699_v29 }
  0x7b   : > { %1688 = vmatprep.mubr.bf16.mxu1 %v4701_v32 }
  0x7d   : > { %1528 = vmatmul.mubr.bf16.gmra.mxu0 %v4679_v15 }
  0x7e   : > { %1535 = vmatprep.mubr.bf16.mxu0 %v4703_v33 }
  0x82   : > { %1689 = vmatmul.mubr.bf16.gmra.mxu1 %v4709_v46 }
  0x83   : > { %1696 = vmatprep.mubr.bf16.mxu1 %v4711_v47 }
  0x85   : > { %1536 = vmatmul.mubr.bf16.gmra.mxu0 %v4701_v32 }
  0x86   : > { %1543 = vmatprep.mubr.bf16.mxu0 %v4713_v48 }
  0x8a   : > { %1697 = vmatmul.mubr.bf16.gmra.mxu1 %v4719_v60 }
  0x8b   : > { %1704 = vmatprep.mubr.bf16.mxu1 %v4721_v63 }
  0x8d   : > { %1544 = vmatmul.mubr.bf16.gmra.mxu0 %v4711_v47 }
  0x8e   : > { %1551 = vmatprep.mubr.bf16.mxu0 %v4723_v0 }
  0x92   : > { %1705 = vmatmul.mubr.bf16.gmra.mxu1 %v4729_v10 }
  0x93   : > { %1712 = vmatprep.mubr.bf16.mxu1 %v4731_v13 }
  0x95   : > { %1552 = vmatmul.mubr.bf16.gmra.mxu0 %v4721_v63 }
  0x96   : > { %1559 = vmatprep.mubr.bf16.mxu0 %v4733_v22 }
  0x9a   : > { %1713 = vmatmul.mubr.bf16.gmra.mxu1 %v4739_v36 }
  0x9b   : > { %1720 = vmatprep.mubr.bf16.mxu1 %v4741_v39 }
  0x9d   : > { %1560 = vmatmul.mubr.bf16.gmra.mxu0 %v4731_v13 }
  0x9e   : > { %1567 = vmatprep.mubr.bf16.mxu0 %v4743_v40 }
  0xa2   : > { %1721 = vmatmul.mubr.bf16.gmra.mxu1 %v4749_v51 }
  0xa3   : > { %1728 = vmatprep.mubr.bf16.mxu1 %v4751_v52 }
  0xa5   : > { %1568 = vmatmul.mubr.bf16.gmra.mxu0 %v4741_v39 }
  0xa6   : > { %1769 = vmatprep.mubr.bf16.mxu0 %v4486_v9  ;;  %v4264_v9 = vld [vmem:[%s5132_s1 + $0x228] sm:$0xff]  }
  0xaa   : > { %1729 = vmatmul.mubr.bf16.gmra.mxu1 %v4757_v1 }
  0xab   : > { %1930 = vmatprep.mubr.bf16.mxu1 %v4483_v7 }
  0xad   : > { %1770 = vmatmul.mubr.bf16.vlgmr.msra.gmra.mxu0 %v4465_v56  ;;  %v4266_v56 = vld [vmem:[%s5132_s1 + $0x220] sm:$0xff]  }
  0xae   : > { %4092 = vmatpush3.bf16.msra.mxu0 %v4686_v20  ;;  %1777 = vmatprep.mubr.bf16.mxu0 %v4514_v26  ;;  %v4265_v26 = vld [vmem:[%s5133_s2 + $0x28] sm:$0xff]   ;;  %v4269_v20 = vld [vmem:[%s5133_s2 + $0x18] sm:$0xff]  }
  0xaf   : > { %4093 = vmatprep.subr.bf16.mxu0 %v4262_v2 }
  0xb2   : > { %4094 = vmatpush3.bf16.msra.mxu0 %v4262_v2  ;;  %1931 = vmatmul.mubr.bf16.vlgmr.msra.gmra.mxu1 %v4481_v3  ;;  %v4268_v3 = vld [vmem:[%s5132_s1 + $0x218] sm:$0xff]  }
  0xb3   : > { %4095 = vmatprep.subr.bf16.mxu0 %v4264_v9  ;;  %4140 = vmatpush3.bf16.msra.mxu1 %v4691_v21  ;;  %v4273_v21 = vld [vmem:[%s5133_s2 + $0x8] sm:$0xff]  }
  0xb4   : > { %1938 = vmatprep.mubr.bf16.mxu1 %v4491_v12  ;;  %4141 = vmatprep.subr.bf16.mxu1 %v4263_v4 }
  0xb5   : > { %1778 = vmatmul.mubr.bf16.gmra.mxu0 %v4483_v7  ;;  %v4267_v7 = vld [vmem:[%s5133_s2 + $0x20] sm:$0xff]  }
  0xb6   : > { %1785 = vmatprep.mubr.bf16.mxu0 %v4544_v43  ;;  %4096 = vmatpush3.bf16.msra.mxu0 %v4264_v9  ;;  %v4270_v43 = vld [vmem:[%s5132_s1 + $0x210] sm:$0xff]  }
  0xb7   : > { %4097 = vmatprep.subr.bf16.mxu0 %v4266_v56  ;;  %4142 = vmatpush3.bf16.msra.mxu1 %v4263_v4 }
  0xb8   : > { %4143 = vmatprep.subr.bf16.mxu1 %v4265_v26 }
  0xba   : > { %4098 = vmatpush3.bf16.msra.mxu0 %v4266_v56  ;;  %1939 = vmatmul.mubr.bf16.gmra.mxu1 %v4489_v11  ;;  %v4272_v11 = vld [vmem:[%s5132_s1 + $0x208] sm:$0xff]  }
  0xbb   : > { %1946 = vmatprep.mubr.bf16.mxu1 %v4522_v31  ;;  %4144 = vmatpush3.bf16.msra.mxu1 %v4265_v26 }
  0xbc   : > { %4099 = vmatprep.subr.bf16.mxu0 %v4268_v3  ;;  %4145 = vmatprep.subr.bf16.mxu1 %v4267_v7 }
  0xbd   : > { %1786 = vmatmul.mubr.bf16.gmra.mxu0 %v4491_v12  ;;  %v4271_v12 = vld [vmem:[%s5133_s2 + $0x10] sm:$0xff]  }
  0xbe   : > { %1793 = vmatprep.mubr.bf16.mxu0 %v4570_v59  ;;  %4100 = vmatpush3.bf16.msra.mxu0 %v4268_v3  ;;  %v4274_v59 = vld [vmem:[%s5132_s1 + $0x200] sm:$0xff]  }
  0xbf   : > { %4101 = vmatprep.subr.bf16.mxu0 %v4270_v43  ;;  %4146 = vmatpush3.bf16.msra.mxu1 %v4267_v7 }
  0xc0   : > { %4147 = vmatprep.subr.bf16.mxu1 %v4269_v20 }
  0xc2   : > { %4102 = vmatpush3.bf16.msra.mxu0 %v4270_v43  ;;  %1947 = vmatmul.mubr.bf16.gmra.mxu1 %v4520_v30  ;;  %v4275_v30 = vld [vmem:[%s5133_s2] sm:$0xff]  }
  0xc3   : > { %1954 = vmatprep.mubr.bf16.mxu1 %v4549_v45  ;;  %4148 = vmatpush3.bf16.msra.mxu1 %v4269_v20 }
  0xc4   : > { %4103 = vmatprep.subr.bf16.mxu0 %v4272_v11  ;;  %4149 = vmatprep.subr.bf16.mxu1 %v4271_v12 }
  0xc5   : > { %1794 = vmatmul.mubr.bf16.gmra.mxu0 %v4522_v31 }
  0xc6   : > { %1801 = vmatprep.mubr.bf16.mxu0 %v4597_v16  ;;  %4104 = vmatpush3.bf16.msra.mxu0 %v4272_v11 }
  0xc7   : > { %4105 = vmatprep.subr.bf16.mxu0 %v4274_v59  ;;  %4150 = vmatpush3.bf16.msra.mxu1 %v4271_v12 }
  0xc8   : > { %4151 = vmatprep.subr.bf16.mxu1 %v4273_v21 }
  0xca   : > { %4106 = vmatpush3.bf16.msra.mxu0 %v4274_v59  ;;  %1955 = vmatmul.mubr.bf16.gmra.mxu1 %v4547_v44 }
  0xcb   : > { %1962 = vmatprep.mubr.bf16.mxu1 %v4577_v62  ;;  %4152 = vmatpush3.bf16.msra.mxu1 %v4273_v21 }
  0xcc   : > { %4153 = vmatprep.subr.bf16.mxu1 %v4275_v30 }
  0xcd   : > { %1802 = vmatmul.mubr.bf16.gmra.mxu0 %v4549_v45 }
  0xce   : > { %1809 = vmatprep.mubr.bf16.mxu0 %v4624_v35 }
  0xcf   : > { %4154 = vmatpush3.bf16.msra.mxu1 %v4275_v30 }
  0xd2   : > { %1963 = vmatmul.mubr.bf16.gmra.mxu1 %v4575_v61 }
  0xd3   : > { %1970 = vmatprep.mubr.bf16.mxu1 %v4604_v19 }
  0xd5   : > { %1810 = vmatmul.mubr.bf16.gmra.mxu0 %v4577_v62 }
  0xd6   : > { %1817 = vmatprep.mubr.bf16.mxu0 %v4649_v53 }
  0xda   : > { %1971 = vmatmul.mubr.bf16.gmra.mxu1 %v4602_v18 }
  0xdb   : > { %1978 = vmatprep.mubr.bf16.mxu1 %v4631_v38 }
  0xdd   : > { %1818 = vmatmul.mubr.bf16.gmra.mxu0 %v4604_v19 }
  0xde   : > { %1825 = vmatprep.mubr.bf16.mxu0 %v4675_v14 }
  0xe2   : > { %1979 = vmatmul.mubr.bf16.gmra.mxu1 %v4629_v37 }
  0xe3   : > { %1986 = vmatprep.mubr.bf16.mxu1 %v4654_v57 }
  0xe5   : > { %1826 = vmatmul.mubr.bf16.gmra.mxu0 %v4631_v38 }
  0xe6   : > { %1833 = vmatprep.mubr.bf16.mxu0 %v4699_v29 }
  0xea   : > { %1987 = vmatmul.mubr.bf16.gmra.mxu1 %v4652_v55 }
  0xeb   : > { %1994 = vmatprep.mubr.bf16.mxu1 %v4681_v17 }
  0xed   : > { %v3611_v31 = vpop.f32.mrf.mxu0  ;;  %1834 = vmatmul.mubr.bf16.gmra.mxu0 %v4654_v57 }
  0xee   : > { %1841 = vmatprep.mubr.bf16.mxu0 %v4709_v46 }
  0xef   : > { %v3612_v44 = vpop.f32.mrf.mxu0 }
  0xf0   : > { %v3613_v45 = vadd.f32 %v3612_v44, %v3611_v31 }
  0xf1   : > { %v3614_v61 = vpop.f32.mrf.mxu0 }
  0xf2   : > { %v3723_v18 = vpop.f32.mrf.mxu1  ;;  %1995 = vmatmul.mubr.bf16.gmra.mxu1 %v4679_v15 }
  0xf3   : > { %v3615_v62 = vpop.f32.mrf.mxu0  ;;  %2002 = vmatprep.mubr.bf16.mxu1 %v4703_v33 }
  0xf4   : > { %v3616_v16 = vadd.f32 %v3615_v62, %v3614_v61  ;;  %v3724_v35 = vpop.f32.mrf.mxu1 }
  0xf5   : > { %v3617_v19 = vpop.f32.mrf.mxu0  ;;  %1842 = vmatmul.mubr.bf16.gmra.mxu0 %v4681_v17  ;;  %v3725_v38 = vadd.f32 %v3724_v35, %v3723_v18 }
  0xf6   : > { %1849 = vmatprep.mubr.bf16.mxu0 %v4719_v60  ;;  %v3726_v55 = vpop.f32.mrf.mxu1 }
  0xf7   : > { %v3618_v37 = vpop.f32.mrf.mxu0  ;;  %v4843_v14 = vadd.f32 %v3725_v38, %v3613_v45  ;;  %v676_v38 = vld [vmem:[#allocation2 + $0x182] sm:$0xff] }
  0xf8   : > { %v3619_v53 = vadd.f32 %v3618_v37, %v3617_v19  ;;  %v3727_v29 = vpop.f32.mrf.mxu1  ;;  %v772_v37 = vld [vmem:[#allocation2 + $0x189] sm:$0xff] }
  0xf9   : > { %v3620_v57 = vpop.f32.mrf.mxu0  ;;  %v3728_v5 = vadd.f32 %v3727_v29, %v3726_v55 }
  0xfa   : > { %v3729_v15 = vpop.f32.mrf.mxu1  ;;  %2003 = vmatmul.mubr.bf16.gmra.mxu1 %v4701_v32 }
  0xfb   : > { %v3621_v46 = vpop.f32.mrf.mxu0  ;;  %v4847_v8 = vadd.f32 %v3728_v5, %v3616_v16  ;;  %2010 = vmatprep.mubr.bf16.mxu1 %v4713_v48 }
  0xfc   : > { %v3622_v6 = vadd.f32 %v3621_v46, %v3620_v57  ;;  %v3730_v60 = vpop.f32.mrf.mxu1 }
  0xfd   : > { %v3623_v17 = vpop.f32.mrf.mxu0  ;;  %1850 = vmatmul.mubr.bf16.gmra.mxu0 %v4703_v33  ;;  %v3731_v24 = vadd.f32 %v3730_v60, %v3729_v15 }
  0xfe   : > { %1857 = vmatprep.mubr.bf16.mxu0 %v4729_v10  ;;  %v3732_v27 = vpop.f32.mrf.mxu1 }
  0xff   : > { %v3624_v23 = vpop.f32.mrf.mxu0  ;;  %v4851_v34 = vadd.f32 %v3731_v24, %v3619_v53  ;;  %v677_v53 = vld [vmem:[#allocation2 + $0x18a] sm:$0xff] }
 0x100   : > { %v3625_v25 = vadd.f32 %v3624_v23, %v3623_v17  ;;  %v3733_v41 = vpop.f32.mrf.mxu1 }
 0x101   : > { %v3626_v28 = vpop.f32.mrf.mxu0  ;;  %v3734_v32 = vadd.f32 %v3733_v41, %v3732_v27  ;;  %v774_v41 = vld [vmem:[#allocation2 + $0x1a1] sm:$0xff] }
 0x102   : > { %v3735_v50 = vpop.f32.mrf.mxu1  ;;  %2011 = vmatmul.mubr.bf16.gmra.mxu1 %v4711_v47 }
 0x103   : > { %v3627_v42 = vpop.f32.mrf.mxu0  ;;  %v4855_v54 = vadd.f32 %v3734_v32, %v3622_v6  ;;  %2018 = vmatprep.mubr.bf16.mxu1 %v4723_v0  ;;  %v792_v32 = vld [vmem:[#allocation2 + $0x3a] sm:$0xff] }
 0x104   : > { %v3628_v49 = vadd.f32 %v3627_v42, %v3626_v28  ;;  %v3736_v10 = vpop.f32.mrf.mxu1  ;;  %v791_v42 = vld [vmem:[#allocation2 + $0x32] sm:$0xff] }
 0x105   : > { %v3629_v33 = vpop.f32.mrf.mxu0  ;;  %1858 = vmatmul.mubr.bf16.gmra.mxu0 %v4713_v48  ;;  %v3737_v2 = vadd.f32 %v3736_v10, %v3735_v50 }
 0x106   : > { %1865 = vmatprep.mubr.bf16.mxu0 %v4739_v36  ;;  %v3738_v4 = vpop.f32.mrf.mxu1 }
 0x107   : > { %v3630_v58 = vpop.f32.mrf.mxu0  ;;  %v4859_v26 = vadd.f32 %v3737_v2, %v3625_v25  ;;  %v773_v25 = vld [vmem:[#allocation2 + $0x199] sm:$0xff] }
 0x108   : > { %v3631_v9 = vadd.f32 %v3630_v58, %v3629_v33  ;;  %v3739_v3 = vpop.f32.mrf.mxu1  ;;  %v790_v58 = vpack.c.bf16 %v774_v41, %v773_v25  ;;  %v2493_v25 = vld [vmem:[#allocation2 + $0x51] sm:$0xff] }
 0x109   : > { %v3632_v56 = vpop.f32.mrf.mxu0  ;;  %v3740_v47 = vadd.f32 %v3739_v3, %v3738_v4 }
 0x10a   : > { %v3741_v20 = vpop.f32.mrf.mxu1  ;;  %2019 = vmatmul.mubr.bf16.gmra.mxu1 %v4721_v63 }
 0x10b   : > { %v3633_v7 = vpop.f32.mrf.mxu0  ;;  %v4863_v11 = vadd.f32 %v3740_v47, %v3628_v49  ;;  %2026 = vmatprep.mubr.bf16.mxu1 %v4733_v22 }
 0x10c   : > { %v3634_v43 = vadd.f32 %v3633_v7, %v3632_v56  ;;  %v3742_v36 = vpop.f32.mrf.mxu1 }
 0x10d   : > { %v3635_v48 = vpop.f32.mrf.mxu0  ;;  %1866 = vmatmul.mubr.bf16.gmra.mxu0 %v4723_v0  ;;  %v3743_v59 = vadd.f32 %v3742_v36, %v3741_v20  ;;  %v793_v20 = vld [vmem:[#allocation2 + $0x4a] sm:$0xff] }
 0x10e   : > { %1873 = vmatprep.mubr.bf16.mxu0 %v4749_v51  ;;  %v3744_v30 = vpop.f32.mrf.mxu1  ;;  %v771_v51 = vld [vmem:[#allocation2 + $0x181] sm:$0xff] }
 0x10f   : > { %v3636_v12 = vpop.f32.mrf.mxu0  ;;  %v4867_v44 = vadd.f32 %v3743_v59, %v3631_v9  ;;  %v4877_v5 = vpack.c.bf16 %v772_v37, %v771_v51  ;;  %v2489_v59 = vld [vmem:[#allocation2 + $0x21] sm:$0xff] }
 0x110   : > { %v3637_v21 = vadd.f32 %v3636_v12, %v3635_v48  ;;  %v3745_v45 = vpop.f32.mrf.mxu1  ;;  %v794_v48 = vld [vmem:[#allocation2 + $0x52] sm:$0xff] }
 0x111   : > { %v3638_v31 = vpop.f32.mrf.mxu0  ;;  %v3746_v63 = vadd.f32 %v3745_v45, %v3744_v30  ;;  %v796_v30 = vld [vmem:[#allocation2 + $0x6a] sm:$0xff] }
 0x112   : > { %v3747_v16 = vpop.f32.mrf.mxu1  ;;  %2027 = vmatmul.mubr.bf16.gmra.mxu1 %v4731_v13 }
 0x113   : > { %v3639_v61 = vpop.f32.mrf.mxu0  ;;  %v4871_v18 = vadd.f32 %v3746_v63, %v3634_v43  ;;  %2034 = vmatprep.mubr.bf16.mxu1 %v4743_v40  ;;  %v2488_v43 = vld [vmem:[#allocation2 + $0x19] sm:$0xff] }
 0x114   : > { %v3640_v62 = vadd.f32 %v3639_v61, %v3638_v31  ;;  %v3748_v19 = vpop.f32.mrf.mxu1  ;;  %v4276_v63 = vld [vmem:[#allocation2] sm:$0xff]  ;;  %v2520_v51 = vpack.c.bf16 %v2489_v59, %v2488_v43  ;;  %v802_v59 = vld [vmem:[#allocation2 + $0xb2] sm:$0xff] }
 0x115   : > { %v3641_v0 = vpop.f32.mrf.mxu0  ;;  %1874 = vmatmul.mubr.bf16.gmra.mxu0 %v4733_v22  ;;  %v3749_v55 = vadd.f32 %v3748_v19, %v3747_v16  ;;  %v4879_v22 = vpack.c.bf16 %v677_v53, %v676_v38  ;;  %v824_v16 = vpack.c.bf16 %v794_v48, %v793_v20  ;;  %v2494_v43 = vld [vmem:[#allocation2 + $0x61] sm:$0xff]  ;;  %v2495_v20 = vld [vmem:[#allocation2 + $0x69] sm:$0xff] }
 0x116   : > { %1881 = vmatprep.mubr.bf16.mxu0 %v4757_v1  ;;  %v3750_v29 = vpop.f32.mrf.mxu1 }
 0x117   : > { %v3642_v35 = vpop.f32.mrf.mxu0  ;;  %v4875_v13 = vadd.f32 %v3749_v55, %v3637_v21  ;;  %v795_v21 = vld [vmem:[#allocation2 + $0x62] sm:$0xff] }
 0x118   : > { %v3643_v57 = vadd.f32 %v3642_v35, %v3641_v0  ;;  %v3751_v6 = vpop.f32.mrf.mxu1  ;;  %v825_v19 = vpack.c.bf16 %v796_v30, %v795_v21 }
 0x119   : > { %v3644_v46 = vpop.f32.mrf.mxu0  ;;  %v3752_v17 = vadd.f32 %v3751_v6, %v3750_v29  ;;  %v2490_v29 = vld [vmem:[#allocation2 + $0x31] sm:$0xff] }
 0x11a   : > { %v3753_v60 = vpop.f32.mrf.mxu1  ;;  %2035 = vmatmul.mubr.bf16.gmra.mxu1 %v4741_v39 }
 0x11b   : > { %v3645_v15 = vpop.f32.mrf.mxu0  ;;  %v4883_v24 = vadd.f32 %v3752_v17, %v3640_v62  ;;  %2042 = vmatprep.mubr.bf16.mxu1 %v4877_v5  ;;  %v797_v17 = vld [vmem:[#allocation2 + $0x7a] sm:$0xff] }
 0x11c   : > { %v3646_v1 = vadd.f32 %v3645_v15, %v3644_v46  ;;  %v3754_v27 = vpop.f32.mrf.mxu1  ;;  %v2491_v46 = vld [vmem:[#allocation2 + $0x39] sm:$0xff]  ;;  %v2492_v15 = vld [vmem:[#allocation2 + $0x49] sm:$0xff] }
 0x11d   : > { %v3647_v23 = vpop.f32.mrf.mxu0  ;;  %1882 = vmatmul.mubr.bf16.gmra.mxu0 %v4743_v40  ;;  %v3755_v49 = vadd.f32 %v3754_v27, %v3753_v60  ;;  %v823_v40 = vpack.c.bf16 %v792_v32, %v791_v42  ;;  %v799_v27 = vld [vmem:[#allocation2 + $0x92] sm:$0xff] }
 0x11e   : > { %1889 = vmatprep.mubr.bf16.mxu0 %v4879_v22  ;;  %v3756_v33 = vpop.f32.mrf.mxu1 }
 0x11f   : > { %v3648_v28 = vpop.f32.mrf.mxu0  ;;  %v4887_v39 = vadd.f32 %v3755_v49, %v3643_v57  ;;  %v2521_v49 = vpack.c.bf16 %v2491_v46, %v2490_v29 }
 0x120   : > { %v3649_v50 = vadd.f32 %v3648_v28, %v3647_v23  ;;  %v3757_v2 = vpop.f32.mrf.mxu1  ;;  %v800_v28 = vld [vmem:[#allocation2 + $0x9a] sm:$0xff] }
 0x121   : > { %v3650_v10 = vpop.f32.mrf.mxu0  ;;  %v3758_v4 = vadd.f32 %v3757_v2, %v3756_v33 }
 0x122   : > { %v3759_v3 = vpop.f32.mrf.mxu1  ;;  %2043 = vmatmul.mubr.bf16.gmra.mxu1 %v4751_v52  ;;  %v742_v52 = vpack.c.bf16 %v4276_v63, %v4276_v63 }
 0x123   : > { %v3651_v9 = vpop.f32.mrf.mxu0  ;;  %v4891_v47 = vadd.f32 %v3758_v4, %v3646_v1  ;;  %2050 = vmatprep.mubr.bf16.mxu1 %v790_v58  ;;  %v798_v1 = vld [vmem:[#allocation2 + $0x82] sm:$0xff]  ;;  %v2522_v58 = vpack.c.bf16 %v2493_v25, %v2492_v15  ;;  %v805_v25 = vld [vmem:[#allocation2 + $0xda] sm:$0xff] }
 0x124   : > { %v3652_v56 = vadd.f32 %v3651_v9, %v3650_v10  ;;  %v3760_v36 = vpop.f32.mrf.mxu1  ;;  %v826_v33 = vpack.c.bf16 %v798_v1, %v797_v17  ;;  %v2498_v17 = vld [vmem:[#allocation2 + $0x91] sm:$0xff]  ;;  %v2499_v1 = vld [vmem:[#allocation2 + $0x99] sm:$0xff] }
 0x125   : > { %v3653_v7 = vpop.f32.mrf.mxu0  ;;  %1890 = vmatmul.mubr.bf16.gmra.mxu0 %v4877_v5  ;;  %v3761_v31 = vadd.f32 %v3760_v36, %v3759_v3  ;;  %v2496_v36 = vld [vmem:[#allocation2 + $0x79] sm:$0xff] }
 0x126   : > { %4107 = vmatprep.mubr.bf16.mxu0 %v823_v40  ;;  %v3762_v61 = vpop.f32.mrf.mxu1  ;;  %v827_v40 = vpack.c.bf16 %v800_v28, %v799_v27  ;;  %v806_v27 = vld [vmem:[#allocation2 + $0xe2] sm:$0xff] }
 0x127   : > { %v3654_v12 = vpop.f32.mrf.mxu0  ;;  %v4893_v0 = vadd.f32 %v3761_v31, %v3649_v50  ;;  %v2497_v31 = vld [vmem:[#allocation2 + $0x81] sm:$0xff] }
 0x128   : > { %v3655_v45 = vadd.f32 %v3654_v12, %v3653_v7  ;;  %v3763_v35 = vpop.f32.mrf.mxu1  ;;  %v801_v12 = vld [vmem:[#allocation2 + $0xaa] sm:$0xff] }
 0x129   : > { %v3656_v62 = vpop.f32.mrf.mxu0  ;;  %v3764_v38 = vadd.f32 %v3763_v35, %v3762_v61  ;;  %v804_v61 = vld [vmem:[#allocation2 + $0xca] sm:$0xff] }
 0x12a   : > { %v3765_v55 = vpop.f32.mrf.mxu1  ;;  %2051 = vmatmul.mubr.bf16.gmra.mxu1 %v742_v52 }
 0x12b   : > { %v3657_v37 = vpop.f32.mrf.mxu0  ;;  %v4895_v6 = vadd.f32 %v3764_v38, %v3652_v56  ;;  %4155 = vmatprep.mubr.bf16.mxu1 %v2520_v51 }
 0x12c   : > { %v3658_v53 = vadd.f32 %v3657_v37, %v3656_v62  ;;  %v3766_v60 = vpop.f32.mrf.mxu1  ;;  %v2524_v37 = vpack.c.bf16 %v2497_v31, %v2496_v36 }
 0x12d   : > { %v3659_v57 = vpop.f32.mrf.mxu0  ;;  %4108 = vmatmul.mubr.bf16.vlgmr.msra.gmra.mxu0 %v824_v16  ;;  %v3767_v41 = vadd.f32 %v3766_v60, %v3765_v55  ;;  %v2523_v16 = vpack.c.bf16 %v2495_v20, %v2494_v43 }
 0x12e   : > { %4111 = vmatprep.mubr.bf16.mxu0 %v825_v19  ;;  %v3768_v32 = vpop.f32.mrf.mxu1  ;;  %v828_v19 = vpack.c.bf16 %v802_v59, %v801_v12 }
 0x12f   : > { %v3660_v23 = vpop.f32.mrf.mxu0  ;;  %v4897_v10 = vadd.f32 %v3767_v41, %v3655_v45  ;;  %v803_v45 = vld [vmem:[#allocation2 + $0xc2] sm:$0xff] }
 0x130   : > { %v3661_v42 = vadd.f32 %v3660_v23, %v3659_v57  ;;  %v3769_v2 = vpop.f32.mrf.mxu1  ;;  %v829_v38 = vpack.c.bf16 %v804_v61, %v803_v45  ;;  %v2500_v23 = vld [vmem:[#allocation2 + $0xa9] sm:$0xff]  ;;  %v2504_v45 = vld [vmem:[#allocation2 + $0xd9] sm:$0xff] }
 0x131   : > { %v3662_v50 = vpop.f32.mrf.mxu0  ;;  %v3770_v4 = vadd.f32 %v3769_v2, %v3768_v32  ;;  %v807_v32 = vld [vmem:[#allocation2 + $0xf2] sm:$0xff]  ;;  %v809_v61 = vld [vmem:[#allocation2 + $0x10a] sm:$0xff] }
 0x132   : > { %v3771_v3 = vpop.f32.mrf.mxu1  ;;  %4156 = vmatmul.mubr.bf16.vlgmr.msra.gmra.mxu1 %v2521_v49  ;;  %v808_v49 = vld [vmem:[#allocation2 + $0xfa] sm:$0xff] }
 0x133   : > { %v3663_v9 = vpop.f32.mrf.mxu0  ;;  %v4899_v48 = vadd.f32 %v3770_v4, %v3658_v53  ;;  %4159 = vmatprep.mubr.bf16.mxu1 %v2522_v58 }
 0x134   : > { %v3664_v56 = vadd.f32 %v3663_v9, %v3662_v50  ;;  %v3772_v21 = vpop.f32.mrf.mxu1  ;;  %v830_v9 = vpack.c.bf16 %v806_v27, %v805_v25 }
 0x135   : > { %v3665_v7 = vpop.f32.mrf.mxu0  ;;  %4112 = vmatmul.mubr.bf16.gmra.mxu0 %v826_v33  ;;  %v3773_v63 = vadd.f32 %v3772_v21, %v3771_v3  ;;  %v831_v3 = vpack.c.bf16 %v808_v49, %v807_v32  ;;  %v2502_v21 = vld [vmem:[#allocation2 + $0xc1] sm:$0xff]  ;;  %v2507_v32 = vld [vmem:[#allocation2 + $0xf9] sm:$0xff] }
 0x136   : > { %4115 = vmatprep.mubr.bf16.mxu0 %v827_v40  ;;  %v3774_v62 = vpop.f32.mrf.mxu1  ;;  %v2525_v40 = vpack.c.bf16 %v2499_v1, %v2498_v17 }
 0x137   : > { %v3666_v30 = vpop.f32.mrf.mxu0  ;;  %v4901_v35 = vadd.f32 %v3773_v63, %v3661_v42  ;;  %v2501_v42 = vld [vmem:[#allocation2 + $0xb1] sm:$0xff] }
 0x138   : > { %v3667_v52 = vadd.f32 %v3666_v30, %v3665_v7  ;;  %v3775_v53 = vpop.f32.mrf.mxu1  ;;  %v2503_v30 = vld [vmem:[#allocation2 + $0xc9] sm:$0xff]  ;;  %v810_v63 = vld [vmem:[#allocation2 + $0x112] sm:$0xff] }
 0x139   : > { %v3668_v51 = vpop.f32.mrf.mxu0  ;;  %v3776_v57 = vadd.f32 %v3775_v53, %v3774_v62 }
 0x13a   : > { %v3777_v46 = vpop.f32.mrf.mxu1  ;;  %4160 = vmatmul.mubr.bf16.gmra.mxu1 %v2523_v16  ;;  %v2505_v16 = vld [vmem:[#allocation2 + $0xe1] sm:$0xff] }
 0x13b   : > { %v3669_v55 = vpop.f32.mrf.mxu0  ;;  %v4903_v60 = vadd.f32 %v3776_v57, %v3664_v56  ;;  %4163 = vmatprep.mubr.bf16.mxu1 %v2524_v37  ;;  %v2526_v56 = vpack.c.bf16 %v2501_v42, %v2500_v23  ;;  %v2506_v42 = vld [vmem:[#allocation2 + $0xf1] sm:$0xff] }
 0x13c   : > { %v3670_v29 = vadd.f32 %v3669_v55, %v3668_v51  ;;  %v3778_v28 = vpop.f32.mrf.mxu1  ;;  %v811_v51 = vld [vmem:[#allocation2 + $0x122] sm:$0xff]  ;;  %v2527_v55 = vpack.c.bf16 %v2503_v30, %v2502_v21 }
 0x13d   : > { %v3671_v15 = vpop.f32.mrf.mxu0  ;;  %4116 = vmatmul.mubr.bf16.gmra.mxu0 %v828_v19  ;;  %v3779_v50 = vadd.f32 %v3778_v28, %v3777_v46  ;;  %v812_v19 = vld [vmem:[#allocation2 + $0x12a] sm:$0xff]  ;;  %v832_v46 = vpack.c.bf16 %v810_v63, %v809_v61 }
 0x13e   : > { %4119 = vmatprep.mubr.bf16.mxu0 %v829_v38  ;;  %v3780_v58 = vpop.f32.mrf.mxu1  ;;  %v833_v17 = vpack.c.bf16 %v812_v19, %v811_v51  ;;  %v2510_v19 = vld [vmem:[#allocation2 + $0x121] sm:$0xff] }
 0x13f   : > { %v3672_v41 = vpop.f32.mrf.mxu0  ;;  %v4905_v4 = vadd.f32 %v3779_v50, %v3667_v52  ;;  %v2508_v50 = vld [vmem:[#allocation2 + $0x109] sm:$0xff] }
 0x140   : > { %v3673_v33 = vadd.f32 %v3672_v41, %v3671_v15  ;;  %v3781_v7 = vpop.f32.mrf.mxu1 }
 0x141   : > { %v3674_v2 = vpop.f32.mrf.mxu0  ;;  %v3782_v20 = vadd.f32 %v3781_v7, %v3780_v58  ;;  %v813_v58 = vld [vmem:[#allocation2 + $0x13a] sm:$0xff] }
 0x142   : > { %v3783_v12 = vpop.f32.mrf.mxu1  ;;  %4164 = vmatmul.mubr.bf16.gmra.mxu1 %v2525_v40 }
 0x143   : > { %v3675_v43 = vpop.f32.mrf.mxu0  ;;  %v4907_v31 = vadd.f32 %v3782_v20, %v3670_v29  ;;  %4167 = vmatprep.mubr.bf16.mxu1 %v2526_v56  ;;  %v2528_v29 = vpack.c.bf16 %v2505_v16, %v2504_v45  ;;  %v815_v56 = vld [vmem:[#allocation2 + $0x152] sm:$0xff] }
 0x144   : > { %v3676_v36 = vadd.f32 %v3675_v43, %v3674_v2  ;;  %v3784_v52 = vpop.f32.mrf.mxu1 }
 0x145   : > { %v3677_v59 = vpop.f32.mrf.mxu0  ;;  %4120 = vmatmul.mubr.bf16.gmra.mxu0 %v830_v9  ;;  %v3785_v37 = vadd.f32 %v3784_v52, %v3783_v12  ;;  %v2509_v9 = vld [vmem:[#allocation2 + $0x111] sm:$0xff]  ;;  %v2529_v12 = vpack.c.bf16 %v2507_v32, %v2506_v42 }
 0x146   : > { %4123 = vmatprep.mubr.bf16.mxu0 %v831_v3  ;;  %v3786_v53 = vpop.f32.mrf.mxu1  ;;  %v816_v3 = vld [vmem:[#allocation2 + $0x15a] sm:$0xff] }
 0x147   : > { %v3678_v62 = vpop.f32.mrf.mxu0  ;;  %v4909_v15 = vadd.f32 %v3785_v37, %v3673_v33  ;;  %v814_v33 = vld [vmem:[#allocation2 + $0x142] sm:$0xff]  ;;  %v835_v45 = vpack.c.bf16 %v816_v3, %v815_v56  ;;  %v2514_v56 = vld [vmem:[#allocation2 + $0x151] sm:$0xff] }
 0x148   : > { %v3679_v38 = vadd.f32 %v3678_v62, %v3677_v59  ;;  %v3787_v1 = vpop.f32.mrf.mxu1  ;;  %v834_v21 = vpack.c.bf16 %v814_v33, %v813_v58 }
 0x149   : > { %v3680_v57 = vpop.f32.mrf.mxu0  ;;  %v3788_v25 = vadd.f32 %v3787_v1, %v3786_v53  ;;  %v2511_v53 = vld [vmem:[#allocation2 + $0x129] sm:$0xff] }
 0x14a   : > { %v3789_v28 = vpop.f32.mrf.mxu1  ;;  %4168 = vmatmul.mubr.bf16.gmra.mxu1 %v2527_v55  ;;  %v817_v55 = vld [vmem:[#allocation2 + $0x16a] sm:$0xff] }
 0x14b   : > { %v3681_v23 = vpop.f32.mrf.mxu0  ;;  %v4911_v49 = vadd.f32 %v3788_v25, %v3676_v36  ;;  %4171 = vmatprep.mubr.bf16.mxu1 %v2528_v29  ;;  %v2530_v36 = vpack.c.bf16 %v2509_v9, %v2508_v50  ;;  %v2512_v29 = vld [vmem:[#allocation2 + $0x139] sm:$0xff] }
 0x14c   : > { %v3682_v27 = vadd.f32 %v3681_v23, %v3680_v57  ;;  %v3790_v40 = vpop.f32.mrf.mxu1  ;;  %v818_v57 = vld [vmem:[#allocation2 + $0x172] sm:$0xff] }
 0x14d   : > { %v3683_v41 = vpop.f32.mrf.mxu0  ;;  %4124 = vmatmul.mubr.bf16.gmra.mxu0 %v832_v46  ;;  %v3791_v7 = vadd.f32 %v3790_v40, %v3789_v28  ;;  %v2531_v28 = vpack.c.bf16 %v2511_v53, %v2510_v19  ;;  %v836_v42 = vpack.c.bf16 %v818_v57, %v817_v55 }
 0x14e   : > { %4127 = vmatprep.mubr.bf16.mxu0 %v833_v17  ;;  %v3792_v20 = vpop.f32.mrf.mxu1  ;;  %v2513_v17 = vld [vmem:[#allocation2 + $0x141] sm:$0xff] }
 0x14f   : > { %v3684_v2 = vpop.f32.mrf.mxu0  ;;  %v4913_v30 = vadd.f32 %v3791_v7, %v3679_v38  ;;  %v2532_v50 = vpack.c.bf16 %v2513_v17, %v2512_v29  ;;  %v2515_v7 = vld [vmem:[#allocation2 + $0x159] sm:$0xff] }
 0x150   : > { %v3685_v43 = vadd.f32 %v3684_v2, %v3683_v41  ;;  %v3793_v61 = vpop.f32.mrf.mxu1 }
 0x151   : > { %v3686_v59 = vpop.f32.mrf.mxu0  ;;  %v3794_v52 = vadd.f32 %v3793_v61, %v3792_v20  ;;  %v821_v20 = vld [vmem:[#allocation2 + $0x19a] sm:$0xff] }
 0x152   : > { %v3795_v16 = vpop.f32.mrf.mxu1  ;;  %4172 = vmatmul.mubr.bf16.gmra.mxu1 %v2529_v12  ;;  %v822_v12 = vld [vmem:[#allocation2 + $0x1a2] sm:$0xff] }
 0x153   : > { %v3687_v63 = vpop.f32.mrf.mxu0  ;;  %v4915_v37 = vadd.f32 %v3794_v52, %v3682_v27  ;;  %4175 = vmatprep.mubr.bf16.mxu1 %v2530_v36  ;;  %v2517_v36 = vld [vmem:[#allocation2 + $0x171] sm:$0xff]  ;;  %v2533_v52 = vpack.c.bf16 %v2515_v7, %v2514_v56 }
 0x154   : > { %v3688_v62 = vadd.f32 %v3687_v63, %v3686_v59  ;;  %v3796_v38 = vpop.f32.mrf.mxu1 }
 0x155   : > { %v3689_v51 = vpop.f32.mrf.mxu0  ;;  %4128 = vmatmul.mubr.bf16.gmra.mxu0 %v834_v21  ;;  %v3797_v1 = vadd.f32 %v3796_v38, %v3795_v16  ;;  %v2516_v21 = vld [vmem:[#allocation2 + $0x169] sm:$0xff] }
 0x156   : > { %4131 = vmatprep.mubr.bf16.mxu0 %v835_v45  ;;  %v3798_v25 = vpop.f32.mrf.mxu1 }
 0x157   : > { %v3690_v46 = vpop.f32.mrf.mxu0  ;;  %v4917_v32 = vadd.f32 %v3797_v1, %v3685_v43 }
 0x158   : > { %v3691_v23 = vadd.f32 %v3690_v46, %v3689_v51  ;;  %v3799_v27 = vpop.f32.mrf.mxu1  ;;  %v838_v51 = vpack.c.bf16 %v822_v12, %v821_v20 }
 0x159   : > { %v3692_v41 = vpop.f32.mrf.mxu0  ;;  %v3800_v33 = vadd.f32 %v3799_v27, %v3798_v25 }
 0x15a   : > { %v3801_v2 = vpop.f32.mrf.mxu1  ;;  %4176 = vmatmul.mubr.bf16.gmra.mxu1 %v2531_v28 }
 0x15b   : > { %v3693_v58 = vpop.f32.mrf.mxu0  ;;  %v4919_v3 = vadd.f32 %v3800_v33, %v3688_v62  ;;  %4179 = vmatprep.mubr.bf16.mxu1 %v2532_v50  ;;  %v2534_v62 = vpack.c.bf16 %v2517_v36, %v2516_v21 }
 0x15c   : > { %v3694_v40 = vadd.f32 %v3693_v58, %v3692_v41  ;;  %v3802_v43 = vpop.f32.mrf.mxu1 }
 0x15d   : > { %v3695_v9 = vpop.f32.mrf.mxu0  ;;  %4132 = vmatmul.mubr.bf16.gmra.mxu0 %v836_v42  ;;  %v3803_v45 = vadd.f32 %v3802_v43, %v3801_v2 }
 0x15e   : > { %4135 = vmatprep.mubr.bf16.mxu0 %v4879_v22  ;;  %v3804_v63 = vpop.f32.mrf.mxu1 }
 0x15f   : > { %v3696_v59 = vpop.f32.mrf.mxu0  ;;  %v4922_v19 = vadd.f32 %v3803_v45, %v3691_v23 }
 0x160   : > { %v3697_v61 = vadd.f32 %v3696_v59, %v3695_v9  ;;  %v3805_v53 = vpop.f32.mrf.mxu1 }
 0x161   : > { %v3698_v16 = vpop.f32.mrf.mxu0  ;;  %v3806_v57 = vadd.f32 %v3805_v53, %v3804_v63 }
 0x162   : > { %v3807_v22 = vpop.f32.mrf.mxu1  ;;  %4180 = vmatmul.mubr.bf16.gmra.mxu1 %v2533_v52 }
 0x163   : > { %v3699_v55 = vpop.f32.mrf.mxu0  ;;  %v4924_v29 = vadd.f32 %v3806_v57, %v3694_v40  ;;  %4183 = vmatprep.mubr.bf16.mxu1 %v2534_v62 }
 0x164   : > { %v3700_v38 = vadd.f32 %v3699_v55, %v3698_v16  ;;  %v3808_v17 = vpop.f32.mrf.mxu1 }
 0x165   : > { %v3701_v46 = vpop.f32.mrf.mxu0  ;;  %4136 = vmatmul.mubr.bf16.gmra.mxu0 %v838_v51  ;;  %v3809_v25 = vadd.f32 %v3808_v17, %v3807_v22 }
 0x166   : > { %v3810_v41 = vpop.f32.mrf.mxu1 }
 0x167   : > { %v3702_v1 = vpop.f32.mrf.mxu0  ;;  %v4926_v23 = vadd.f32 %v3809_v25, %v3697_v61 }
 0x168   : > { %v3703_v28 = vadd.f32 %v3702_v1, %v3701_v46  ;;  %v3811_v50 = vpop.f32.mrf.mxu1 }
 0x169   : > { %v3704_v42 = vpop.f32.mrf.mxu0  ;;  %v3812_v58 = vadd.f32 %v3811_v50, %v3810_v41 }
 0x16a   : > { %v3813_v2 = vpop.f32.mrf.mxu1  ;;  %4184 = vmatmul.mubr.bf16.gmra.mxu1 %v4877_v5 }
 0x16b   : > { %v3705_v27 = vpop.f32.mrf.mxu0  ;;  %v4929_v56 = vadd.f32 %v3812_v58, %v3700_v38 }
 0x16c   : > { %v3706_v33 = vadd.f32 %v3705_v27, %v3704_v42  ;;  %v3814_v40 = vpop.f32.mrf.mxu1 }
 0x16d   : > { %v3835_v9 = vpop.f32.mrf.mxu0  ;;  %v3815_v20 = vadd.f32 %v3814_v40, %v3813_v2 }
 0x16e   : > { %v3816_v43 = vpop.f32.mrf.mxu1 }
 0x16f   : > { %v3836_v7 = vpop.f32.mrf.mxu0  ;;  %v4931_v21 = vadd.f32 %v3815_v20, %v3703_v28 }
 0x170   : > { %v3837_v12 = vadd.f32 %v3836_v7, %v3835_v9  ;;  %v3817_v45 = vpop.f32.mrf.mxu1 }
 0x171   : > { %v3838_v59 = vpop.f32.mrf.mxu0  ;;  %v3818_v63 = vadd.f32 %v3817_v45, %v3816_v43 }
 0x172   : > { %v1772_v36 = vadd.f32 %v3837_v12, %v4843_v14  ;;  %v3947_v16 = vpop.f32.mrf.mxu1 }
 0x173   : > { %v3839_v61 = vpop.f32.mrf.mxu0  ;;  %v4934_v5 = vadd.f32 %v3818_v63, %v3706_v33 }
 0x174   : > { %v3840_v52 = vadd.f32 %v3839_v61, %v3838_v59  ;;  %v3948_v53 = vpop.f32.mrf.mxu1 }
 0x175   : > { %v3841_v51 = vpop.f32.mrf.mxu0  ;;  %v3949_v57 = vadd.f32 %v3948_v53, %v3947_v16 }
 0x176   : > { %v1775_v62 = vadd.f32 %v3840_v52, %v4847_v8  ;;  %v3950_v22 = vpop.f32.mrf.mxu1 }
 0x177   : > { %v3842_v55 = vpop.f32.mrf.mxu0  ;;  %v4938_v1 = vadd.f32 %v3949_v57, %v1772_v36 }
 0x178   : > { %v3843_v38 = vadd.f32 %v3842_v55, %v3841_v51  ;;  %v3951_v14 = vpop.f32.mrf.mxu1 }
 0x179   : > { %v3844_v46 = vpop.f32.mrf.mxu0  ;;  %v3952_v28 = vadd.f32 %v3951_v14, %v3950_v22 }
 0x17a   : > { %v1780_v17 = vadd.f32 %v3843_v38, %v4851_v34  ;;  %v3953_v42 = vpop.f32.mrf.mxu1 }
 0x17b   : > { %v3845_v25 = vpop.f32.mrf.mxu0  ;;  %v4941_v58 = vadd.f32 %v3952_v28, %v1775_v62 }
 0x17c   : > { %v3846_v41 = vadd.f32 %v3845_v25, %v3844_v46  ;;  %v3954_v8 = vpop.f32.mrf.mxu1 }
 0x17d   : > { %v3847_v50 = vpop.f32.mrf.mxu0  ;;  %v3955_v2 = vadd.f32 %v3954_v8, %v3953_v42 }
 0x17e   : > { %v1783_v27 = vadd.f32 %v3846_v41, %v4855_v54  ;;  %v3956_v40 = vpop.f32.mrf.mxu1 }
 0x17f   : > { %v3848_v33 = vpop.f32.mrf.mxu0  ;;  %v4944_v20 = vadd.f32 %v3955_v2, %v1780_v17 }
 0x180   : > { %v3849_v9 = vadd.f32 %v3848_v33, %v3847_v50  ;;  %v3957_v12 = vpop.f32.mrf.mxu1 }
 0x181   : > { %v3850_v7 = vpop.f32.mrf.mxu0  ;;  %v3958_v59 = vadd.f32 %v3957_v12, %v3956_v40 }
 0x182   : > { %v1788_v34 = vadd.f32 %v3849_v9, %v4859_v26  ;;  %v3959_v45 = vpop.f32.mrf.mxu1 }
 0x183   : > { %v3851_v43 = vpop.f32.mrf.mxu0  ;;  %v4947_v63 = vadd.f32 %v3958_v59, %v1783_v27 }
 0x184   : > { %v3852_v36 = vadd.f32 %v3851_v43, %v3850_v7  ;;  %v3960_v52 = vpop.f32.mrf.mxu1 }
 0x185   : > { %v3853_v61 = vpop.f32.mrf.mxu0  ;;  %v3961_v51 = vadd.f32 %v3960_v52, %v3959_v45 }
 0x186   : > { %v1791_v54 = vadd.f32 %v3852_v36, %v4863_v11  ;;  %v3962_v53 = vpop.f32.mrf.mxu1 }
 0x187   : > { %v3854_v16 = vpop.f32.mrf.mxu0  ;;  %v4950_v57 = vadd.f32 %v3961_v51, %v1788_v34 }
 0x188   : > { %v3855_v62 = vadd.f32 %v3854_v16, %v3853_v61  ;;  %v3963_v38 = vpop.f32.mrf.mxu1 }
 0x189   : > { %v3856_v55 = vpop.f32.mrf.mxu0  ;;  %v3964_v46 = vadd.f32 %v3963_v38, %v3962_v53 }
 0x18a   : > { %v1796_v26 = vadd.f32 %v3855_v62, %v4867_v44  ;;  %v3965_v14 = vpop.f32.mrf.mxu1 }
 0x18b   : > { %v3857_v22 = vpop.f32.mrf.mxu0  ;;  %v4953_v28 = vadd.f32 %v3964_v46, %v1791_v54 }
 0x18c   : > { %v3858_v17 = vadd.f32 %v3857_v22, %v3856_v55  ;;  %v3966_v41 = vpop.f32.mrf.mxu1 }
 0x18d   : > { %v3859_v25 = vpop.f32.mrf.mxu0  ;;  %v3967_v50 = vadd.f32 %v3966_v41, %v3965_v14 }
 0x18e   : > { %v1799_v11 = vadd.f32 %v3858_v17, %v4871_v18  ;;  %v3968_v8 = vpop.f32.mrf.mxu1 }
 0x18f   : > { %v3860_v42 = vpop.f32.mrf.mxu0  ;;  %v4956_v2 = vadd.f32 %v3967_v50, %v1796_v26 }
 0x190   : > { %v3861_v27 = vadd.f32 %v3860_v42, %v3859_v25  ;;  %v3969_v9 = vpop.f32.mrf.mxu1 }
 0x191   : > { %v3862_v33 = vpop.f32.mrf.mxu0  ;;  %v3970_v7 = vadd.f32 %v3969_v9, %v3968_v8 }
 0x192   : > { %v1804_v44 = vadd.f32 %v3861_v27, %v4875_v13  ;;  %v3971_v12 = vpop.f32.mrf.mxu1 }
 0x193   : > { %v3863_v40 = vpop.f32.mrf.mxu0  ;;  %v4959_v59 = vadd.f32 %v3970_v7, %v1799_v11 }
 0x194   : > { %v3864_v34 = vadd.f32 %v3863_v40, %v3862_v33  ;;  %v3972_v36 = vpop.f32.mrf.mxu1 }
 0x195   : > { %v3865_v43 = vpop.f32.mrf.mxu0  ;;  %v3973_v61 = vadd.f32 %v3972_v36, %v3971_v12 }
 0x196   : > { %v1807_v18 = vadd.f32 %v3864_v34, %v4883_v24  ;;  %v3974_v52 = vpop.f32.mrf.mxu1 }
 0x197   : > { %v3866_v45 = vpop.f32.mrf.mxu0  ;;  %v4962_v51 = vadd.f32 %v3973_v61, %v1804_v44 }
 0x198   : > { %v3867_v54 = vadd.f32 %v3866_v45, %v3865_v43  ;;  %v3975_v62 = vpop.f32.mrf.mxu1 }
 0x199   : > { %v3868_v16 = vpop.f32.mrf.mxu0  ;;  %v3976_v55 = vadd.f32 %v3975_v62, %v3974_v52 }
 0x19a   : > { %v1812_v13 = vadd.f32 %v3867_v54, %v4887_v39  ;;  %v3977_v38 = vpop.f32.mrf.mxu1 }
 0x19b   : > { %v3869_v53 = vpop.f32.mrf.mxu0  ;;  %v4965_v46 = vadd.f32 %v3976_v55, %v1807_v18 }
 0x19c   : > { %v3870_v26 = vadd.f32 %v3869_v53, %v3868_v16  ;;  %v3978_v17 = vpop.f32.mrf.mxu1 }
 0x19d   : > { %v3871_v22 = vpop.f32.mrf.mxu0  ;;  %v3979_v25 = vadd.f32 %v3978_v17, %v3977_v38 }
 0x19e   : > { %v1815_v24 = vadd.f32 %v3870_v26, %v4891_v47  ;;  %v3980_v41 = vpop.f32.mrf.mxu1 }
 0x19f   : > { %v3872_v14 = vpop.f32.mrf.mxu0  ;;  %v4968_v50 = vadd.f32 %v3979_v25, %v1812_v13 }
 0x1a0   : > { %v3873_v11 = vadd.f32 %v3872_v14, %v3871_v22  ;;  %v3981_v27 = vpop.f32.mrf.mxu1 }
 0x1a1   : > { %v3874_v42 = vpop.f32.mrf.mxu0  ;;  %v3982_v33 = vadd.f32 %v3981_v27, %v3980_v41 }
 0x1a2   : > { %v1820_v39 = vadd.f32 %v3873_v11, %v4893_v0  ;;  %v3983_v9 = vpop.f32.mrf.mxu1 }
 0x1a3   : > { %v3875_v8 = vpop.f32.mrf.mxu0  ;;  %v4971_v7 = vadd.f32 %v3982_v33, %v1815_v24 }
 0x1a4   : > { %v3876_v44 = vadd.f32 %v3875_v8, %v3874_v42  ;;  %v3984_v34 = vpop.f32.mrf.mxu1 }
 0x1a5   : > { %v3877_v40 = vpop.f32.mrf.mxu0  ;;  %v3985_v43 = vadd.f32 %v3984_v34, %v3983_v9 }
 0x1a6   : > { %v1823_v47 = vadd.f32 %v3876_v44, %v4895_v6  ;;  %v3986_v36 = vpop.f32.mrf.mxu1 }
 0x1a7   : > { %v3878_v12 = vpop.f32.mrf.mxu0  ;;  %v4974_v61 = vadd.f32 %v3985_v43, %v1820_v39 }
 0x1a8   : > { %v3879_v18 = vadd.f32 %v3878_v12, %v3877_v40  ;;  %v3987_v54 = vpop.f32.mrf.mxu1 }
 0x1a9   : > { %v3880_v45 = vpop.f32.mrf.mxu0  ;;  %v3988_v16 = vadd.f32 %v3987_v54, %v3986_v36 }
 0x1aa   : > { %v1828_v0 = vadd.f32 %v3879_v18, %v4897_v10  ;;  %v3989_v62 = vpop.f32.mrf.mxu1 }
 0x1ab   : > { %v3881_v52 = vpop.f32.mrf.mxu0  ;;  %v4977_v55 = vadd.f32 %v3988_v16, %v1823_v47 }
 0x1ac   : > { %v3882_v13 = vadd.f32 %v3881_v52, %v3880_v45  ;;  %v3990_v26 = vpop.f32.mrf.mxu1 }
 0x1ad   : > { %v3883_v53 = vpop.f32.mrf.mxu0  ;;  %v3991_v22 = vadd.f32 %v3990_v26, %v3989_v62 }
 0x1ae   : > { %v1831_v6 = vadd.f32 %v3882_v13, %v4899_v48  ;;  %v3992_v17 = vpop.f32.mrf.mxu1 }
 0x1af   : > { %v3884_v38 = vpop.f32.mrf.mxu0  ;;  %v4980_v25 = vadd.f32 %v3991_v22, %v1828_v0 }
 0x1b0   : > { %v3885_v24 = vadd.f32 %v3884_v38, %v3883_v53  ;;  %v3993_v11 = vpop.f32.mrf.mxu1 }
 0x1b1   : > { %v3886_v14 = vpop.f32.mrf.mxu0  ;;  %v3994_v42 = vadd.f32 %v3993_v11, %v3992_v17 }
 0x1b2   : > { %v1836_v10 = vadd.f32 %v3885_v24, %v4901_v35  ;;  %v3995_v27 = vpop.f32.mrf.mxu1 }
 0x1b3   : > { %v3887_v41 = vpop.f32.mrf.mxu0  ;;  %v4983_v33 = vadd.f32 %v3994_v42, %v1831_v6 }
 0x1b4   : > { %v3888_v39 = vadd.f32 %v3887_v41, %v3886_v14  ;;  %v3996_v44 = vpop.f32.mrf.mxu1 }
 0x1b5   : > { %v3889_v8 = vpop.f32.mrf.mxu0  ;;  %v3997_v40 = vadd.f32 %v3996_v44, %v3995_v27 }
 0x1b6   : > { %v1839_v48 = vadd.f32 %v3888_v39, %v4903_v60  ;;  %v3998_v34 = vpop.f32.mrf.mxu1 }
 0x1b7   : > { %v3890_v9 = vpop.f32.mrf.mxu0  ;;  %v4986_v43 = vadd.f32 %v3997_v40, %v1836_v10 }
 0x1b8   : > { %v3891_v47 = vadd.f32 %v3890_v9, %v3889_v8  ;;  %v3999_v18 = vpop.f32.mrf.mxu1 }
 0x1b9   : > { %v3892_v12 = vpop.f32.mrf.mxu0  ;;  %v4000_v45 = vadd.f32 %v3999_v18, %v3998_v34 }
 0x1ba   : > { %v1844_v35 = vadd.f32 %v3891_v47, %v4905_v4  ;;  %v4001_v54 = vpop.f32.mrf.mxu1 }
 0x1bb   : > { %v3893_v36 = vpop.f32.mrf.mxu0  ;;  %v4989_v16 = vadd.f32 %v4000_v45, %v1839_v48 }
 0x1bc   : > { %v3894_v0 = vadd.f32 %v3893_v36, %v3892_v12  ;;  %v4002_v13 = vpop.f32.mrf.mxu1 }
 0x1bd   : > { %v3895_v52 = vpop.f32.mrf.mxu0  ;;  %v4003_v53 = vadd.f32 %v4002_v13, %v4001_v54 }
 0x1be   : > { %v1847_v60 = vadd.f32 %v3894_v0, %v4907_v31  ;;  %v4004_v26 = vpop.f32.mrf.mxu1 }
 0x1bf   : > { %v3896_v62 = vpop.f32.mrf.mxu0  ;;  %v4992_v22 = vadd.f32 %v4003_v53, %v1844_v35 }
 0x1c0   : > { %v3897_v6 = vadd.f32 %v3896_v62, %v3895_v52  ;;  %v4005_v24 = vpop.f32.mrf.mxu1 }
 0x1c1   : > { %v3898_v38 = vpop.f32.mrf.mxu0  ;;  %v4006_v14 = vadd.f32 %v4005_v24, %v4004_v26 }
 0x1c2   : > { %v1852_v4 = vadd.f32 %v3897_v6, %v4909_v15  ;;  %v4007_v11 = vpop.f32.mrf.mxu1 }
 0x1c3   : > { %v3899_v17 = vpop.f32.mrf.mxu0  ;;  %v4995_v42 = vadd.f32 %v4006_v14, %v1847_v60 }
 0x1c4   : > { %v3900_v10 = vadd.f32 %v3899_v17, %v3898_v38  ;;  %v4008_v39 = vpop.f32.mrf.mxu1 }
 0x1c5   : > { %v3901_v41 = vpop.f32.mrf.mxu0  ;;  %v4009_v8 = vadd.f32 %v4008_v39, %v4007_v11 }
 0x1c6   : > { %v1855_v31 = vadd.f32 %v3900_v10, %v4911_v49  ;;  %v4010_v44 = vpop.f32.mrf.mxu1 }
 0x1c7   : > { %v3902_v27 = vpop.f32.mrf.mxu0  ;;  %v4998_v40 = vadd.f32 %v4009_v8, %v1852_v4 }
 0x1c8   : > { %v3903_v48 = vadd.f32 %v3902_v27, %v3901_v41  ;;  %v4011_v47 = vpop.f32.mrf.mxu1 }
 0x1c9   : > { %v3904_v9 = vpop.f32.mrf.mxu0  ;;  %v4012_v12 = vadd.f32 %v4011_v47, %v4010_v44 }
 0x1ca   : > { %v1860_v15 = vadd.f32 %v3903_v48, %v4913_v30  ;;  %v4013_v18 = vpop.f32.mrf.mxu1 }
 0x1cb   : > { %v3905_v34 = vpop.f32.mrf.mxu0  ;;  %v5001_v45 = vadd.f32 %v4012_v12, %v1855_v31 }
 0x1cc   : > { %v3906_v35 = vadd.f32 %v3905_v34, %v3904_v9  ;;  %v4014_v0 = vpop.f32.mrf.mxu1 }
 0x1cd   : > { %v3907_v36 = vpop.f32.mrf.mxu0  ;;  %v4015_v52 = vadd.f32 %v4014_v0, %v4013_v18 }
 0x1ce   : > { %v1863_v49 = vadd.f32 %v3906_v35, %v4915_v37  ;;  %v4016_v13 = vpop.f32.mrf.mxu1 }
 0x1cf   : > { %v3908_v54 = vpop.f32.mrf.mxu0  ;;  %v5004_v53 = vadd.f32 %v4015_v52, %v1860_v15 }
 0x1d0   : > { %v3909_v60 = vadd.f32 %v3908_v54, %v3907_v36  ;;  %v4017_v6 = vpop.f32.mrf.mxu1 }
 0x1d1   : > { %v3910_v62 = vpop.f32.mrf.mxu0  ;;  %v4018_v38 = vadd.f32 %v4017_v6, %v4016_v13 }
 0x1d2   : > { %v1868_v30 = vadd.f32 %v3909_v60, %v4917_v32  ;;  %v4019_v24 = vpop.f32.mrf.mxu1 }
 0x1d3   : > { %v3911_v26 = vpop.f32.mrf.mxu0  ;;  %v5007_v14 = vadd.f32 %v4018_v38, %v1863_v49 }
 0x1d4   : > { %v3912_v4 = vadd.f32 %v3911_v26, %v3910_v62  ;;  %v4020_v10 = vpop.f32.mrf.mxu1 }
 0x1d5   : > { %v3913_v17 = vpop.f32.mrf.mxu0  ;;  %v4021_v41 = vadd.f32 %v4020_v10, %v4019_v24 }
 0x1d6   : > { %v1871_v37 = vadd.f32 %v3912_v4, %v4919_v3  ;;  %v4022_v39 = vpop.f32.mrf.mxu1 }
 0x1d7   : > { %v3914_v11 = vpop.f32.mrf.mxu0  ;;  %v5010_v8 = vadd.f32 %v4021_v41, %v1868_v30 }
 0x1d8   : > { %v3915_v31 = vadd.f32 %v3914_v11, %v3913_v17  ;;  %v4023_v48 = vpop.f32.mrf.mxu1 }
 0x1d9   : > { %v3916_v27 = vpop.f32.mrf.mxu0  ;;  %v4024_v9 = vadd.f32 %v4023_v48, %v4022_v39 }
 0x1da   : > { %v1876_v32 = vadd.f32 %v3915_v31, %v4922_v19  ;;  %v4025_v47 = vpop.f32.mrf.mxu1 }
 0x1db   : > { %v3917_v44 = vpop.f32.mrf.mxu0  ;;  %v5015_v12 = vadd.f32 %v4024_v9, %v1871_v37 }
 0x1dc   : > { %v3918_v15 = vadd.f32 %v3917_v44, %v3916_v27  ;;  %v4026_v35 = vpop.f32.mrf.mxu1 }
 0x1dd   : > { %v3919_v34 = vpop.f32.mrf.mxu0  ;;  %v4027_v36 = vadd.f32 %v4026_v35, %v4025_v47 }
 0x1de   : > { %v5013_v3 = vadd.f32 %v3918_v15, %v4924_v29  ;;  %v4028_v0 = vpop.f32.mrf.mxu1 }
 0x1df   : > { %v3920_v18 = vpop.f32.mrf.mxu0  ;;  %v5018_v52 = vadd.f32 %v4027_v36, %v1876_v32 }
 0x1e0   : > { %v3921_v49 = vadd.f32 %v3920_v18, %v3919_v34  ;;  %v4029_v60 = vpop.f32.mrf.mxu1 }
 0x1e1   : > { %v3922_v54 = vpop.f32.mrf.mxu0 }
 0x1e2   : > { %v1884_v19 = vadd.f32 %v3921_v49, %v4926_v23  ;;  %v4031_v30 = vpop.f32.mrf.mxu1 }
 0x1e3   : > { %v3923_v13 = vpop.f32.mrf.mxu0 }
 0x1e4   : > { %v3924_v62 = vadd.f32 %v3923_v13, %v3922_v54  ;;  %v4032_v26 = vpop.f32.mrf.mxu1 }
 0x1e5   : > { %v3925_v6 = vpop.f32.mrf.mxu0  ;;  %v4033_v4 = vadd.f32 %v4032_v26, %v4031_v30 }
 0x1e6   : > { %v1887_v29 = vadd.f32 %v3924_v62, %v4929_v56  ;;  %v4034_v17 = vpop.f32.mrf.mxu1 }
 0x1e7   : > { %v3926_v38 = vpop.f32.mrf.mxu0  ;;  %v5024_v23 = vadd.f32 %v4033_v4, %v1884_v19 }
 0x1e8   : > { %v3927_v24 = vadd.f32 %v3926_v38, %v3925_v6  ;;  %v4035_v11 = vpop.f32.mrf.mxu1  ;;  %v5040_v38 = vadd.f32 %v4029_v60, %v4028_v0 }
 0x1e9   : > { %v3928_v37 = vpop.f32.mrf.mxu0  ;;  %v4036_v31 = vadd.f32 %v4035_v11, %v4034_v17 }
 0x1ea   : > { %v5022_v10 = vadd.f32 %v3927_v24, %v4931_v21  ;;  %v4037_v39 = vpop.f32.mrf.mxu1 }
 0x1eb   : > { %v3929_v41 = vpop.f32.mrf.mxu0  ;;  %v5026_v32 = vadd.f32 %v4036_v31, %v1887_v29 }
 0x1ec   : > { %v4038_v56 = vpop.f32.mrf.mxu1  ;;  %v3930_v49 = vadd.f32 %v3929_v41, %v3928_v37 }
 0x1ed   : > { %v4109_v27 = vpop.f32.mrf.mxu0  ;;  %v5051_v37 = vadd.f32 %v4038_v56, %v4037_v39 }
 0x1ee   : > { %v4040_v44 = vpop.f32.mrf.mxu1  ;;  %v2102_v15 = vadd.f32 %v4109_v27, %v4944_v20  ;;  %v5043_v4 = vadd.f32 %v3930_v49, %v4934_v5 }
 0x1ef   : > { %v2093_v48 = vpop.f32.mrf.mxu0 }
 0x1f0   : > { %v2094_v47 = vadd.f32 %v2093_v48, %v4938_v1  ;;  %v4041_v34 = vpop.f32.mrf.mxu1  ;;  %v2420_v6 = vmul.f32 %v2102_v15, %v2102_v15 }
 0x1f1   : > { %v4110_v9 = vpop.f32.mrf.mxu0 }
 0x1f2   : > { %v2105_v21 = vadd.f32 %v4110_v9, %v4947_v63  ;;  %v4157_v54 = vpop.f32.mrf.mxu1  ;;  %v2418_v19 = vmul.f32 %v2094_v47, %v2094_v47 }
 0x1f3   : > { %v2096_v35 = vpop.f32.mrf.mxu0 }
 0x1f4   : > { %v3413_v18 = vpack.c.bf16 %v2105_v21, %v2102_v15  ;;  %v2097_v36 = vadd.f32 %v2096_v35, %v4941_v58  ;;  %v2634_v62 = vpop.f32.mrf.mxu1  ;;  %v2421_v60 = vmul.f32 %v2105_v21, %v2105_v21 }
 0x1f5   : > { %v4113_v20 = vpop.f32.mrf.mxu0  ;;  %v2959_v0 = vmul.f32 %v2634_v62, %v2634_v62 }
 0x1f6   : > { %3565 = vst [vmem:[%s5035_s14 + $0x8] sm:$0xff] %v3413_v18   ;;  %v3408_v1 = vpack.c.bf16 %v2097_v36, %v2094_v47  ;;  %v2380_v13 = vadd.f32 %v2097_v36, %v2094_v47  ;;  %v2419_v63 = vmul.f32 %v2097_v36, %v2097_v36  ;;  %v4158_v58 = vpop.f32.mrf.mxu1  ;;  %v2118_v5 = vadd.f32 %v4113_v20, %v4956_v2 }
 0x1f7   : > { %v2109_v30 = vpop.f32.mrf.mxu0  ;;  %v3493_v11 = vpack.c.bf16 %v4158_v58, %v4157_v54 }
 0x1f8   : > { %3409 = vst [vmem:[%s5035_s14] sm:$0xff] %v3408_v1   ;;  %v2381_v29 = vadd.f32 %v2380_v13, %v2102_v15  ;;  %v2450_v26 = vadd.f32 %v2419_v63, %v2418_v19  ;;  %v2110_v24 = vadd.f32 %v2109_v30, %v4950_v57  ;;  %v2637_v27 = vpop.f32.mrf.mxu1  ;;  %v4042_v19 = vadd.f32 %v4041_v34, %v4040_v44 }
 0x1f9   : > { %v4114_v17 = vpop.f32.mrf.mxu0  ;;  %3580 = vst [vmem:[%s5048_s17 + $0x8] sm:$0xff] %v3493_v11   ;;  %v3488_v15 = vpack.c.bf16 %v2637_v27, %v2634_v62  ;;  %v2921_v47 = vadd.f32 %v2637_v27, %v2634_v62  ;;  %v2960_v57 = vmul.f32 %v2637_v27, %v2637_v27  ;;  %v2961_v1 = vmul.f32 %v4157_v54, %v4157_v54 }
 0x1fa   : > { %v2451_v41 = vadd.f32 %v2450_v26, %v2420_v6  ;;  %v2382_v31 = vadd.f32 %v2381_v29, %v2105_v21  ;;  %v2121_v48 = vadd.f32 %v4114_v17, %v4959_v59  ;;  %v4161_v39 = vpop.f32.mrf.mxu1  ;;  %v2422_v56 = vmul.f32 %v2110_v24, %v2110_v24 }
 0x1fb   : > { %v2112_v9 = vpop.f32.mrf.mxu0  ;;  %3489 = vst [vmem:[%s5048_s17] sm:$0xff] %v3488_v15   ;;  %v2922_v2 = vadd.f32 %v4157_v54, %v2921_v47  ;;  %v2991_v59 = vadd.f32 %v2960_v57, %v2959_v0  ;;  %v2962_v29 = vmul.f32 %v4158_v58, %v4158_v58  ;;  %v2424_v17 = vmul.f32 %v2118_v5, %v2118_v5 }
 0x1fc   : > { %v2383_v35 = vadd.f32 %v2382_v31, %v2110_v24  ;;  %v2452_v18 = vadd.f32 %v2451_v41, %v2421_v60  ;;  %v3423_v36 = vpack.c.bf16 %v2121_v48, %v2118_v5  ;;  %v2113_v49 = vadd.f32 %v2112_v9, %v4953_v28  ;;  %v2650_v13 = vpop.f32.mrf.mxu1 }
 0x1fd   : > { %v4117_v21 = vpop.f32.mrf.mxu0  ;;  %v2992_v26 = vadd.f32 %v2991_v59, %v2961_v1  ;;  %v2923_v11 = vadd.f32 %v4158_v58, %v2922_v2  ;;  %v2425_v41 = vmul.f32 %v2121_v48, %v2121_v48  ;;  %v2963_v60 = vmul.f32 %v2650_v13, %v2650_v13 }
 0x1fe   : > { %v2453_v20 = vadd.f32 %v2452_v18, %v2422_v56  ;;  %3567 = vst [vmem:[%s5035_s14 + $0x18] sm:$0xff] %v3423_v36   ;;  %v3418_v63 = vpack.c.bf16 %v2113_v49, %v2110_v24  ;;  %v2384_v62 = vadd.f32 %v2383_v35, %v2113_v49  ;;  %v2423_v30 = vmul.f32 %v2113_v49, %v2113_v49  ;;  %v4162_v28 = vpop.f32.mrf.mxu1 }
 0x1ff   : > { %v2125_v6 = vpop.f32.mrf.mxu0  ;;  %v2924_v0 = vadd.f32 %v2923_v11, %v2650_v13  ;;  %v2993_v27 = vadd.f32 %v2992_v26, %v2962_v29  ;;  %v3503_v24 = vpack.c.bf16 %v4162_v28, %v4161_v39  ;;  %v2134_v47 = vadd.f32 %v4117_v21, %v4968_v50 }
 0x200   : > { %3566 = vst [vmem:[%s5035_s14 + $0x10] sm:$0xff] %v3418_v63   ;;  %v2385_v44 = vadd.f32 %v2384_v62, %v2118_v5  ;;  %v2454_v34 = vadd.f32 %v2453_v20, %v2423_v30  ;;  %v2126_v54 = vadd.f32 %v2125_v6, %v4962_v51  ;;  %v2653_v15 = vpop.f32.mrf.mxu1  ;;  %v2965_v63 = vmul.f32 %v4161_v39, %v4161_v39 }
 0x201   : > { %v4118_v31 = vpop.f32.mrf.mxu0  ;;  %v2994_v56 = vadd.f32 %v2993_v27, %v2963_v60  ;;  %3582 = vst [vmem:[%s5048_s17 + $0x18] sm:$0xff] %v3503_v24   ;;  %v3498_v5 = vpack.c.bf16 %v2653_v15, %v2650_v13  ;;  %v2925_v18 = vadd.f32 %v2924_v0, %v2653_v15  ;;  %v2964_v51 = vmul.f32 %v2653_v15, %v2653_v15 }
 0x202   : > { %v2455_v9 = vadd.f32 %v2454_v34, %v2424_v17  ;;  %v2386_v57 = vadd.f32 %v2385_v44, %v2121_v48  ;;  %v2137_v58 = vadd.f32 %v4118_v31, %v4971_v7  ;;  %v4165_v36 = vpop.f32.mrf.mxu1  ;;  %v2426_v1 = vmul.f32 %v2126_v54, %v2126_v54 }
 0x203   : > { %v2128_v35 = vpop.f32.mrf.mxu0  ;;  %3581 = vst [vmem:[%s5048_s17 + $0x10] sm:$0xff] %v3498_v5   ;;  %v2926_v50 = vadd.f32 %v4161_v39, %v2925_v18  ;;  %v2995_v21 = vadd.f32 %v2994_v56, %v2964_v51  ;;  %v5069_v13 = vadd.f32 %v5040_v38, %v5013_v3  ;;  %v5073_v6 = vadd.f32 %v5051_v37, %v5022_v10 }
 0x204   : > { %v2387_v49 = vadd.f32 %v2386_v57, %v2126_v54  ;;  %v2456_v2 = vadd.f32 %v2455_v9, %v2425_v41  ;;  %v3433_v59 = vpack.c.bf16 %v2137_v58, %v2134_v47  ;;  %v2129_v48 = vadd.f32 %v2128_v35, %v4965_v46  ;;  %v2666_v62 = vpop.f32.mrf.mxu1 }
 0x205   : > { %v4121_v20 = vpop.f32.mrf.mxu0  ;;  %v5076_v29 = vadd.f32 %v4042_v19, %v5043_v4  ;;  %v2966_v39 = vmul.f32 %v4162_v28, %v4162_v28  ;;  %v2996_v26 = vadd.f32 %v2995_v21, %v2965_v63  ;;  %v2927_v17 = vadd.f32 %v4162_v28, %v2926_v50 }
 0x206   : > { %v2457_v7 = vadd.f32 %v2456_v2, %v2426_v1  ;;  %3569 = vst [vmem:[%s5035_s14 + $0x28] sm:$0xff] %v3433_v59   ;;  %v3428_v46 = vpack.c.bf16 %v2129_v48, %v2126_v54  ;;  %v2428_v11 = vmul.f32 %v2134_v47, %v2134_v47  ;;  %v4166_v41 = vpop.f32.mrf.mxu1  ;;  %v2388_v44 = vadd.f32 %v2387_v49, %v2129_v48 }
 0x207   : > { %v2141_v30 = vpop.f32.mrf.mxu0  ;;  %v2427_v34 = vmul.f32 %v2129_v48, %v2129_v48  ;;  %v2150_v3 = vadd.f32 %v4121_v20, %v4980_v25  ;;  %v2928_v31 = vadd.f32 %v2927_v17, %v2666_v62  ;;  %v2967_v0 = vmul.f32 %v2666_v62, %v2666_v62 }
 0x208   : > { %v2997_v10 = vadd.f32 %v2996_v26, %v2966_v39  ;;  %v3513_v37 = vpack.c.bf16 %v4166_v41, %v4165_v36  ;;  %3568 = vst [vmem:[%s5035_s14 + $0x20] sm:$0xff] %v3428_v46   ;;  %v2389_v60 = vadd.f32 %v2388_v44, %v2134_v47  ;;  %v2669_v19 = vpop.f32.mrf.mxu1  ;;  %v2142_v28 = vadd.f32 %v2141_v30, %v4974_v61 }
 0x209   : > { %v4122_v38 = vpop.f32.mrf.mxu0  ;;  %v2458_v4 = vadd.f32 %v2457_v7, %v2427_v34  ;;  %v3508_v9 = vpack.c.bf16 %v2669_v19, %v2666_v62  ;;  %v2929_v15 = vadd.f32 %v2928_v31, %v2669_v19  ;;  %v2968_v25 = vmul.f32 %v2669_v19, %v2669_v19 }
 0x20a   : > { %v2153_v54 = vadd.f32 %v4122_v38, %v4983_v33  ;;  %v2998_v24 = vadd.f32 %v2997_v10, %v2967_v0  ;;  %3584 = vst [vmem:[%s5048_s17 + $0x28] sm:$0xff] %v3513_v37   ;;  %v2429_v57 = vmul.f32 %v2137_v58, %v2137_v58  ;;  %v4169_v56 = vpop.f32.mrf.mxu1  ;;  %v2390_v5 = vadd.f32 %v2389_v60, %v2137_v58 }
 0x20b   : > { %v2144_v27 = vpop.f32.mrf.mxu0  ;;  %v2459_v35 = vadd.f32 %v2458_v4, %v2428_v11  ;;  %v2969_v51 = vmul.f32 %v4165_v36, %v4165_v36  ;;  %3583 = vst [vmem:[%s5048_s17 + $0x20] sm:$0xff] %v3508_v9   ;;  %v2930_v49 = vadd.f32 %v4165_v36, %v2929_v15  ;;  %v2432_v33 = vmul.f32 %v2150_v3, %v2150_v3 }
 0x20c   : > { %v3443_v18 = vpack.c.bf16 %v2153_v54, %v2150_v3  ;;  %v2999_v1 = vadd.f32 %v2998_v24, %v2968_v25  ;;  %v2145_v61 = vadd.f32 %v2144_v27, %v4977_v55  ;;  %v2391_v2 = vadd.f32 %v2390_v5, %v2142_v28  ;;  %v2682_v63 = vpop.f32.mrf.mxu1 }
 0x20d   : > { %v4125_v47 = vpop.f32.mrf.mxu0  ;;  %v2430_v59 = vmul.f32 %v2142_v28, %v2142_v28  ;;  %v2460_v20 = vadd.f32 %v2459_v35, %v2429_v57  ;;  %v2970_v21 = vmul.f32 %v4166_v41, %v4166_v41  ;;  %v2931_v7 = vadd.f32 %v4166_v41, %v2930_v49 }
 0x20e   : > { %3571 = vst [vmem:[%s5035_s14 + $0x38] sm:$0xff] %v3443_v18   ;;  %v3000_v48 = vadd.f32 %v2999_v1, %v2969_v51  ;;  %v3438_v58 = vpack.c.bf16 %v2145_v61, %v2142_v28  ;;  %v4170_v30 = vpop.f32.mrf.mxu1  ;;  %v2392_v39 = vadd.f32 %v2391_v2, %v2145_v61  ;;  %v2431_v36 = vmul.f32 %v2145_v61, %v2145_v61 }
 0x20f   : > { %v2157_v50 = vpop.f32.mrf.mxu0  ;;  %v2461_v62 = vadd.f32 %v2460_v20, %v2430_v59  ;;  %v2166_v26 = vadd.f32 %v4125_v47, %v4992_v22  ;;  %v2932_v17 = vadd.f32 %v2931_v7, %v2682_v63  ;;  %v2971_v46 = vmul.f32 %v2682_v63, %v2682_v63 }
 0x210   : > { %v3001_v11 = vadd.f32 %v3000_v48, %v2970_v21  ;;  %v3523_v44 = vpack.c.bf16 %v4170_v30, %v4169_v56  ;;  %3570 = vst [vmem:[%s5035_s14 + $0x30] sm:$0xff] %v3438_v58   ;;  %v2393_v34 = vadd.f32 %v2392_v39, %v2150_v3  ;;  %v2685_v31 = vpop.f32.mrf.mxu1  ;;  %v2158_v41 = vadd.f32 %v2157_v50, %v4986_v43 }
 0x211   : > { %v4126_v55 = vpop.f32.mrf.mxu0  ;;  %v2462_v38 = vadd.f32 %v2461_v62, %v2431_v36  ;;  %v3518_v60 = vpack.c.bf16 %v2685_v31, %v2682_v63  ;;  %v2933_v4 = vadd.f32 %v2932_v17, %v2685_v31  ;;  %v2972_v22 = vmul.f32 %v2685_v31, %v2685_v31 }
 0x212   : > { %v2169_v0 = vadd.f32 %v4126_v55, %v4995_v42  ;;  %v3002_v37 = vadd.f32 %v3001_v11, %v2971_v46  ;;  %3586 = vst [vmem:[%s5048_s17 + $0x38] sm:$0xff] %v3523_v44   ;;  %v2433_v19 = vmul.f32 %v2153_v54, %v2153_v54  ;;  %v4173_v27 = vpop.f32.mrf.mxu1  ;;  %v2394_v24 = vadd.f32 %v2393_v34, %v2153_v54 }
 0x213   : > { %v2160_v10 = vpop.f32.mrf.mxu0  ;;  %v2463_v28 = vadd.f32 %v2462_v38, %v2432_v33  ;;  %v2973_v15 = vmul.f32 %v4169_v56, %v4169_v56  ;;  %3585 = vst [vmem:[%s5048_s17 + $0x30] sm:$0xff] %v3518_v60   ;;  %v2934_v25 = vadd.f32 %v4169_v56, %v2933_v4  ;;  %v2436_v43 = vmul.f32 %v2166_v26, %v2166_v26 }
 0x214   : > { %v3453_v9 = vpack.c.bf16 %v2169_v0, %v2166_v26  ;;  %v3003_v57 = vadd.f32 %v3002_v37, %v2972_v22  ;;  %v2395_v35 = vadd.f32 %v2394_v24, %v2158_v41  ;;  %v2434_v42 = vmul.f32 %v2158_v41, %v2158_v41  ;;  %v2698_v18 = vpop.f32.mrf.mxu1 }
 0x215   : > { %v4129_v3 = vpop.f32.mrf.mxu0  ;;  %v2464_v5 = vadd.f32 %v2463_v28, %v2433_v19  ;;  %v2161_v47 = vadd.f32 %v2160_v10, %v4989_v16  ;;  %v2974_v49 = vmul.f32 %v4170_v30, %v4170_v30  ;;  %v2935_v61 = vadd.f32 %v4170_v30, %v2934_v25 }
 0x216   : > { %3573 = vst [vmem:[%s5035_s14 + $0x48] sm:$0xff] %v3453_v9   ;;  %v3004_v1 = vadd.f32 %v3003_v57, %v2973_v15  ;;  %v2437_v54 = vmul.f32 %v2169_v0, %v2169_v0  ;;  %v4174_v2 = vpop.f32.mrf.mxu1  ;;  %v2975_v21 = vmul.f32 %v2698_v18, %v2698_v18  ;;  %v2182_v39 = vadd.f32 %v4129_v3, %v5004_v53 }
 0x217   : > { %v2173_v51 = vpop.f32.mrf.mxu0  ;;  %v2465_v33 = vadd.f32 %v2464_v5, %v2434_v42  ;;  %v3448_v59 = vpack.c.bf16 %v2161_v47, %v2158_v41  ;;  %v2396_v56 = vadd.f32 %v2395_v35, %v2161_v47  ;;  %v2435_v20 = vmul.f32 %v2161_v47, %v2161_v47 }
 0x218   : > { %v2936_v50 = vadd.f32 %v2935_v61, %v2698_v18  ;;  %v3005_v48 = vadd.f32 %v3004_v1, %v2974_v49  ;;  %v3533_v7 = vpack.c.bf16 %v4174_v2, %v4173_v27  ;;  %v2701_v62 = vpop.f32.mrf.mxu1  ;;  %v2174_v30 = vadd.f32 %v2173_v51, %v4998_v40 }
 0x219   : > { %v4130_v63 = vpop.f32.mrf.mxu0  ;;  %3572 = vst [vmem:[%s5035_s14 + $0x40] sm:$0xff] %v3448_v59   ;;  %v2397_v58 = vadd.f32 %v2396_v56, %v2166_v26  ;;  %v2466_v16 = vadd.f32 %v2465_v33, %v2435_v20  ;;  %v3528_v17 = vpack.c.bf16 %v2701_v62, %v2698_v18  ;;  %v2976_v11 = vmul.f32 %v2701_v62, %v2701_v62 }
 0x21a   : > { %v3006_v55 = vadd.f32 %v3005_v48, %v2975_v21  ;;  %3588 = vst [vmem:[%s5048_s17 + $0x48] sm:$0xff] %v3533_v7   ;;  %v2937_v46 = vadd.f32 %v2936_v50, %v2701_v62  ;;  %v4177_v34 = vpop.f32.mrf.mxu1  ;;  %v2185_v31 = vadd.f32 %v4130_v63, %v5007_v14  ;;  %v2977_v10 = vmul.f32 %v4173_v27, %v4173_v27 }
 0x21b   : > { %v2176_v36 = vpop.f32.mrf.mxu0  ;;  %v2467_v44 = vadd.f32 %v2466_v16, %v2436_v43  ;;  %v2398_v38 = vadd.f32 %v2397_v58, %v2169_v0  ;;  %v2978_v53 = vmul.f32 %v4174_v2, %v4174_v2  ;;  %3587 = vst [vmem:[%s5048_s17 + $0x40] sm:$0xff] %v3528_v17   ;;  %v2438_v4 = vmul.f32 %v2174_v30, %v2174_v30 }
 0x21c   : > { %v2177_v26 = vadd.f32 %v2176_v36, %v5001_v45  ;;  %v2938_v37 = vadd.f32 %v4173_v27, %v2937_v46  ;;  %v3007_v40 = vadd.f32 %v3006_v55, %v2976_v11  ;;  %v2714_v19 = vpop.f32.mrf.mxu1  ;;  %v3463_v28 = vpack.c.bf16 %v2185_v31, %v2182_v39 }
 0x21d   : > { %v4133_v41 = vpop.f32.mrf.mxu0  ;;  %v2399_v60 = vadd.f32 %v2398_v38, %v2174_v30  ;;  %v2468_v22 = vadd.f32 %v2467_v44, %v2437_v54  ;;  %v2440_v0 = vmul.f32 %v2182_v39, %v2182_v39  ;;  %v2979_v42 = vmul.f32 %v2714_v19, %v2714_v19 }
 0x21e   : > { %v3008_v9 = vadd.f32 %v3007_v40, %v2977_v10  ;;  %v2939_v3 = vadd.f32 %v4174_v2, %v2938_v37  ;;  %v3458_v14 = vpack.c.bf16 %v2177_v26, %v2174_v30  ;;  %3575 = vst [vmem:[%s5035_s14 + $0x58] sm:$0xff] %v3463_v28   ;;  %v4178_v45 = vpop.f32.mrf.mxu1  ;;  %v2439_v57 = vmul.f32 %v2177_v26, %v2177_v26 }
 0x21f   : > { %v2189_v24 = vpop.f32.mrf.mxu0  ;;  %v2469_v15 = vadd.f32 %v2468_v22, %v2438_v4  ;;  %v2400_v25 = vadd.f32 %v2399_v60, %v2177_v26  ;;  %v2198_v27 = vadd.f32 %v4133_v41, %v5018_v52  ;;  %v3543_v18 = vpack.c.bf16 %v4178_v45, %v4177_v34 }
 0x220   : > { %v2940_v35 = vadd.f32 %v2939_v3, %v2714_v19  ;;  %v3009_v5 = vadd.f32 %v3008_v9, %v2978_v53  ;;  %3574 = vst [vmem:[%s5035_s14 + $0x50] sm:$0xff] %v3458_v14   ;;  %v2717_v49 = vpop.f32.mrf.mxu1  ;;  %v2190_v1 = vadd.f32 %v2189_v24, %v5010_v8  ;;  %v2441_v56 = vmul.f32 %v2185_v31, %v2185_v31 }
 0x221   : > { %v4134_v43 = vpop.f32.mrf.mxu0  ;;  %v2401_v47 = vadd.f32 %v2400_v25, %v2182_v39  ;;  %v2470_v51 = vadd.f32 %v2469_v15, %v2439_v57  ;;  %3590 = vst [vmem:[%s5048_s17 + $0x58] sm:$0xff] %v3543_v18   ;;  %v3538_v2 = vpack.c.bf16 %v2717_v49, %v2714_v19  ;;  %v2980_v52 = vmul.f32 %v2717_v49, %v2717_v49 }
 0x222   : > { %v2201_v61 = vadd.f32 %v4134_v43, %v5069_v13  ;;  %v3010_v33 = vadd.f32 %v3009_v5, %v2979_v42  ;;  %v2941_v59 = vadd.f32 %v2940_v35, %v2717_v49  ;;  %v4181_v63 = vpop.f32.mrf.mxu1  ;;  %v2981_v7 = vmul.f32 %v4177_v34, %v4177_v34 }
 0x223   : > { %v2192_v54 = vpop.f32.mrf.mxu0  ;;  %v2471_v20 = vadd.f32 %v2470_v51, %v2440_v0  ;;  %v2402_v50 = vadd.f32 %v2401_v47, %v2185_v31  ;;  %3589 = vst [vmem:[%s5048_s17 + $0x50] sm:$0xff] %v3538_v2   ;;  %v2444_v8 = vmul.f32 %v2198_v27, %v2198_v27  ;;  %v2442_v13 = vmul.f32 %v2190_v1, %v2190_v1 }
 0x224   : > { %v3473_v21 = vpack.c.bf16 %v2201_v61, %v2198_v27  ;;  %v2942_v58 = vadd.f32 %v4177_v34, %v2941_v59  ;;  %v3011_v16 = vadd.f32 %v3010_v33, %v2980_v52  ;;  %v2730_v30 = vpop.f32.mrf.mxu1  ;;  %v2193_v36 = vadd.f32 %v2192_v54, %v5015_v12 }
 0x225   : > { %v4137_v48 = vpop.f32.mrf.mxu0  ;;  %v2403_v62 = vadd.f32 %v2402_v50, %v2190_v1  ;;  %v2472_v39 = vadd.f32 %v2471_v20, %v2441_v56  ;;  %v2982_v17 = vmul.f32 %v4178_v45, %v4178_v45  ;;  %v2445_v44 = vmul.f32 %v2201_v61, %v2201_v61 }
 0x226   : > { %3577 = vst [vmem:[%s5035_s14 + $0x68] sm:$0xff] %v3473_v21   ;;  %v3012_v46 = vadd.f32 %v3011_v16, %v2981_v7  ;;  %v2943_v11 = vadd.f32 %v4178_v45, %v2942_v58  ;;  %v4182_v31 = vpop.f32.mrf.mxu1  ;;  %v3468_v26 = vpack.c.bf16 %v2193_v36, %v2190_v1  ;;  %v2443_v41 = vmul.f32 %v2193_v36, %v2193_v36 }
 0x227   : > { %v2205_v55 = vpop.f32.mrf.mxu0  ;;  %v2473_v38 = vadd.f32 %v2472_v39, %v2442_v13  ;;  %v2404_v34 = vadd.f32 %v2403_v62, %v2193_v36  ;;  %v2983_v37 = vmul.f32 %v2730_v30, %v2730_v30  ;;  %v3553_v60 = vpack.c.bf16 %v4182_v31, %v4181_v63 }
 0x228   : > { %v2944_v53 = vadd.f32 %v2943_v11, %v2730_v30  ;;  %v3013_v40 = vadd.f32 %v3012_v46, %v2982_v17  ;;  %3576 = vst [vmem:[%s5035_s14 + $0x60] sm:$0xff] %v3468_v26   ;;  %v2733_v22 = vpop.f32.mrf.mxu1  ;;  %v2214_v19 = vadd.f32 %v4137_v48, %v5073_v6  ;;  %v2206_v28 = vadd.f32 %v2205_v55, %v5024_v23 }
 0x229   : > { %v4138_v10 = vpop.f32.mrf.mxu0  ;;  %v2405_v4 = vadd.f32 %v2404_v34, %v2198_v27  ;;  %v2474_v12 = vadd.f32 %v2473_v38, %v2443_v41  ;;  %3592 = vst [vmem:[%s5048_s17 + $0x68] sm:$0xff] %v3553_v60   ;;  %v3548_v0 = vpack.c.bf16 %v2733_v22, %v2730_v30  ;;  %v2984_v14 = vmul.f32 %v2733_v22, %v2733_v22 }
 0x22a   : > { %v3014_v9 = vadd.f32 %v3013_v40, %v2983_v37  ;;  %v2945_v3 = vadd.f32 %v2944_v53, %v2733_v22  ;;  %v4185_v45 = vpop.f32.mrf.mxu1  ;;  %v2217_v57 = vadd.f32 %v4138_v10, %v5076_v29  ;;  %v2985_v43 = vmul.f32 %v4181_v63, %v4181_v63 }
 0x22b   : > { %v2208_v24 = vpop.f32.mrf.mxu0  ;;  %v2475_v15 = vadd.f32 %v2474_v12, %v2444_v8  ;;  %v2406_v25 = vadd.f32 %v2405_v4, %v2201_v61  ;;  %3591 = vst [vmem:[%s5048_s17 + $0x60] sm:$0xff] %v3548_v0   ;;  %v2446_v23 = vmul.f32 %v2206_v28, %v2206_v28  ;;  %v2986_v51 = vmul.f32 %v4182_v31, %v4182_v31 }
 0x22c   : > { %v2209_v27 = vadd.f32 %v2208_v24, %v5026_v32  ;;  %v2946_v35 = vadd.f32 %v4181_v63, %v2945_v3  ;;  %v3015_v6 = vadd.f32 %v3014_v9, %v2984_v14  ;;  %v2746_v18 = vpop.f32.mrf.mxu1  ;;  %v3483_v47 = vpack.c.bf16 %v2217_v57, %v2214_v19 }
 0x22d   : > { %v2407_v42 = vadd.f32 %v2406_v25, %v2206_v28  ;;  %v2476_v5 = vadd.f32 %v2475_v15, %v2445_v44  ;;  %v2987_v59 = vmul.f32 %v2746_v18, %v2746_v18  ;;  %v2448_v20 = vmul.f32 %v2214_v19, %v2214_v19 }
 0x22e   : > { %v3016_v49 = vadd.f32 %v3015_v6, %v2985_v43  ;;  %v2947_v1 = vadd.f32 %v4182_v31, %v2946_v35  ;;  %v3478_v54 = vpack.c.bf16 %v2209_v27, %v2206_v28  ;;  %3579 = vst [vmem:[%s5035_s14 + $0x78] sm:$0xff] %v3483_v47   ;;  %v4186_v29 = vpop.f32.mrf.mxu1  ;;  %v2447_v32 = vmul.f32 %v2209_v27, %v2209_v27 }
 0x22f   : > { %v2477_v61 = vadd.f32 %v2476_v5, %v2446_v23  ;;  %v2408_v33 = vadd.f32 %v2407_v42, %v2209_v27  ;;  %v3563_v56 = vpack.c.bf16 %v4186_v29, %v4185_v45  ;;  %v2449_v8 = vmul.f32 %v2217_v57, %v2217_v57 }
 0x230   : > { %v2948_v2 = vadd.f32 %v2947_v1, %v2746_v18  ;;  %v3017_v52 = vadd.f32 %v3016_v49, %v2986_v51  ;;  %3578 = vst [vmem:[%s5035_s14 + $0x70] sm:$0xff] %v3478_v54   ;;  %v2749_v21 = vpop.f32.mrf.mxu1  ;;  %v2989_v39 = vmul.f32 %v4185_v45, %v4185_v45  ;;  %v2990_v46 = vmul.f32 %v4186_v29, %v4186_v29 }
 0x231   : > { %v2409_v63 = vadd.f32 %v2408_v33, %v2214_v19  ;;  %v2478_v50 = vadd.f32 %v2477_v61, %v2447_v32  ;;  %3594 = vst [vmem:[%s5048_s17 + $0x78] sm:$0xff] %v3563_v56   ;;  %v3558_v7 = vpack.c.bf16 %v2749_v21, %v2746_v18  ;;  %v2988_v16 = vmul.f32 %v2749_v21, %v2749_v21 }
 0x232   : > { %v3018_v48 = vadd.f32 %v3017_v52, %v2987_v59  ;;  %v2949_v58 = vadd.f32 %v2948_v2, %v2749_v21 }
 0x233   : > { %v2410_v62 = vadd.f32 %v2409_v63, %v2217_v57  ;;  %v2479_v13 = vadd.f32 %v2478_v50, %v2448_v20  ;;  %3593 = vst [vmem:[%s5048_s17 + $0x70] sm:$0xff] %v3558_v7  }
 0x234   : > { %v2950_v30 = vadd.f32 %v4185_v45, %v2949_v58  ;;  %v3019_v36 = vadd.f32 %v3018_v48, %v2988_v16 }
 0x235   : > { %v2411_v55 = vrot.slane %v2410_v62, 4  ;;  %v2480_v17 = vadd.f32 %v2479_v13, %v2449_v8 }
 0x236   : > { %v2951_v11 = vadd.f32 %v4186_v29, %v2950_v30  ;;  %v3020_v44 = vadd.f32 %v3019_v36, %v2989_v39 }
 0x237   : > { %v2412_v38 = vadd.f32 %v2411_v55, %v2410_v62  ;;  %v2481_v31 = vrot.slane %v2480_v17, 4 }
 0x238   : > { %v2952_v26 = vrot.slane %v2951_v11, 4  ;;  %v3021_v34 = vadd.f32 %v3020_v44, %v2990_v46 }
 0x239   : > { %v2413_v41 = vrot.slane %v2412_v38, 2  ;;  %v2482_v10 = vadd.f32 %v2481_v31, %v2480_v17 }
 0x23a   : > { %v2953_v53 = vadd.f32 %v2952_v26, %v2951_v11  ;;  %v3022_v37 = vrot.slane %v3021_v34, 4 }
 0x23b   : > { %v2414_v40 = vadd.f32 %v2413_v41, %v2412_v38  ;;  %v2483_v60 = vrot.slane %v2482_v10, 2 }
 0x23c   : > { %v2954_v4 = vrot.slane %v2953_v53, 2  ;;  %v3023_v12 = vadd.f32 %v3022_v37, %v3021_v34 }
 0x23d   : > { %v2415_v22 = vrot.slane %v2414_v40, 1  ;;  %v2484_v19 = vadd.f32 %v2483_v60, %v2482_v10 }
 0x23e   : > { %v2955_v28 = vadd.f32 %v2954_v4, %v2953_v53  ;;  %v3024_v24 = vrot.slane %v3023_v12, 2 }
 0x23f   : > { %v2416_v9 = vadd.f32 %v2415_v22, %v2414_v40  ;;  %v2485_v0 = vrot.slane %v2484_v19, 1 }
 0x240   : > { %v2956_v3 = vrot.slane %v2955_v28, 1  ;;  %v3025_v14 = vadd.f32 %v3024_v24, %v3023_v12 }
 0x241   : > { %v2486_v15 = vadd.f32 %v2485_v0, %v2484_v19  ;;  %2417 = vst [vmem:[%s275_s24] sm:$0x1] %v2416_v9 }
 0x242   : > { %v2957_v45 = vadd.f32 %v2956_v3, %v2955_v28  ;;  %v3026_v25 = vrot.slane %v3025_v14, 1 }
 0x243   : > { %2487 = vst [vmem:[%s275_s24 + $0x1] sm:$0x1] %v2486_v15 }
 0x244   : > { %2958 = vst [vmem:[%s284_s27] sm:$0x1] %v2957_v45  ;;  %v3027_v57 = vadd.f32 %v3026_v25, %v3025_v14 }
 0x246   : > { %3028 = vst [vmem:[%s284_s27 + $0x1] sm:$0x1] %v3027_v57 }
 0x247 PF: > { %s17_s21 = sadd.s32 1, %s4283_s21  }
 0x248   : > { %p14_p4 = scmp.ge.s32.totalorder %s17_s21, 4  }
 0x24a   :  { %16 = sbr.rel (!%p14_p4) target bundleno = 1 (0x1), region = 100 }

</bundles_post_ra>
